<compile_context>
chip_gen: v7x
topology: tpu7x:2x2x1
jax: 0.10.0
libtpu: 0.0.40
codegen_flags: <defaults>
</compile_context>

<pallas_src>
import functools

import jax
import jax.numpy as jnp
from jax.experimental import pallas as pl
from jax.experimental.pallas import tpu as pltpu

NZ = 100
NZ_PAD = 128          # lane/sublane-aligned padding of the 100-channel input
NGF = 64
NC = 512
BN_EPS = 1e-5


def _gen_fea_kernel(
    x_ref,
    w1_ref, b1_ref,
    w2_ref, b2_ref,
    w3_ref, b3_ref,
    w4_ref, b4_ref,
    w5_ref, bias5_ref,
    out_ref,
):
    """One (batch element, spatial tile) block through the folded conv chain.

    Channel-major: activations are (C, hw_tile), channels on the sublane axis,
    spatial positions lane-dense.  Each 1x1 conv is W(C_out, C_in) @ h(C_in, hw)
    on the MXU with f32 accumulation; BN scale is pre-folded into the weights,
    so only the per-channel shift + ReLU remain (f32), then recast to bf16.
    """
    h = x_ref[...]                                                    # (128, HWT) bf16

    # layer 1: conv(100 -> 512) + BN + ReLU
    h = jnp.dot(w1_ref[...], h, preferred_element_type=jnp.float32)   # (512, HWT)
    h = jnp.maximum(h + b1_ref[...], 0.0).astype(jnp.bfloat16)

    # layer 2: conv(512 -> 256) + BN + ReLU
    h = jnp.dot(w2_ref[...], h, preferred_element_type=jnp.float32)   # (256, HWT)
    h = jnp.maximum(h + b2_ref[...], 0.0).astype(jnp.bfloat16)

    # layer 3: conv(256 -> 128) + BN + ReLU
    h = jnp.dot(w3_ref[...], h, preferred_element_type=jnp.float32)   # (128, HWT)
    h = jnp.maximum(h + b3_ref[...], 0.0).astype(jnp.bfloat16)

    # layer 4: conv(128 -> 256) + BN + ReLU
    h = jnp.dot(w4_ref[...], h, preferred_element_type=jnp.float32)   # (256, HWT)
    h = jnp.maximum(h + b4_ref[...], 0.0).astype(jnp.bfloat16)

    # layer 5: conv(256 -> 512) with bias, no BN / no ReLU
    h = jnp.dot(w5_ref[...], h, preferred_element_type=jnp.float32)   # (512, HWT)
    out_ref[...] = (h + bias5_ref[...]).astype(out_ref.dtype)


def _const_spec(shape):
    # Whole-array block with a constant index_map: resident across the grid,
    # no per-step re-DMA.  Weights are bf16 (~0.75 MiB total), shifts tiny.
    assert len(shape) == 2
    return pl.BlockSpec(shape, lambda b, t: (0, 0))


def _choose_hw_tile(hw, n, requested):
    """Pick a lane-dense (multiple of 128) spatial tile.

    Clamped to the padded spatial extent; when the batch axis alone can't give
    the megacore (v7x) >= 2 grid steps, the hw axis is split instead.
    """
    hw_ceil = ((hw + 127) // 128) * 128
    tile = max(128, min((requested // 128) * 128, hw_ceil))
    if n < 2 and hw_ceil // tile < 2 and hw_ceil >= 256:
        tile = max(128, ((hw_ceil // 2) // 128) * 128)
    return tile


def _vmem_limit_bytes(tile, out_bytes):
    """VMEM budget derived from the actual buffers at this tile size.

    v7x has 64 MiB physical VMEM (vs 128 MiB on v5e/v6e), so the limit is
    computed, not hard-coded, and clamped well under 64 MiB.
    """
    x_bufs = 2 * NZ_PAD * tile * 2                       # dbl-buffered bf16 input tile
    out_bufs = 2 * NC * tile * out_bytes                 # dbl-buffered output tile
    w_elems = (NGF * 8 * NZ_PAD + NGF * 4 * NGF * 8 + NGF * 2 * NGF * 4
               + NGF * 4 * NGF * 2 + NC * NGF * 4)
    w_bufs = 2 * w_elems * 2                             # bf16 weights (2 bufs allocated)
    interm = 6 * NC * tile * 4                           # generous bound on live f32 temps
    total = x_bufs + out_bufs + w_bufs + interm + (8 << 20)  # + Mosaic internal scratch
    return int(min(max(total, 32 << 20), 56 << 20))


@functools.partial(jax.jit, static_argnames=("hw_tile", "out_dtype"))
def generator_fea_forward(x_nchw, params, hw_tile=1024, out_dtype=jnp.float32):
    """Runs Generator_fea.forward on an NCHW float32 input.

    `params` comes from `fold_params`: bf16 BN-folded (C_out, C_in) weights
    plus f32 (C_out, 1) shift / bias vectors.  `out_dtype=jnp.bfloat16` halves
    the HBM writeback (recommended on v6e if downstream tolerates bf16).
    """
    n, c_in, h, w = x_nchw.shape
    assert c_in == NZ
    hw = h * w

    # Cast to bf16 FIRST so every wrapper-side layout/pad pass moves half the bytes.
    x = x_nchw.astype(jnp.bfloat16).reshape(n, c_in, hw)
    # Pad input channels 100 -> 128 (w1 columns are zero-padded to match).
    x = jnp.pad(x, ((0, 0), (0, NZ_PAD - NZ), (0, 0)))

    tile = _choose_hw_tile(hw, n, hw_tile)
    hw_pad = pl.cdiv(hw, tile) * tile
    if hw_pad != hw:
        x = jnp.pad(x, ((0, 0), (0, 0), (0, hw_pad - hw)))

    grid = (n, hw_pad // tile)
    out_bytes = jnp.dtype(out_dtype).itemsize

    in_specs = [
        pl.BlockSpec((None, NZ_PAD, tile), lambda b, t: (b, 0, t)),
        _const_spec(params["w1"].shape), _const_spec(params["b1"].shape),
        _const_spec(params["w2"].shape), _const_spec(params["b2"].shape),
        _const_spec(params["w3"].shape), _const_spec(params["b3"].shape),
        _const_spec(params["w4"].shape), _const_spec(params["b4"].shape),
        _const_spec(params["w5"].shape), _const_spec(params["bias5"].shape),
    ]

    out = pl.pallas_call(
        _gen_fea_kernel,
        out_shape=jax.ShapeDtypeStruct((n, NC, hw_pad), out_dtype),
        grid_spec=pl.GridSpec(
            grid=grid,
            in_specs=in_specs,
            out_specs=pl.BlockSpec((None, NC, tile), lambda b, t: (b, 0, t)),
        ),
        compiler_params=pltpu.CompilerParams(
            dimension_semantics=("parallel", "parallel"),   # megacore sharding on v7x
            vmem_limit_bytes=_vmem_limit_bytes(tile, out_bytes),
        ),
    )(
        x,
        params["w1"], params["b1"],
        params["w2"], params["b2"],
        params["w3"], params["b3"],
        params["w4"], params["b4"],
        params["w5"], params["bias5"],
    )

    # Drop spatial padding (no-op when hw % tile == 0) and restore NCHW.
    return out[:, :, :hw].reshape(n, NC, h, w)


def init_raw_params(key):
    """Deterministic synthetic parameters matching the PyTorch module shapes.

    Conv2d(in, out, 1, 1, 0) weight (out, in, 1, 1) is stored as (out, in).
    BatchNorm2d(out) has gamma/beta and running stats (eval mode:
    running_mean=0, running_var=1).
    """
    dims = [
        (NZ, NGF * 8),        # conv1: 100 -> 512
        (NGF * 8, NGF * 4),   # conv2: 512 -> 256
        (NGF * 4, NGF * 2),   # conv3: 256 -> 128
        (NGF * 2, NGF * 4),   # conv4: 128 -> 256
        (NGF * 4, NC),        # conv5: 256 -> 512 (bias=True)
    ]
    params = {}
    keys = jax.random.split(key, 16)
    ki = 0
    for li, (cin, cout) in enumerate(dims, start=1):
        params[f"w{li}"] = 0.02 * jax.random.normal(keys[ki], (cout, cin), jnp.float32)
        ki += 1
        if li < 5:
            params[f"gamma{li}"] = 1.0 + 0.1 * jax.random.normal(keys[ki], (cout,), jnp.float32); ki += 1
            params[f"beta{li}"] = 0.1 * jax.random.normal(keys[ki], (cout,), jnp.float32); ki += 1
            params[f"mean{li}"] = jnp.zeros((cout,), jnp.float32)
            params[f"var{li}"] = jnp.ones((cout,), jnp.float32)
    params["bias5"] = 0.1 * jax.random.normal(keys[ki], (NC,), jnp.float32)
    return params


def fold_params(raw):
    """Fold eval-mode BN into the conv weights, pad w1 cols to 128, cast bf16."""
    folded = {}
    for li in range(1, 5):
        scale = raw[f"gamma{li}"] / jnp.sqrt(raw[f"var{li}"] + BN_EPS)     # (cout,)
        shift = raw[f"beta{li}"] - raw[f"mean{li}"] * scale
        w = raw[f"w{li}"] * scale[:, None]                                 # row-wise fold (f32)
        if li == 1:
            w = jnp.pad(w, ((0, 0), (0, NZ_PAD - NZ)))                     # 100 -> 128 cols, zeros
        folded[f"w{li}"] = w.astype(jnp.bfloat16)
        folded[f"b{li}"] = shift.reshape(-1, 1)                            # (cout, 1) f32
    folded["w5"] = raw["w5"].astype(jnp.bfloat16)
    folded["bias5"] = raw["bias5"].reshape(-1, 1)                          # (512, 1) f32
    return folded


def _reference_forward(x_nchw, raw):
    """Pure-JAX f32 reference of the module (eval-mode BN) semantics."""
    n, c, h, w = x_nchw.shape
    x = x_nchw.reshape(n, c, h * w).astype(jnp.float32)
    for li in range(1, 5):
        scale = raw[f"gamma{li}"] / jnp.sqrt(raw[f"var{li}"] + BN_EPS)
        shift = raw[f"beta{li}"] - raw[f"mean{li}"] * scale
        x = jnp.einsum("oi,niw->now", raw[f"w{li}"], x)
        x = jnp.maximum(x * scale[None, :, None] + shift[None, :, None], 0.0)
    x = jnp.einsum("oi,niw->now", raw["w5"], x) + raw["bias5"][None, :, None]
    return x.reshape(n, NC, h, w)


if __name__ == "__main__":
    key = jax.random.PRNGKey(0)
    pkey, xkey = jax.random.split(key)

    raw = init_raw_params(pkey)
    params = fold_params(raw)

    # small example input consistent with the module: NCHW, C = nz = 100
    N, H, W = 2, 4, 4
    x = jax.random.normal(xkey, (N, NZ, H, W), jnp.float32)

    ref = _reference_forward(x, raw)

    # default f32 output
    out = jax.block_until_ready(generator_fea_forward(x, params))
    assert out.shape == (N, NC, H, W), out.shape
    max_err = float(jnp.max(jnp.abs(out - ref)))
    assert jnp.allclose(out, ref, atol=3e-2, rtol=3e-2), f"mismatch vs reference (max abs err {max_err})"

    # bf16-output path (v6e writeback optimization) — looser tolerance
    out_b = jax.block_until_ready(generator_fea_forward(x, params, out_dtype=jnp.bfloat16))
    assert out_b.shape == (N, NC, H, W), out_b.shape
    assert jnp.allclose(out_b.astype(jnp.float32), ref, atol=7.5e-2, rtol=7.5e-2)

    print("KERNEL_OK")
</pallas_src>

<mosaic_0001>
module attributes {stable_mosaic.version = 11 : i64} {
  func.func @_gen_fea_kernel(%arg0: i32, %arg1: i32, %arg2: memref<1x128x128xbf16, #tpu.memory_space<vmem>>, %arg3: memref<512x128xbf16, #tpu.memory_space<vmem>>, %arg4: memref<512x1xf32, #tpu.memory_space<vmem>>, %arg5: memref<256x512xbf16, #tpu.memory_space<vmem>>, %arg6: memref<256x1xf32, #tpu.memory_space<vmem>>, %arg7: memref<128x256xbf16, #tpu.memory_space<vmem>>, %arg8: memref<128x1xf32, #tpu.memory_space<vmem>>, %arg9: memref<256x128xbf16, #tpu.memory_space<vmem>>, %arg10: memref<256x1xf32, #tpu.memory_space<vmem>>, %arg11: memref<512x256xbf16, #tpu.memory_space<vmem>>, %arg12: memref<512x1xf32, #tpu.memory_space<vmem>>, %arg13: memref<1x512x128xf32, #tpu.memory_space<vmem>>) attributes {dimension_semantics = [#tpu.dimension_semantics<parallel>, #tpu.dimension_semantics<parallel>], iteration_bounds = array<i64: 2, 1>, scalar_prefetch = 0 : i64, scratch_operands = 0 : i64, tpu.core_type = #tpu.core_type<tc>, window_params = [{transform_indices = @transform_0, window_bounds = array<i64: 1, 128, 128>}, {pipeline_mode = #tpu.pipeline_mode<synchronous>, transform_indices = @transform_1, window_bounds = array<i64: 512, 128>}, {pipeline_mode = #tpu.pipeline_mode<synchronous>, transform_indices = @transform_2, window_bounds = array<i64: 512, 1>}, {pipeline_mode = #tpu.pipeline_mode<synchronous>, transform_indices = @transform_3, window_bounds = array<i64: 256, 512>}, {pipeline_mode = #tpu.pipeline_mode<synchronous>, transform_indices = @transform_4, window_bounds = array<i64: 256, 1>}, {pipeline_mode = #tpu.pipeline_mode<synchronous>, transform_indices = @transform_5, window_bounds = array<i64: 128, 256>}, {pipeline_mode = #tpu.pipeline_mode<synchronous>, transform_indices = @transform_6, window_bounds = array<i64: 128, 1>}, {pipeline_mode = #tpu.pipeline_mode<synchronous>, transform_indices = @transform_7, window_bounds = array<i64: 256, 128>}, {pipeline_mode = #tpu.pipeline_mode<synchronous>, transform_indices = @transform_8, window_bounds = array<i64: 256, 1>}, {pipeline_mode = #tpu.pipeline_mode<synchronous>, transform_indices = @transform_9, window_bounds = array<i64: 512, 256>}, {pipeline_mode = #tpu.pipeline_mode<synchronous>, transform_indices = @transform_10, window_bounds = array<i64: 512, 1>}, {transform_indices = @transform_11, window_bounds = array<i64: 1, 512, 128>}]} {
    %c0 = arith.constant 0 : index
    %c0_0 = arith.constant 0 : index
    %c0_1 = arith.constant 0 : index
    %0 = vector.load %arg2[%c0, %c0_0, %c0_1] : memref<1x128x128xbf16, #tpu.memory_space<vmem>>, vector<1x128x128xbf16>
    %1 = vector.shape_cast %0 : vector<1x128x128xbf16> to vector<128x128xbf16>
    %c0_2 = arith.constant 0 : index
    %c0_3 = arith.constant 0 : index
    %2 = vector.load %arg3[%c0_2, %c0_3] : memref<512x128xbf16, #tpu.memory_space<vmem>>, vector<512x128xbf16>
    %cst = arith.constant dense<0.000000e+00> : vector<512x128xf32>
    %3 = tpu.matmul %2, %1, %cst {dimension_numbers = #tpu.dot_dimension_numbers<[1], [0], [0], [1], [0, 0, 1, 1], [], []>} : vector<512x128xbf16>, vector<128x128xbf16>, vector<512x128xf32> -> vector<512x128xf32>
    %c0_4 = arith.constant 0 : index
    %c0_5 = arith.constant 0 : index
    %4 = vector.load %arg4[%c0_4, %c0_5] : memref<512x1xf32, #tpu.memory_space<vmem>>, vector<512x1xf32>
    %5 = vector.broadcast %4 : vector<512x1xf32> to vector<512x128xf32>
    %6 = arith.addf %3, %5 : vector<512x128xf32>
    %cst_6 = arith.constant 0.000000e+00 : f32
    %7 = vector.broadcast %cst_6 : f32 to vector<512x128xf32>
    %8 = arith.maximumf %6, %7 : vector<512x128xf32>
    %9 = arith.truncf %8 : vector<512x128xf32> to vector<512x128xbf16>
    %c0_7 = arith.constant 0 : index
    %c0_8 = arith.constant 0 : index
    %10 = vector.load %arg5[%c0_7, %c0_8] : memref<256x512xbf16, #tpu.memory_space<vmem>>, vector<256x512xbf16>
    %cst_9 = arith.constant dense<0.000000e+00> : vector<256x128xf32>
    %11 = tpu.matmul %10, %9, %cst_9 {dimension_numbers = #tpu.dot_dimension_numbers<[1], [0], [0], [1], [0, 0, 1, 1], [], []>} : vector<256x512xbf16>, vector<512x128xbf16>, vector<256x128xf32> -> vector<256x128xf32>
    %c0_10 = arith.constant 0 : index
    %c0_11 = arith.constant 0 : index
    %12 = vector.load %arg6[%c0_10, %c0_11] : memref<256x1xf32, #tpu.memory_space<vmem>>, vector<256x1xf32>
    %13 = vector.broadcast %12 : vector<256x1xf32> to vector<256x128xf32>
    %14 = arith.addf %11, %13 : vector<256x128xf32>
    %cst_12 = arith.constant 0.000000e+00 : f32
    %15 = vector.broadcast %cst_12 : f32 to vector<256x128xf32>
    %16 = arith.maximumf %14, %15 : vector<256x128xf32>
    %17 = arith.truncf %16 : vector<256x128xf32> to vector<256x128xbf16>
    %c0_13 = arith.constant 0 : index
    %c0_14 = arith.constant 0 : index
    %18 = vector.load %arg7[%c0_13, %c0_14] : memref<128x256xbf16, #tpu.memory_space<vmem>>, vector<128x256xbf16>
    %cst_15 = arith.constant dense<0.000000e+00> : vector<128x128xf32>
    %19 = tpu.matmul %18, %17, %cst_15 {dimension_numbers = #tpu.dot_dimension_numbers<[1], [0], [0], [1], [0, 0, 1, 1], [], []>} : vector<128x256xbf16>, vector<256x128xbf16>, vector<128x128xf32> -> vector<128x128xf32>
    %c0_16 = arith.constant 0 : index
    %c0_17 = arith.constant 0 : index
    %20 = vector.load %arg8[%c0_16, %c0_17] : memref<128x1xf32, #tpu.memory_space<vmem>>, vector<128x1xf32>
    %21 = vector.broadcast %20 : vector<128x1xf32> to vector<128x128xf32>
    %22 = arith.addf %19, %21 : vector<128x128xf32>
    %cst_18 = arith.constant 0.000000e+00 : f32
    %23 = vector.broadcast %cst_18 : f32 to vector<128x128xf32>
    %24 = arith.maximumf %22, %23 : vector<128x128xf32>
    %25 = arith.truncf %24 : vector<128x128xf32> to vector<128x128xbf16>
    %c0_19 = arith.constant 0 : index
    %c0_20 = arith.constant 0 : index
    %26 = vector.load %arg9[%c0_19, %c0_20] : memref<256x128xbf16, #tpu.memory_space<vmem>>, vector<256x128xbf16>
    %cst_21 = arith.constant dense<0.000000e+00> : vector<256x128xf32>
    %27 = tpu.matmul %26, %25, %cst_21 {dimension_numbers = #tpu.dot_dimension_numbers<[1], [0], [0], [1], [0, 0, 1, 1], [], []>} : vector<256x128xbf16>, vector<128x128xbf16>, vector<256x128xf32> -> vector<256x128xf32>
    %c0_22 = arith.constant 0 : index
    %c0_23 = arith.constant 0 : index
    %28 = vector.load %arg10[%c0_22, %c0_23] : memref<256x1xf32, #tpu.memory_space<vmem>>, vector<256x1xf32>
    %29 = vector.broadcast %28 : vector<256x1xf32> to vector<256x128xf32>
    %30 = arith.addf %27, %29 : vector<256x128xf32>
    %cst_24 = arith.constant 0.000000e+00 : f32
    %31 = vector.broadcast %cst_24 : f32 to vector<256x128xf32>
    %32 = arith.maximumf %30, %31 : vector<256x128xf32>
    %33 = arith.truncf %32 : vector<256x128xf32> to vector<256x128xbf16>
    %c0_25 = arith.constant 0 : index
    %c0_26 = arith.constant 0 : index
    %34 = vector.load %arg11[%c0_25, %c0_26] : memref<512x256xbf16, #tpu.memory_space<vmem>>, vector<512x256xbf16>
    %cst_27 = arith.constant dense<0.000000e+00> : vector<512x128xf32>
    %35 = tpu.matmul %34, %33, %cst_27 {dimension_numbers = #tpu.dot_dimension_numbers<[1], [0], [0], [1], [0, 0, 1, 1], [], []>} : vector<512x256xbf16>, vector<256x128xbf16>, vector<512x128xf32> -> vector<512x128xf32>
    %c0_28 = arith.constant 0 : index
    %c0_29 = arith.constant 0 : index
    %36 = vector.load %arg12[%c0_28, %c0_29] : memref<512x1xf32, #tpu.memory_space<vmem>>, vector<512x1xf32>
    %37 = vector.broadcast %36 : vector<512x1xf32> to vector<512x128xf32>
    %38 = arith.addf %35, %37 : vector<512x128xf32>
    %c0_30 = arith.constant 0 : index
    %c0_31 = arith.constant 0 : index
    %c0_32 = arith.constant 0 : index
    %39 = vector.load %arg13[%c0_30, %c0_31, %c0_32] : memref<1x512x128xf32, #tpu.memory_space<vmem>>, vector<1x512x128xf32>
    %40 = vector.shape_cast %39 : vector<1x512x128xf32> to vector<512x128xf32>
    %41 = vector.shape_cast %38 : vector<512x128xf32> to vector<1x512x128xf32>
    tpu.vector_store %arg13[%c0_30, %c0_31, %c0_32], %41 {strides = array<i32>} : memref<1x512x128xf32, #tpu.memory_space<vmem>>, vector<1x512x128xf32>,
    return
  }
  func.func @transform_0(%arg0: i32, %arg1: i32) -> (i32, i32, i32) {
    %c0_i32 = arith.constant 0 : i32
    %c0_i32_0 = arith.constant 0 : i32
    return %arg0, %c0_i32, %arg1 : i32, i32, i32
  }
  func.func @transform_1(%arg0: i32, %arg1: i32) -> (i32, i32) {
    %c0_i32 = arith.constant 0 : i32
    %c0_i32_0 = arith.constant 0 : i32
    %c0_i32_1 = arith.constant 0 : i32
    return %c0_i32, %c0_i32_0 : i32, i32
  }
  func.func @transform_2(%arg0: i32, %arg1: i32) -> (i32, i32) {
    %c0_i32 = arith.constant 0 : i32
    %c0_i32_0 = arith.constant 0 : i32
    %c0_i32_1 = arith.constant 0 : i32
    return %c0_i32, %c0_i32_0 : i32, i32
  }
  func.func @transform_3(%arg0: i32, %arg1: i32) -> (i32, i32) {
    %c0_i32 = arith.constant 0 : i32
    %c0_i32_0 = arith.constant 0 : i32
    %c0_i32_1 = arith.constant 0 : i32
    return %c0_i32, %c0_i32_0 : i32, i32
  }
  func.func @transform_4(%arg0: i32, %arg1: i32) -> (i32, i32) {
    %c0_i32 = arith.constant 0 : i32
    %c0_i32_0 = arith.constant 0 : i32
    %c0_i32_1 = arith.constant 0 : i32
    return %c0_i32, %c0_i32_0 : i32, i32
  }
  func.func @transform_5(%arg0: i32, %arg1: i32) -> (i32, i32) {
    %c0_i32 = arith.constant 0 : i32
    %c0_i32_0 = arith.constant 0 : i32
    %c0_i32_1 = arith.constant 0 : i32
    return %c0_i32, %c0_i32_0 : i32, i32
  }
  func.func @transform_6(%arg0: i32, %arg1: i32) -> (i32, i32) {
    %c0_i32 = arith.constant 0 : i32
    %c0_i32_0 = arith.constant 0 : i32
    %c0_i32_1 = arith.constant 0 : i32
    return %c0_i32, %c0_i32_0 : i32, i32
  }
  func.func @transform_7(%arg0: i32, %arg1: i32) -> (i32, i32) {
    %c0_i32 = arith.constant 0 : i32
    %c0_i32_0 = arith.constant 0 : i32
    %c0_i32_1 = arith.constant 0 : i32
    return %c0_i32, %c0_i32_0 : i32, i32
  }
  func.func @transform_8(%arg0: i32, %arg1: i32) -> (i32, i32) {
    %c0_i32 = arith.constant 0 : i32
    %c0_i32_0 = arith.constant 0 : i32
    %c0_i32_1 = arith.constant 0 : i32
    return %c0_i32, %c0_i32_0 : i32, i32
  }
  func.func @transform_9(%arg0: i32, %arg1: i32) -> (i32, i32) {
    %c0_i32 = arith.constant 0 : i32
    %c0_i32_0 = arith.constant 0 : i32
    %c0_i32_1 = arith.constant 0 : i32
    return %c0_i32, %c0_i32_0 : i32, i32
  }
  func.func @transform_10(%arg0: i32, %arg1: i32) -> (i32, i32) {
    %c0_i32 = arith.constant 0 : i32
    %c0_i32_0 = arith.constant 0 : i32
    %c0_i32_1 = arith.constant 0 : i32
    return %c0_i32, %c0_i32_0 : i32, i32
  }
  func.func @transform_11(%arg0: i32, %arg1: i32) -> (i32, i32, i32) {
    %c0_i32 = arith.constant 0 : i32
    %c0_i32_0 = arith.constant 0 : i32
    return %arg0, %c0_i32, %arg1 : i32, i32, i32
  }
}

</mosaic_0001>

<bundles_post_ra>
// kernel: generator_fea_forward.1
= control target key start
LH: loop header
LB: loop body
LE: loop exit
PB: predicated region body
PF: predicated region fallthrough
CT: control target
= control target key end

     0   :  { %s5577_s17 = smov 0   ;;  %s5579_s18 = smov 0   ;;  %s7394_s0 = inlined_call_operand.vmem [shape: bf16[2,128,128], index: 0, kind: input, shape index: {}]   ;;  %s7395_s1 = inlined_call_operand.vmem [shape: bf16[512,128], index: 1, kind: input, shape index: {}]   ;;  %s7396_s2 = inlined_call_operand.vmem [shape: f32[512,1], index: 2, kind: input, shape index: {}]   ;;  %s7397_s3 = inlined_call_operand.vmem [shape: bf16[256,512], index: 3, kind: input, shape index: {}]   ;;  %s7398_s4 = inlined_call_operand.vmem [shape: f32[256,1], index: 4, kind: input, shape index: {}]   ;;  %s7399_s5 = inlined_call_operand.vmem [shape: bf16[128,256], index: 5, kind: input, shape index: {}]   ;;  %s7400_s6 = inlined_call_operand.vmem [shape: f32[128,1], index: 6, kind: input, shape index: {}]   ;;  %s7401_s7 = inlined_call_operand.vmem [shape: bf16[256,128], index: 7, kind: input, shape index: {}]   ;;  %s7402_s8 = inlined_call_operand.vmem [shape: f32[256,1], index: 8, kind: input, shape index: {}]   ;;  %s7403_s9 = inlined_call_operand.vmem [shape: bf16[512,256], index: 9, kind: input, shape index: {}]   ;;  %s7404_s10 = inlined_call_operand.vmem [shape: f32[512,1], index: 10, kind: input, shape index: {}]   ;;  %s7405_s11 = inlined_call_operand.vmem [shape: f32[2,512,128], index: 11, kind: output, shape index: {}]  }
   0x1   :  { %s5581_s19 = smov 0  }
   0x2 LB: > { %s33_s20 = sadd.s32 1, %s5510_s18  ;;  %p4504_p0 = scmp.ge.s32.totalorder %s5514_s19, 1  ;;  %s5514_s19 = sphi %s5581_s19, %s21_s19   ;;  %s5510_s18 = sphi %s5579_s18, %s7463_s18   ;;  %s5506_s17 = sphi %s5577_s17, %s7462_s17  }
   0x3   : > { %p35_p1 = scmp.ge.s32.totalorder %s33_s20, 2  ;;  %p356_p2 = scmp.lt.s32.totalorder %s5514_s19, 3 }
   0x5   : > { %s7465_s20 = smov (%p35_p1, %s33_s20), 0  ;;  %p357_p3 = pnand %p4504_p0, %p356_p2 }
   0x7   : > { %360 = sbr.rel (%p357_p3) target bundleno = 1781 (0x6f5), region = 64 }
   0xe   : > { %v515_v0 = vld [vmem:[%s7396_s2 + $0x80] sm:$0xff]  ;;  %p402_p4 = scmp.lt.s32.totalorder %s5506_s17, 1  ;;  %v7406_v2 = vmov 0   ;;  %v516_v3 = vld [vmem:[%s7396_s2 + $0x88] sm:$0xff]  ;;  %v517_v12 = vld [vmem:[%s7396_s2 + $0x90] sm:$0xff] }
   0xf   : > { %v499_v1 = vld [vmem:[%s7396_s2] sm:$0xff]  ;;  %5219 = vset.pattern.permute.xlu1 %v7406_v2  ;;  %5218 = vset.pattern.permute.xlu0 %v7406_v2  ;;  %v500_v4 = vld [vmem:[%s7396_s2 + $0x8] sm:$0xff]  ;;  %v518_v13 = vld [vmem:[%s7396_s2 + $0x98] sm:$0xff] }
  0x10   : > { %645 = vperm.xlu0 %5218, %v515_v0   ;;  %565 = vperm.xlu1 %5219, %v499_v1   ;;  %s7467_s17 = smov (!%p402_p4, %s5506_s17), 1  ;;  %v547_v5 = vld [vmem:[%s7396_s2 + $0x180] sm:$0xff]  ;;  %v548_v6 = vld [vmem:[%s7396_s2 + $0x188] sm:$0xff]  ;;  %v501_v16 = vld [vmem:[%s7396_s2 + $0x10] sm:$0xff] }
  0x11   : > { %s4711_s29 = sshll.u32 %s7467_s17, 6  ;;  %v531_v9 = vld [vmem:[%s7396_s2 + $0x100] sm:$0xff]  ;;  %v532_v10 = vld [vmem:[%s7396_s2 + $0x108] sm:$0xff]  ;;  %v502_v17 = vld [vmem:[%s7396_s2 + $0x18] sm:$0xff]  ;;  %s4712_s28 = sshll.u32 %s7467_s17, 9 }
  0x12   : > { %s5615_s13 = scalar_lea.vmem %s7394_s0, %s4711_s29  ;;  %v5228_v15 = vld [vmem:[%s7395_s1] sm:$0xff]   ;;  %v549_v19 = vld [vmem:[%s7396_s2 + $0x190] sm:$0xff]  ;;  %v550_v20 = vld [vmem:[%s7396_s2 + $0x198] sm:$0xff]  ;;  %s7292_s12 = scalar_lea.vmem %s7405_s11, %s4712_s28 }
  0x13   : > { %v5220_v7 = vld [vmem:[%s5615_s13] sm:$0xff]   ;;  %v5221_v8 = vld [vmem:[%s5615_s13 + $0x8] sm:$0xff]   ;;  %v5222_v11 = vld [vmem:[%s5615_s13 + $0x10] sm:$0xff]   ;;  %5081 = vmatprep.mubr.bf16.mxu1 %v5228_v15 }
  0x14   : > { %650 = vperm.xlu0 %5218, %v516_v3   ;;  %570 = vperm.xlu1 %5219, %v500_v4   ;;  %v5223_v14 = vld [vmem:[%s5615_s13 + $0x18] sm:$0xff]   ;;  %v5224_v18 = vld [vmem:[%s5615_s13 + $0x20] sm:$0xff]   ;;  %v5225_v21 = vld [vmem:[%s5615_s13 + $0x28] sm:$0xff]  }
  0x15   : > { %5065 = vmatprep.subr.bf16.mxu1 %v5220_v7  ;;  %v533_v22 = vld [vmem:[%s7396_s2 + $0x110] sm:$0xff]  ;;  %v534_v23 = vld [vmem:[%s7396_s2 + $0x118] sm:$0xff]  ;;  %v519_v25 = vld [vmem:[%s7396_s2 + $0xa0] sm:$0xff] }
  0x16   : > { %5066 = vmatpush3.bf16.msra.mxu1 %v5220_v7  ;;  %v5226_v24 = vld [vmem:[%s5615_s13 + $0x30] sm:$0xff]   ;;  %v520_v26 = vld [vmem:[%s7396_s2 + $0xa8] sm:$0xff]  ;;  %v5227_v27 = vld [vmem:[%s5615_s13 + $0x38] sm:$0xff]  }
  0x17   : > { %5067 = vmatprep.subr.bf16.mxu1 %v5221_v8  ;;  %v503_v28 = vld [vmem:[%s7396_s2 + $0x20] sm:$0xff]  ;;  %v504_v29 = vld [vmem:[%s7396_s2 + $0x28] sm:$0xff]  ;;  %v5230_v31 = vld [vmem:[%s7395_s1 + $0x10] sm:$0xff]  }
  0x18   : > { %805 = vperm.xlu0 %5218, %v547_v5   ;;  %810 = vperm.xlu1 %5219, %v548_v6   ;;  %v5229_v30 = vld [vmem:[%s7395_s1 + $0x8] sm:$0xff]   ;;  %v551_v32 = vld [vmem:[%s7396_s2 + $0x1a0] sm:$0xff]  ;;  %v5231_v36 = vld [vmem:[%s7395_s1 + $0x18] sm:$0xff]  }
  0x19   : > { %v552_v33 = vld [vmem:[%s7396_s2 + $0x1a8] sm:$0xff]  ;;  %v535_v34 = vld [vmem:[%s7396_s2 + $0x120] sm:$0xff]  ;;  %v521_v38 = vld [vmem:[%s7396_s2 + $0xb0] sm:$0xff] }
  0x1a   : > { %5068 = vmatpush3.bf16.msra.mxu1 %v5221_v8  ;;  %v536_v35 = vld [vmem:[%s7396_s2 + $0x128] sm:$0xff]  ;;  %v5232_v37 = vld [vmem:[%s7395_s1 + $0x20] sm:$0xff]   ;;  %v522_v39 = vld [vmem:[%s7396_s2 + $0xb8] sm:$0xff] }
  0x1b   : > { %5069 = vmatprep.subr.bf16.mxu1 %v5222_v11  ;;  %v505_v40 = vld [vmem:[%s7396_s2 + $0x30] sm:$0xff]  ;;  %v506_v41 = vld [vmem:[%s7396_s2 + $0x38] sm:$0xff]  ;;  %v5233_v42 = vld [vmem:[%s7395_s1 + $0x28] sm:$0xff]  }
  0x1c   : > { %725 = vperm.xlu0 %5218, %v531_v9   ;;  %730 = vperm.xlu1 %5219, %v532_v10   ;;  %v5234_v43 = vld [vmem:[%s7395_s1 + $0x30] sm:$0xff]   ;;  %v554_v45 = vld [vmem:[%s7396_s2 + $0x1b8] sm:$0xff]  ;;  %v5236_v49 = vld [vmem:[%s7395_s1 + $0x40] sm:$0xff]  }
  0x1d   : > { %v553_v44 = vld [vmem:[%s7396_s2 + $0x1b0] sm:$0xff]  ;;  %v538_v47 = vld [vmem:[%s7396_s2 + $0x138] sm:$0xff]  ;;  %v523_v50 = vld [vmem:[%s7396_s2 + $0xc0] sm:$0xff] }
  0x1e   : > { %5070 = vmatpush3.bf16.msra.mxu1 %v5222_v11  ;;  %v537_v46 = vld [vmem:[%s7396_s2 + $0x130] sm:$0xff]  ;;  %v5235_v48 = vld [vmem:[%s7395_s1 + $0x38] sm:$0xff]   ;;  %v524_v51 = vld [vmem:[%s7396_s2 + $0xc8] sm:$0xff] }
  0x1f   : > { %5071 = vmatprep.subr.bf16.mxu1 %v5223_v14  ;;  %v507_v52 = vld [vmem:[%s7396_s2 + $0x40] sm:$0xff]  ;;  %v508_v53 = vld [vmem:[%s7396_s2 + $0x48] sm:$0xff]  ;;  %v5238_v55 = vld [vmem:[%s7395_s1 + $0x50] sm:$0xff]  }
  0x20   : > { %655 = vperm.xlu0 %5218, %v517_v12   ;;  %660 = vperm.xlu1 %5219, %v518_v13   ;;  %v5237_v54 = vld [vmem:[%s7395_s1 + $0x48] sm:$0xff]   ;;  %v555_v56 = vld [vmem:[%s7396_s2 + $0x1c0] sm:$0xff]  ;;  %v5239_v60 = vld [vmem:[%s7395_s1 + $0x58] sm:$0xff]  }
  0x21   : > { %v556_v57 = vld [vmem:[%s7396_s2 + $0x1c8] sm:$0xff]  ;;  %v539_v58 = vld [vmem:[%s7396_s2 + $0x140] sm:$0xff]  ;;  %v525_v61 = vld [vmem:[%s7396_s2 + $0xd0] sm:$0xff] }
  0x22   : > { %5072 = vmatpush3.bf16.msra.mxu1 %v5223_v14  ;;  %v540_v59 = vld [vmem:[%s7396_s2 + $0x148] sm:$0xff]  ;;  %v526_v62 = vld [vmem:[%s7396_s2 + $0xd8] sm:$0xff]  ;;  %v5240_v63 = vld [vmem:[%s7395_s1 + $0x60] sm:$0xff]  }
  0x23   : > { %5073 = vmatprep.subr.bf16.mxu1 %v5224_v18  ;;  %v509_v0 = vld [vmem:[%s7396_s2 + $0x50] sm:$0xff]  ;;  %v510_v1 = vld [vmem:[%s7396_s2 + $0x58] sm:$0xff]  ;;  %v5241_v3 = vld [vmem:[%s7395_s1 + $0x68] sm:$0xff]  }
  0x24   : > { %575 = vperm.xlu0 %5218, %v501_v16   ;;  %580 = vperm.xlu1 %5219, %v502_v17   ;;  %v557_v4 = vld [vmem:[%s7396_s2 + $0x1d0] sm:$0xff]  ;;  %v558_v5 = vld [vmem:[%s7396_s2 + $0x1d8] sm:$0xff]  ;;  %v527_v10 = vld [vmem:[%s7396_s2 + $0xe0] sm:$0xff] }
  0x25   : > { %v5242_v6 = vld [vmem:[%s7395_s1 + $0x70] sm:$0xff]   ;;  %v542_v8 = vld [vmem:[%s7396_s2 + $0x158] sm:$0xff]  ;;  %v528_v11 = vld [vmem:[%s7396_s2 + $0xe8] sm:$0xff] }
  0x26   : > { %5074 = vmatpush3.bf16.msra.mxu1 %v5224_v18  ;;  %v541_v7 = vld [vmem:[%s7396_s2 + $0x150] sm:$0xff]  ;;  %v5243_v9 = vld [vmem:[%s7395_s1 + $0x78] sm:$0xff]   ;;  %v5244_v12 = vld [vmem:[%s7395_s1 + $0x80] sm:$0xff]  }
  0x27   : > { %5075 = vmatprep.subr.bf16.mxu1 %v5225_v21  ;;  %v511_v13 = vld [vmem:[%s7396_s2 + $0x60] sm:$0xff]  ;;  %v512_v14 = vld [vmem:[%s7396_s2 + $0x68] sm:$0xff]  ;;  %v5246_v18 = vld [vmem:[%s7395_s1 + $0x90] sm:$0xff]  }
  0x28   : > { %815 = vperm.xlu0 %5218, %v549_v19   ;;  %820 = vperm.xlu1 %5219, %v550_v20   ;;  %v5245_v15 = vld [vmem:[%s7395_s1 + $0x88] sm:$0xff]   ;;  %v559_v16 = vld [vmem:[%s7396_s2 + $0x1e0] sm:$0xff] }
  0x29   : > { %v560_v17 = vld [vmem:[%s7396_s2 + $0x1e8] sm:$0xff]  ;;  %v543_v19 = vld [vmem:[%s7396_s2 + $0x160] sm:$0xff] }
  0x2a   : > { %5076 = vmatpush3.bf16.msra.mxu1 %v5225_v21  ;;  %v544_v20 = vld [vmem:[%s7396_s2 + $0x168] sm:$0xff]  ;;  %v5247_v21 = vld [vmem:[%s7395_s1 + $0x98] sm:$0xff]  }
  0x2b   : > { %5077 = vmatprep.subr.bf16.mxu1 %v5226_v24 }
  0x2c   : > { %735 = vperm.xlu0 %5218, %v533_v22   ;;  %740 = vperm.xlu1 %5219, %v534_v23   ;;  %v529_v22 = vld [vmem:[%s7396_s2 + $0xf0] sm:$0xff]  ;;  %v530_v23 = vld [vmem:[%s7396_s2 + $0xf8] sm:$0xff] }
  0x2e   : > { %5078 = vmatpush3.bf16.msra.mxu1 %v5226_v24  ;;  %v5248_v24 = vld [vmem:[%s7395_s1 + $0xa0] sm:$0xff]  }
  0x2f   : > { %5079 = vmatprep.subr.bf16.mxu1 %v5227_v27 }
  0x30   : > { %665 = vperm.xlu0 %5218, %v519_v25   ;;  %670 = vperm.xlu1 %5219, %v520_v26   ;;  %v513_v25 = vld [vmem:[%s7396_s2 + $0x70] sm:$0xff]  ;;  %v514_v26 = vld [vmem:[%s7396_s2 + $0x78] sm:$0xff] }
  0x32   : > { %5080 = vmatpush3.bf16.msra.mxu1 %v5227_v27  ;;  %v5249_v27 = vld [vmem:[%s7395_s1 + $0xa8] sm:$0xff]  }
  0x34   : > { %585 = vperm.xlu0 %5218, %v503_v28   ;;  %590 = vperm.xlu1 %5219, %v504_v29   ;;  %v561_v28 = vld [vmem:[%s7396_s2 + $0x1f0] sm:$0xff]  ;;  %v562_v29 = vld [vmem:[%s7396_s2 + $0x1f8] sm:$0xff] }
  0x35   : > { %5082 = vmatmul.mubr.bf16.vlgmr.msra.gmra.mrb[0].mxu1 %v5229_v30  ;;  %v5250_v30 = vld [vmem:[%s7395_s1 + $0xb0] sm:$0xff]  }
  0x36   : > { %5085 = vmatprep.mubr.bf16.mxu1 %v5230_v31  ;;  %v545_v31 = vld [vmem:[%s7396_s2 + $0x170] sm:$0xff] }
  0x38   : > { %825 = vperm.xlu0 %5218, %v551_v32   ;;  %830 = vperm.xlu1 %5219, %v552_v33   ;;  %v546_v32 = vld [vmem:[%s7396_s2 + $0x178] sm:$0xff] }
  0x39   : > { %v5251_v33 = vld [vmem:[%s7395_s1 + $0xb8] sm:$0xff]  }
  0x3c   : > { %745 = vperm.xlu0 %5218, %v535_v34   ;;  %750 = vperm.xlu1 %5219, %v536_v35   ;;  %v1588_v34 = vld [vmem:[%s7398_s4 + $0x80] sm:$0xff]  ;;  %v1589_v35 = vld [vmem:[%s7398_s4 + $0x88] sm:$0xff] }
  0x3d   : > { %5086 = vmatmul.mubr.bf16.gmra.mrb[4].mxu1 %v5231_v36  ;;  %v5252_v36 = vld [vmem:[%s7395_s1 + $0xc0] sm:$0xff]  }
  0x3e   : > { %5089 = vmatprep.mubr.bf16.mxu1 %v5232_v37 }
  0x40   : > { %675 = vperm.xlu0 %5218, %v521_v38   ;;  %680 = vperm.xlu1 %5219, %v522_v39   ;;  %v1572_v39 = vld [vmem:[%s7398_s4] sm:$0xff] }
  0x44   : > { %595 = vperm.xlu0 %5218, %v505_v40   ;;  %600 = vperm.xlu1 %5219, %v506_v41   ;;  %v1573_v40 = vld [vmem:[%s7398_s4 + $0x8] sm:$0xff] }
  0x45   : > { %5090 = vmatmul.mubr.bf16.gmra.mrb[8].mxu1 %v5233_v42  ;;  %v5253_v41 = vld [vmem:[%s7395_s1 + $0xc8] sm:$0xff]   ;;  %v5254_v42 = vld [vmem:[%s7395_s1 + $0xd0] sm:$0xff]  }
  0x46   : > { %5093 = vmatprep.mubr.bf16.mxu1 %v5234_v43 }
  0x48   : > { %835 = vperm.xlu0 %5218, %v553_v44   ;;  %840 = vperm.xlu1 %5219, %v554_v45   ;;  %v1590_v45 = vld [vmem:[%s7398_s4 + $0x90] sm:$0xff] }
  0x4c   : > { %755 = vperm.xlu0 %5218, %v537_v46   ;;  %760 = vperm.xlu1 %5219, %v538_v47   ;;  %v1591_v46 = vld [vmem:[%s7398_s4 + $0x98] sm:$0xff] }
  0x4d   : > { %5094 = vmatmul.mubr.bf16.gmra.mrb[12].mxu1 %v5235_v48 }
  0x4e   : > { %5097 = vmatprep.mubr.bf16.mxu1 %v5236_v49  ;;  %v1574_v49 = vld [vmem:[%s7398_s4 + $0x10] sm:$0xff] }
  0x50   : > { %685 = vperm.xlu0 %5218, %v523_v50   ;;  %690 = vperm.xlu1 %5219, %v524_v51   ;;  %v1575_v50 = vld [vmem:[%s7398_s4 + $0x18] sm:$0xff] }
  0x51   : > { %v5255_v51 = vld [vmem:[%s7395_s1 + $0xd8] sm:$0xff]  }
  0x54   : > { %605 = vperm.xlu0 %5218, %v507_v52   ;;  %610 = vperm.xlu1 %5219, %v508_v53   ;;  %v5256_v52 = vld [vmem:[%s7395_s1 + $0xe0] sm:$0xff]  }
  0x55   : > { %5098 = vmatmul.mubr.bf16.gmra.mrb[16].mxu1 %v5237_v54 }
  0x56   : > { %5101 = vmatprep.mubr.bf16.mxu1 %v5238_v55  ;;  %v1592_v55 = vld [vmem:[%s7398_s4 + $0xa0] sm:$0xff] }
  0x58   : > { %845 = vperm.xlu0 %5218, %v555_v56   ;;  %850 = vperm.xlu1 %5219, %v556_v57   ;;  %v1593_v56 = vld [vmem:[%s7398_s4 + $0xa8] sm:$0xff] }
  0x5c   : > { %765 = vperm.xlu0 %5218, %v539_v58   ;;  %770 = vperm.xlu1 %5219, %v540_v59   ;;  %v1576_v59 = vld [vmem:[%s7398_s4 + $0x20] sm:$0xff] }
  0x5d   : > { %5102 = vmatmul.mubr.bf16.gmra.mrb[20].mxu1 %v5239_v60  ;;  %v1577_v60 = vld [vmem:[%s7398_s4 + $0x28] sm:$0xff] }
  0x5e   : > { %5105 = vmatprep.mubr.bf16.mxu1 %v5240_v63 }
  0x60   : > { %695 = vperm.xlu0 %5218, %v525_v61   ;;  %700 = vperm.xlu1 %5219, %v526_v62   ;;  %v5257_v61 = vld [vmem:[%s7395_s1 + $0xe8] sm:$0xff]  }
  0x64   : > { %615 = vperm.xlu0 %5218, %v509_v0   ;;  %620 = vperm.xlu1 %5219, %v510_v1   ;;  %v5258_v0 = vld [vmem:[%s7395_s1 + $0xf0] sm:$0xff]  }
  0x65   : > { %5106 = vmatmul.mubr.bf16.gmra.mrb[24].mxu1 %v5241_v3  ;;  %v1594_v1 = vld [vmem:[%s7398_s4 + $0xb0] sm:$0xff]  ;;  %v1595_v3 = vld [vmem:[%s7398_s4 + $0xb8] sm:$0xff] }
  0x66   : > { %5109 = vmatprep.mubr.bf16.mxu1 %v5242_v6  ;;  %v1578_v6 = vld [vmem:[%s7398_s4 + $0x30] sm:$0xff] }
  0x68   : > { %855 = vperm.xlu0 %5218, %v557_v4   ;;  %860 = vperm.xlu1 %5219, %v558_v5  }
  0x6c   : > { %775 = vperm.xlu0 %5218, %v541_v7   ;;  %780 = vperm.xlu1 %5219, %v542_v8   ;;  %v1579_v7 = vld [vmem:[%s7398_s4 + $0x38] sm:$0xff] }
  0x6d   : > { %5110 = vmatmul.mubr.bf16.gmra.mrb[28].mxu1 %v5243_v9  ;;  %v5259_v8 = vld [vmem:[%s7395_s1 + $0xf8] sm:$0xff]  }
  0x6e   : > { %5113 = vmatprep.mubr.bf16.mxu1 %v5244_v12  ;;  %v1597_v12 = vld [vmem:[%s7398_s4 + $0xc8] sm:$0xff] }
  0x70   : > { %705 = vperm.xlu0 %5218, %v527_v10   ;;  %710 = vperm.xlu1 %5219, %v528_v11   ;;  %v1596_v11 = vld [vmem:[%s7398_s4 + $0xc0] sm:$0xff] }
  0x74   : > { %625 = vperm.xlu0 %5218, %v511_v13   ;;  %630 = vperm.xlu1 %5219, %v512_v14  }
  0x75   : > { %5114 = vmatmul.mubr.bf16.gmra.mrb[32].mxu1 %v5245_v15  ;;  %v1580_v15 = vld [vmem:[%s7398_s4 + $0x40] sm:$0xff] }
  0x76   : > { %5117 = vmatprep.mubr.bf16.mxu1 %v5246_v18 }
  0x78   : > { %865 = vperm.xlu0 %5218, %v559_v16   ;;  %870 = vperm.xlu1 %5219, %v560_v17   ;;  %v1581_v16 = vld [vmem:[%s7398_s4 + $0x48] sm:$0xff] }
  0x7c   : > { %785 = vperm.xlu0 %5218, %v543_v19   ;;  %790 = vperm.xlu1 %5219, %v544_v20   ;;  %v1598_v19 = vld [vmem:[%s7398_s4 + $0xd0] sm:$0xff]  ;;  %v1599_v20 = vld [vmem:[%s7398_s4 + $0xd8] sm:$0xff] }
  0x7d   : > { %5118 = vmatmul.mubr.bf16.gmra.mrb[36].mxu1 %v5247_v21 }
  0x7e   : > { %5121 = vmatprep.mubr.bf16.mxu1 %v5248_v24  ;;  %v1583_v24 = vld [vmem:[%s7398_s4 + $0x58] sm:$0xff] }
  0x80   : > { %715 = vperm.xlu0 %5218, %v529_v22   ;;  %720 = vperm.xlu1 %5219, %v530_v23   ;;  %v1582_v23 = vld [vmem:[%s7398_s4 + $0x50] sm:$0xff] }
  0x84   : > { %635 = vperm.xlu0 %5218, %v513_v25   ;;  %640 = vperm.xlu1 %5219, %v514_v26  }
  0x85   : > { %5122 = vmatmul.mubr.bf16.gmra.mrb[40].mxu1 %v5249_v27  ;;  %v1600_v27 = vld [vmem:[%s7398_s4 + $0xe0] sm:$0xff] }
  0x86   : > { %5125 = vmatprep.mubr.bf16.mxu1 %v5250_v30 }
  0x88   : > { %875 = vperm.xlu0 %5218, %v561_v28   ;;  %880 = vperm.xlu1 %5219, %v562_v29   ;;  %v1601_v28 = vld [vmem:[%s7398_s4 + $0xe8] sm:$0xff] }
  0x8c   : > { %795 = vperm.xlu0 %5218, %v545_v31   ;;  %800 = vperm.xlu1 %5219, %v546_v32   ;;  %v1584_v31 = vld [vmem:[%s7398_s4 + $0x60] sm:$0xff]  ;;  %v1585_v32 = vld [vmem:[%s7398_s4 + $0x68] sm:$0xff] }
  0x8d   : > { %5126 = vmatmul.mubr.bf16.gmra.mrb[44].mxu1 %v5251_v33 }
  0x8e   : > { %5129 = vmatprep.mubr.bf16.mxu1 %v5252_v36  ;;  %v1603_v36 = vld [vmem:[%s7398_s4 + $0xf8] sm:$0xff] }
  0x8f   : > { %v5886_v37 = vpop.permute.xlu0 %645  ;;  %v5888_v38 = vpop.permute.xlu1 %565 }
  0x90   : > { %1686 = vperm.xlu0 %5218, %v1588_v34   ;;  %1691 = vperm.xlu1 %5219, %v1589_v35   ;;  %v1602_v35 = vld [vmem:[%s7398_s4 + $0xf0] sm:$0xff] }
  0x93   : > { %v5902_v43 = vpop.permute.xlu0 %650  ;;  %v5904_v44 = vpop.permute.xlu1 %570 }
  0x94   : > { %1606 = vperm.xlu0 %5218, %v1572_v39   ;;  %1611 = vperm.xlu1 %5219, %v1573_v40  }
  0x95   : > { %5130 = vmatmul.mubr.bf16.gmra.mrb[48].mxu1 %v5253_v41  ;;  %v1586_v41 = vld [vmem:[%s7398_s4 + $0x70] sm:$0xff] }
  0x96   : > { %5133 = vmatprep.mubr.bf16.mxu1 %v5254_v42  ;;  %v1587_v42 = vld [vmem:[%s7398_s4 + $0x78] sm:$0xff] }
  0x97   : > { %v5912_v47 = vpop.permute.xlu0 %805  ;;  %v5914_v48 = vpop.permute.xlu1 %810 }
  0x98   : > { %1696 = vperm.xlu0 %5218, %v1590_v45   ;;  %1701 = vperm.xlu1 %5219, %v1591_v46  }
  0x9b   : > { %v5928_v53 = vpop.permute.xlu0 %725  ;;  %v5930_v54 = vpop.permute.xlu1 %730 }
  0x9c   : > { %1616 = vperm.xlu0 %5218, %v1574_v49   ;;  %1621 = vperm.xlu1 %5219, %v1575_v50   ;;  %v2470_v49 = vld [vmem:[%s7400_s6] sm:$0xff]  ;;  %v2471_v50 = vld [vmem:[%s7400_s6 + $0x8] sm:$0xff] }
  0x9d   : > { %5134 = vmatmul.mubr.bf16.gmra.mrb[52].mxu1 %v5255_v51 }
  0x9e   : > { %5137 = vmatprep.mubr.bf16.mxu1 %v5256_v52 }
  0x9f   : > { %v5938_v57 = vpop.permute.xlu0 %655  ;;  %v5940_v58 = vpop.permute.xlu1 %660 }
  0xa0   : > { %1706 = vperm.xlu0 %5218, %v1592_v55   ;;  %1711 = vperm.xlu1 %5219, %v1593_v56   ;;  %v2472_v55 = vld [vmem:[%s7400_s6 + $0x10] sm:$0xff]  ;;  %v2473_v56 = vld [vmem:[%s7400_s6 + $0x18] sm:$0xff] }
  0xa3   : > { %v5951_v62 = vpop.permute.xlu0 %575  ;;  %v5953_v63 = vpop.permute.xlu1 %580 }
  0xa4   : > { %1626 = vperm.xlu0 %5218, %v1576_v59   ;;  %1631 = vperm.xlu1 %5219, %v1577_v60   ;;  %v5262_v59 = vld [vmem:[%s7397_s3 + $0x4] ss:$16 sps:$4 sm:$0xff]  }
  0xa5   : > { %5138 = vmatmul.mubr.bf16.gmra.mrb[56].mxu1 %v5257_v61 }
  0xa6   : > { %5141 = vmatprep.mubr.bf16.mxu1 %v5258_v0  ;;  %v2474_v0 = vld [vmem:[%s7400_s6 + $0x20] sm:$0xff] }
  0xa7   : > { %v5964_v4 = vpop.permute.xlu0 %815  ;;  %v5966_v5 = vpop.permute.xlu1 %820 }
  0xa8   : > { %1716 = vperm.xlu0 %5218, %v1594_v1   ;;  %1721 = vperm.xlu1 %5219, %v1595_v3   ;;  %v2475_v1 = vld [vmem:[%s7400_s6 + $0x28] sm:$0xff] }
  0xab   : > { %v5977_v9 = vpop.permute.xlu0 %735  ;;  %v5979_v10 = vpop.permute.xlu1 %740 }
  0xac   : > { %1636 = vperm.xlu0 %5218, %v1578_v6   ;;  %1641 = vperm.xlu1 %5219, %v1579_v7   ;;  %v2476_v7 = vld [vmem:[%s7400_s6 + $0x30] sm:$0xff] }
  0xad   : > { %5142 = vmatmul.mubr.bf16.gmra.mrb[60].mxu1 %v5259_v8  ;;  %v2477_v8 = vld [vmem:[%s7400_s6 + $0x38] sm:$0xff] }
  0xae   : > { %2116 = vmatprep.mubr.bf16.mxu1 %v5262_v59  ;;  %v2802_v59 = vld [vmem:[%s7402_s8 + $0x18] sm:$0xff] }
  0xaf   : > { %v5987_v13 = vpop.permute.xlu0 %665  ;;  %v5989_v14 = vpop.permute.xlu1 %670 }
  0xb0   : > { %1726 = vperm.xlu0 %5218, %v1596_v11   ;;  %1731 = vperm.xlu1 %5219, %v1597_v12  }
  0xb3   : > { %v5997_v17 = vpop.permute.xlu0 %585  ;;  %v5999_v18 = vpop.permute.xlu1 %590 }
  0xb4   : > { %1646 = vperm.xlu0 %5218, %v1580_v15   ;;  %1651 = vperm.xlu1 %5219, %v1581_v16   ;;  %v2478_v15 = vld [vmem:[%s7400_s6 + $0x40] sm:$0xff]  ;;  %v2479_v16 = vld [vmem:[%s7400_s6 + $0x48] sm:$0xff] }
  0xb7   : > { %v6007_v21 = vpop.permute.xlu0 %825  ;;  %v6009_v22 = vpop.permute.xlu1 %830 }
  0xb8   : > { %7408 = vst [vmem:[#allocation2_spill] sm:$0xff] %v6009_v22  ;;  %1736 = vperm.xlu0 %5218, %v1598_v19   ;;  %1741 = vperm.xlu1 %5219, %v1599_v20  }
  0xbb   : > { %v6017_v25 = vpop.permute.xlu0 %745  ;;  %v6019_v26 = vpop.permute.xlu1 %750 }
  0xbc   : > { %1656 = vperm.xlu0 %5218, %v1582_v23   ;;  %1661 = vperm.xlu1 %5219, %v1583_v24   ;;  %v2480_v23 = vld [vmem:[%s7400_s6 + $0x50] sm:$0xff]  ;;  %v2481_v24 = vld [vmem:[%s7400_s6 + $0x58] sm:$0xff] }
  0xbf   : > { %v6027_v29 = vpop.permute.xlu0 %675  ;;  %v6029_v30 = vpop.permute.xlu1 %680 }
  0xc0   : > { %1746 = vperm.xlu0 %5218, %v1600_v27   ;;  %1751 = vperm.xlu1 %5219, %v1601_v28   ;;  %v2482_v28 = vld [vmem:[%s7400_s6 + $0x60] sm:$0xff] }
  0xc3   : > { %v6037_v33 = vpop.permute.xlu0 %595  ;;  %v6039_v34 = vpop.permute.xlu1 %600 }
  0xc4   : > { %1666 = vperm.xlu0 %5218, %v1584_v31   ;;  %1671 = vperm.xlu1 %5219, %v1585_v32   ;;  %v2483_v31 = vld [vmem:[%s7400_s6 + $0x68] sm:$0xff] }
  0xc7   : > { %v6047_v39 = vpop.permute.xlu0 %835  ;;  %v6049_v40 = vpop.permute.xlu1 %840 }
  0xc8   : > { %1756 = vperm.xlu0 %5218, %v1602_v35   ;;  %1761 = vperm.xlu1 %5219, %v1603_v36   ;;  %v2484_v35 = vld [vmem:[%s7400_s6 + $0x70] sm:$0xff]  ;;  %v2485_v36 = vld [vmem:[%s7400_s6 + $0x78] sm:$0xff] }
  0xcb   : > { %v6057_v45 = vpop.permute.xlu0 %755  ;;  %v6059_v46 = vpop.permute.xlu1 %760 }
  0xcc   : > { %1676 = vperm.xlu0 %5218, %v1586_v41   ;;  %1681 = vperm.xlu1 %5219, %v1587_v42  }
  0xcf   : > { %v6067_v51 = vpop.permute.xlu0 %685  ;;  %v6069_v52 = vpop.permute.xlu1 %690 }
  0xd0   : > { %2488 = vperm.xlu0 %5218, %v2470_v49   ;;  %2493 = vperm.xlu1 %5219, %v2471_v50   ;;  %v2799_v49 = vld [vmem:[%s7402_s8] sm:$0xff]  ;;  %v2800_v50 = vld [vmem:[%s7402_s8 + $0x8] sm:$0xff] }
  0xd3   : > { %v6080_v60 = vpop.permute.xlu0 %605  ;;  %v6082_v61 = vpop.permute.xlu1 %610 }
  0xd4   : > { %2498 = vperm.xlu0 %5218, %v2472_v55   ;;  %2503 = vperm.xlu1 %5219, %v2473_v56   ;;  %v2801_v56 = vld [vmem:[%s7402_s8 + $0x10] sm:$0xff] }
  0xd7   : > { %v6090_v3 = vpop.permute.xlu0 %845  ;;  %v6092_v6 = vpop.permute.xlu1 %850 }
  0xd8   : > { %7409 = vst [vmem:[#allocation3_spill] sm:$0xff] %v6090_v3  ;;  %7410 = vst [vmem:[#allocation4_spill] sm:$0xff] %v6092_v6  ;;  %2508 = vperm.xlu0 %5218, %v2474_v0   ;;  %2513 = vperm.xlu1 %5219, %v2475_v1   ;;  %v2803_v1 = vld [vmem:[%s7402_s8 + $0x20] sm:$0xff]  ;;  %v2816_v6 = vld [vmem:[%s7402_s8 + $0x88] sm:$0xff] }
  0xdb   : > { %v6100_v11 = vpop.permute.xlu0 %765  ;;  %v6102_v12 = vpop.permute.xlu1 %770 }
  0xdc   : > { %2518 = vperm.xlu0 %5218, %v2476_v7   ;;  %2523 = vperm.xlu1 %5219, %v2477_v8   ;;  %v2804_v7 = vld [vmem:[%s7402_s8 + $0x28] sm:$0xff] }
  0xdf   : > { %v6110_v19 = vpop.permute.xlu0 %695  ;;  %v6112_v20 = vpop.permute.xlu1 %700 }
  0xe0   : > { %2528 = vperm.xlu0 %5218, %v2478_v15   ;;  %2533 = vperm.xlu1 %5219, %v2479_v16   ;;  %v2805_v16 = vld [vmem:[%s7402_s8 + $0x30] sm:$0xff] }
  0xe3   : > { %v6120_v27 = vpop.permute.xlu0 %615  ;;  %v6128_v32 = vpop.permute.xlu1 %620 }
  0xe4   : > { %2538 = vperm.xlu0 %5218, %v2480_v23   ;;  %2543 = vperm.xlu1 %5219, %v2481_v24   ;;  %v2806_v23 = vld [vmem:[%s7402_s8 + $0x38] sm:$0xff] }
  0xe7   : > { %v6136_v41 = vpop.permute.xlu0 %855  ;;  %v6138_v42 = vpop.permute.xlu1 %860 }
  0xe8   : > { %2548 = vperm.xlu0 %5218, %v2482_v28   ;;  %2553 = vperm.xlu1 %5219, %v2483_v31   ;;  %7411 = vst [vmem:[#allocation5_spill] sm:$0xff] %v6136_v41  ;;  %7412 = vst [vmem:[#allocation6_spill] sm:$0xff] %v6138_v42  ;;  %v2807_v28 = vld [vmem:[%s7402_s8 + $0x40] sm:$0xff]  ;;  %v2808_v31 = vld [vmem:[%s7402_s8 + $0x48] sm:$0xff] }
  0xeb   : > { %v6146_v55 = vpop.permute.xlu0 %775  ;;  %v6154_v0 = vpop.permute.xlu1 %780 }
  0xec   : > { %2558 = vperm.xlu0 %5218, %v2484_v35   ;;  %2563 = vperm.xlu1 %5219, %v2485_v36   ;;  %v2809_v36 = vld [vmem:[%s7402_s8 + $0x50] sm:$0xff] }
  0xef   : > { %v6162_v8 = vpop.permute.xlu0 %705  ;;  %v6164_v15 = vpop.permute.xlu1 %710 }
  0xf0   : > { %2833 = vperm.xlu0 %5218, %v2799_v49   ;;  %2838 = vperm.xlu1 %5219, %v2800_v50   ;;  %v2810_v49 = vld [vmem:[%s7402_s8 + $0x58] sm:$0xff] }
  0xf3   : > { %v6172_v24 = vpop.permute.xlu0 %625  ;;  %v6180_v35 = vpop.permute.xlu1 %630 }
  0xf4   : > { %2843 = vperm.xlu0 %5218, %v2801_v56   ;;  %2848 = vperm.xlu1 %5219, %v2802_v59   ;;  %v2811_v59 = vld [vmem:[%s7402_s8 + $0x60] sm:$0xff] }
  0xf7   : > { %v6188_v50 = vpop.permute.xlu0 %865  ;;  %v6190_v56 = vpop.permute.xlu1 %870 }
  0xf8   : > { %2853 = vperm.xlu0 %5218, %v2803_v1   ;;  %2858 = vperm.xlu1 %5219, %v2804_v7   ;;  %7413 = vst [vmem:[#allocation7_spill] sm:$0xff] %v6188_v50  ;;  %7414 = vst [vmem:[#allocation8_spill] sm:$0xff] %v6190_v56  ;;  %v2812_v1 = vld [vmem:[%s7402_s8 + $0x68] sm:$0xff]  ;;  %v2815_v50 = vld [vmem:[%s7402_s8 + $0x80] sm:$0xff] }
  0xfb   : > { %v6198_v7 = vpop.permute.xlu0 %785 }
  0xfc   : > { %2863 = vperm.xlu0 %5218, %v2805_v16   ;;  %2868 = vperm.xlu1 %5219, %v2806_v23   ;;  %v2813_v23 = vld [vmem:[%s7402_s8 + $0x70] sm:$0xff] }
  0xff   : > { %v6218_v3 = vpop.permute.xlu0 %715 }
 0x100   : > { %2873 = vperm.xlu0 %5218, %v2807_v28   ;;  %2878 = vperm.xlu1 %5219, %v2808_v31   ;;  %v2814_v28 = vld [vmem:[%s7402_s8 + $0x78] sm:$0xff]  ;;  %v6206_v31 = vpop.permute.xlu1 %790 }
 0x104   : > { %2883 = vperm.xlu0 %5218, %v2809_v36   ;;  %2888 = vperm.xlu1 %5219, %v2810_v49  }
 0x108   : > { %2893 = vperm.xlu0 %5218, %v2811_v59   ;;  %2898 = vperm.xlu1 %5219, %v2812_v1   ;;  %v5083_v16 = vpop.f32.mrb[0].mxu1 }
 0x109   : > { %v1157_v36 = vpop.f32.mrb[1].mxu1  ;;  %v1166_v49 = vadd.f32 %v5083_v16, %v5951_v62  ;;  %v6220_v16 = vpop.permute.xlu1 %720 }
 0x10a   : > { %v1158_v2 = vadd.f32 %v1157_v36, %v5888_v38  ;;  %v5084_v59 = vpop.f32.mrb[2].mxu1 }
 0x10b   : > { %v1169_v1 = vadd.f32 %v5084_v59, %v5953_v63  ;;  %v1160_v56 = vpop.f32.mrb[3].mxu1  ;;  %v1414_v62 = vmax.f32 %v1166_v49, 0.0  ;;  %v2817_v59 = vld [vmem:[%s7402_s8 + $0x90] sm:$0xff] }
 0x10c   : > { %2903 = vperm.xlu0 %5218, %v2813_v23   ;;  %2908 = vperm.xlu1 %5219, %v2814_v28   ;;  %v1161_v42 = vadd.f32 %v1160_v56, %v5904_v44  ;;  %v1412_v23 = vmax.f32 %v1158_v2, 0.0  ;;  %v2818_v44 = vld [vmem:[%s7402_s8 + $0x98] sm:$0xff] }
 0x10d   : > { %v1415_v38 = vmax.f32 %v1169_v1, 0.0  ;;  %v5286_v2 = vld [vmem:[%s7397_s3 + $0xc] ss:$16 sps:$4 sm:$0xff]   ;;  %v636_v1 = vpop.permute.xlu0 %635  ;;  %v641_v41 = vpop.permute.xlu1 %640 }
 0x10e   : > { %v1413_v28 = vmax.f32 %v1161_v42, 0.0  ;;  %2277 = vmatprep.mubr.bf16.mxu0 %v5286_v2  ;;  %v2822_v2 = vld [vmem:[%s7402_s8 + $0xb8] sm:$0xff] }
 0x10f   : > { %v6222_v63 = vpack.c.bf16 %v1415_v38, %v1414_v62 }
 0x110   : > { %2913 = vperm.xlu0 %5218, %v2815_v50   ;;  %2918 = vperm.xlu1 %5219, %v2816_v6   ;;  %v5087_v36 = vpop.f32.mrb[4].mxu1  ;;  %v6230_v56 = vpack.c.bf16 %v1413_v28, %v1412_v23  ;;  %v2819_v23 = vld [vmem:[%s7402_s8 + $0xa0] sm:$0xff]  ;;  %v2820_v28 = vld [vmem:[%s7402_s8 + $0xa8] sm:$0xff] }
 0x111   : > { %v1173_v49 = vpop.f32.mrb[5].mxu1  ;;  %v1182_v6 = vadd.f32 %v5087_v36, %v6037_v33 }
 0x112   : > { %v1174_v42 = vadd.f32 %v1173_v49, %v5997_v17  ;;  %v5088_v50 = vpop.f32.mrb[6].mxu1 }
 0x113   : > { %v1185_v62 = vadd.f32 %v5088_v50, %v6039_v34  ;;  %v1176_v38 = vpop.f32.mrb[7].mxu1  ;;  %v1418_v17 = vmax.f32 %v1182_v6, 0.0  ;;  %v2821_v50 = vld [vmem:[%s7402_s8 + $0xb0] sm:$0xff]  ;;  %v6255_v6 = vpop.permute.xlu0 %875 }
 0x114   : > { %2923 = vperm.xlu0 %5218, %v2817_v59   ;;  %2928 = vperm.xlu1 %5219, %v2818_v44   ;;  %v1177_v33 = vadd.f32 %v1176_v38, %v5999_v18  ;;  %v1416_v59 = vmax.f32 %v1174_v42, 0.0 }
 0x115   : > { %v1419_v36 = vmax.f32 %v1185_v62, 0.0  ;;  %v6258_v62 = vpop.permute.xlu1 %880 }
 0x116   : > { %v1417_v44 = vmax.f32 %v1177_v33, 0.0 }
 0x117   : > { %v6245_v34 = vpack.c.bf16 %v1419_v36, %v1418_v17  ;;  %v2823_v17 = vld [vmem:[%s7402_s8 + $0xc0] sm:$0xff]  ;;  %v2824_v36 = vld [vmem:[%s7402_s8 + $0xc8] sm:$0xff] }
 0x118   : > { %2933 = vperm.xlu0 %5218, %v2819_v23   ;;  %2938 = vperm.xlu1 %5219, %v2820_v28   ;;  %v5091_v49 = vpop.f32.mrb[8].mxu1  ;;  %v6253_v22 = vpack.c.bf16 %v1417_v44, %v1416_v59 }
 0x119   : > { %v1189_v18 = vpop.f32.mrb[9].mxu1  ;;  %v1198_v42 = vadd.f32 %v5091_v49, %v6120_v27 }
 0x11a   : > { %v1190_v38 = vadd.f32 %v1189_v18, %v6080_v60  ;;  %v5092_v23 = vpop.f32.mrb[10].mxu1  ;;  %v2825_v18 = vld [vmem:[%s7402_s8 + $0xd0] sm:$0xff] }
 0x11b   : > { %v1201_v28 = vadd.f32 %v5092_v23, %v6128_v32  ;;  %v1192_v33 = vpop.f32.mrb[11].mxu1  ;;  %v1422_v59 = vmax.f32 %v1198_v42, 0.0  ;;  %v2826_v23 = vld [vmem:[%s7402_s8 + $0xd8] sm:$0xff] }
 0x11c   : > { %2943 = vperm.xlu0 %5218, %v2821_v50   ;;  %2948 = vperm.xlu1 %5219, %v2822_v2   ;;  %v1193_v27 = vadd.f32 %v1192_v33, %v6082_v61  ;;  %v1420_v49 = vmax.f32 %v1190_v38, 0.0  ;;  %v6269_v50 = vpop.permute.xlu0 %795  ;;  %v6279_v61 = vpop.permute.xlu1 %800 }
 0x11d   : > { %v1423_v44 = vmax.f32 %v1201_v28, 0.0 }
 0x11e   : > { %v1421_v60 = vmax.f32 %v1193_v27, 0.0 }
 0x11f   : > { %v6271_v32 = vpack.c.bf16 %v1423_v44, %v1422_v59  ;;  %v2827_v59 = vld [vmem:[%s7402_s8 + $0xe0] sm:$0xff]  ;;  %v2828_v44 = vld [vmem:[%s7402_s8 + $0xe8] sm:$0xff] }
 0x120   : > { %2953 = vperm.xlu0 %5218, %v2823_v17   ;;  %2958 = vperm.xlu1 %5219, %v2824_v36   ;;  %v5095_v2 = vpop.f32.mrb[12].mxu1  ;;  %v6281_v42 = vpack.c.bf16 %v1421_v60, %v1420_v49  ;;  %v6291_v60 = vpop.permute.xlu0 %1686 }
 0x121   : > { %v1205_v38 = vpop.f32.mrb[13].mxu1  ;;  %v1214_v28 = vadd.f32 %v5095_v2, %v636_v1  ;;  %7415 = vst [vmem:[#allocation9_spill] sm:$0xff] %v6291_v60 }
 0x122   : > { %v1206_v33 = vadd.f32 %v1205_v38, %v6172_v24  ;;  %v5096_v17 = vpop.f32.mrb[14].mxu1  ;;  %v6293_v24 = vpop.permute.xlu1 %1691 }
 0x123   : > { %v1217_v36 = vadd.f32 %v5096_v17, %v641_v41  ;;  %v1208_v27 = vpop.f32.mrb[15].mxu1  ;;  %v1426_v1 = vmax.f32 %v1214_v28, 0.0  ;;  %7416 = vst [vmem:[#allocation10_spill] sm:$0xff] %v6293_v24  ;;  %v2829_v17 = vld [vmem:[%s7402_s8 + $0xf0] sm:$0xff]  ;;  %v3363_v24 = vld [vmem:[%s7404_s10 + $0x18] sm:$0xff] }
 0x124   : > { %2963 = vperm.xlu0 %5218, %v2825_v18   ;;  %2968 = vperm.xlu1 %5219, %v2826_v23   ;;  %v1209_v49 = vadd.f32 %v1208_v27, %v6180_v35  ;;  %v1424_v18 = vmax.f32 %v1206_v33, 0.0  ;;  %v2830_v35 = vld [vmem:[%s7402_s8 + $0xf8] sm:$0xff] }
 0x125   : > { %v1427_v2 = vmax.f32 %v1217_v36, 0.0 }
 0x126   : > { %v1425_v23 = vmax.f32 %v1209_v49, 0.0 }
 0x127   : > { %v6295_v41 = vpack.c.bf16 %v1427_v2, %v1426_v1  ;;  %v3360_v2 = vld [vmem:[%s7404_s10] sm:$0xff] }
 0x128   : > { %2973 = vperm.xlu0 %5218, %v2827_v59   ;;  %2978 = vperm.xlu1 %5219, %v2828_v44   ;;  %v5099_v38 = vpop.f32.mrb[16].mxu1  ;;  %v6303_v27 = vpack.c.bf16 %v1425_v23, %v1424_v18  ;;  %v6307_v44 = vpop.permute.xlu0 %1606  ;;  %v3361_v18 = vld [vmem:[%s7404_s10 + $0x8] sm:$0xff] }
 0x129   : > { %v1221_v28 = vpop.f32.mrb[17].mxu1  ;;  %v1230_v36 = vadd.f32 %v5099_v38, %v5938_v57  ;;  %7417 = vst [vmem:[#allocation11_spill] sm:$0xff] %v6307_v44  ;;  %v6316_v23 = vpop.permute.xlu1 %1611 }
 0x12a   : > { %v1222_v33 = vadd.f32 %v1221_v28, %v5886_v37  ;;  %v5100_v59 = vpop.f32.mrb[18].mxu1  ;;  %7418 = vst [vmem:[#allocation12_spill] sm:$0xff] %v6316_v23 }
 0x12b   : > { %v1233_v49 = vadd.f32 %v5100_v59, %v5940_v58  ;;  %v1224_v1 = vpop.f32.mrb[19].mxu1  ;;  %v1430_v57 = vmax.f32 %v1230_v36, 0.0  ;;  %v3362_v59 = vld [vmem:[%s7404_s10 + $0x10] sm:$0xff] }
 0x12c   : > { %2983 = vperm.xlu0 %5218, %v2829_v17   ;;  %2988 = vperm.xlu1 %5219, %v2830_v35   ;;  %v1225_v37 = vadd.f32 %v1224_v1, %v5902_v43  ;;  %v1428_v17 = vmax.f32 %v1222_v33, 0.0  ;;  %v6325_v44 = vpop.permute.xlu0 %1696 }
 0x12d   : > { %v1431_v38 = vmax.f32 %v1233_v49, 0.0  ;;  %v6328_v36 = vpop.permute.xlu1 %1701 }
 0x12e   : > { %v1429_v35 = vmax.f32 %v1225_v37, 0.0  ;;  %v3365_v37 = vld [vmem:[%s7404_s10 + $0x28] sm:$0xff] }
 0x12f   : > { %v1485_v58 = vpack.c.bf16 %v1431_v38, %v1430_v57 }
 0x130   : > { %3426 = vperm.xlu0 %5218, %v3360_v2   ;;  %3431 = vperm.xlu1 %5219, %v3361_v18   ;;  %v5103_v28 = vpop.f32.mrb[20].mxu1  ;;  %v1484_v60 = vpack.c.bf16 %v1429_v35, %v1428_v17  ;;  %v3364_v18 = vld [vmem:[%s7404_s10 + $0x20] sm:$0xff]  ;;  %v3366_v17 = vld [vmem:[%s7404_s10 + $0x30] sm:$0xff] }
 0x131   : > { %v1237_v23 = vpop.f32.mrb[21].mxu1  ;;  %v1246_v43 = vadd.f32 %v5103_v28, %v6027_v29 }
 0x132   : > { %v1238_v33 = vadd.f32 %v1237_v23, %v5987_v13  ;;  %v5104_v49 = vpop.f32.mrb[22].mxu1  ;;  %4753 = vmatprep.subr.bf16.mxu1 %v1484_v60 }
 0x133   : > { %v1249_v1 = vadd.f32 %v5104_v49, %v6029_v30  ;;  %v1240_v2 = vpop.f32.mrb[23].mxu1  ;;  %4754 = vmatpush3.bf16.msra.mxu1 %v6230_v56  ;;  %v1434_v13 = vmax.f32 %v1246_v43, 0.0  ;;  %v6340_v30 = vpop.permute.xlu0 %1616 }
 0x134   : > { %3436 = vperm.xlu0 %5218, %v3362_v59   ;;  %3441 = vperm.xlu1 %5219, %v3363_v24   ;;  %v1241_v29 = vadd.f32 %v1240_v2, %v5989_v14  ;;  %v1432_v24 = vmax.f32 %v1238_v33, 0.0  ;;  %v3367_v14 = vld [vmem:[%s7404_s10 + $0x38] sm:$0xff]  ;;  %v6348_v56 = vpop.permute.xlu1 %1621 }
 0x135   : > { %v1435_v23 = vmax.f32 %v1249_v1, 0.0  ;;  %4755 = vmatprep.subr.bf16.mxu1 %v1485_v58  ;;  %v3368_v1 = vld [vmem:[%s7404_s10 + $0x40] sm:$0xff] }
 0x136   : > { %v1433_v57 = vmax.f32 %v1241_v29, 0.0 }
 0x137   : > { %v1487_v60 = vpack.c.bf16 %v1435_v23, %v1434_v13  ;;  %4756 = vmatpush3.bf16.msra.mxu1 %v6222_v63  ;;  %v3369_v63 = vld [vmem:[%s7404_s10 + $0x48] sm:$0xff] }
 0x138   : > { %3446 = vperm.xlu0 %5218, %v3364_v18   ;;  %3451 = vperm.xlu1 %5219, %v3365_v37   ;;  %v5107_v38 = vpop.f32.mrb[24].mxu1  ;;  %v1486_v35 = vpack.c.bf16 %v1433_v57, %v1432_v24  ;;  %v3370_v24 = vld [vmem:[%s7404_s10 + $0x50] sm:$0xff] }
 0x139   : > { %v1253_v58 = vpop.f32.mrb[25].mxu1  ;;  %v1262_v28 = vadd.f32 %v5107_v38, %v6110_v19 }
 0x13a   : > { %v1254_v59 = vadd.f32 %v1253_v58, %v6067_v51  ;;  %v5108_v43 = vpop.f32.mrb[26].mxu1  ;;  %4757 = vmatprep.subr.bf16.mxu1 %v1486_v35  ;;  %v6362_v51 = vpop.permute.xlu0 %1706 }
 0x13b   : > { %v1265_v33 = vadd.f32 %v5108_v43, %v6112_v20  ;;  %v1256_v49 = vpop.f32.mrb[27].mxu1  ;;  %4758 = vmatpush3.bf16.msra.mxu1 %v6253_v22  ;;  %v1438_v19 = vmax.f32 %v1262_v28, 0.0  ;;  %v6364_v20 = vpop.permute.xlu1 %1711  ;;  %v3371_v22 = vld [vmem:[%s7404_s10 + $0x58] sm:$0xff]  ;;  %v3372_v28 = vld [vmem:[%s7404_s10 + $0x60] sm:$0xff] }
 0x13c   : > { %3456 = vperm.xlu0 %5218, %v3366_v17   ;;  %3461 = vperm.xlu1 %5219, %v3367_v14   ;;  %v1257_v2 = vadd.f32 %v1256_v49, %v6069_v52  ;;  %v1436_v37 = vmax.f32 %v1254_v59, 0.0 }
 0x13d   : > { %v1439_v18 = vmax.f32 %v1265_v33, 0.0  ;;  %4759 = vmatprep.subr.bf16.mxu1 %v1487_v60 }
 0x13e   : > { %v1437_v29 = vmax.f32 %v1257_v2, 0.0  ;;  %v6375_v14 = vpop.permute.xlu0 %1626  ;;  %v3375_v2 = vld [vmem:[%s7404_s10 + $0x78] sm:$0xff] }
 0x13f   : > { %v1489_v13 = vpack.c.bf16 %v1439_v18, %v1438_v19  ;;  %4760 = vmatpush3.bf16.msra.mxu1 %v6245_v34  ;;  %v3373_v34 = vld [vmem:[%s7404_s10 + $0x68] sm:$0xff] }
 0x140   : > { %3466 = vperm.xlu0 %5218, %v3368_v1   ;;  %3471 = vperm.xlu1 %5219, %v3369_v63   ;;  %v5111_v23 = vpop.f32.mrb[28].mxu1  ;;  %v1488_v52 = vpack.c.bf16 %v1437_v29, %v1436_v37  ;;  %v3374_v63 = vld [vmem:[%s7404_s10 + $0x70] sm:$0xff] }
 0x141   : > { %v1269_v57 = vpop.f32.mrb[29].mxu1  ;;  %v1278_v60 = vadd.f32 %v5111_v23, %v6218_v3  ;;  %v6384_v3 = vpop.permute.xlu1 %1631 }
 0x142   : > { %v1270_v38 = vadd.f32 %v1269_v57, %v6162_v8  ;;  %v5112_v17 = vpop.f32.mrb[30].mxu1  ;;  %4761 = vmatprep.subr.bf16.mxu1 %v1488_v52  ;;  %v6395_v19 = vpop.permute.xlu0 %1716 }
 0x143   : > { %v1281_v35 = vadd.f32 %v5112_v17, %v6220_v16  ;;  %v1272_v58 = vpop.f32.mrb[31].mxu1  ;;  %4762 = vmatpush3.bf16.msra.mxu1 %v6281_v42  ;;  %v1442_v59 = vmax.f32 %v1278_v60, 0.0 }
 0x144   : > { %3476 = vperm.xlu0 %5218, %v3370_v24   ;;  %3481 = vperm.xlu1 %5219, %v3371_v22   ;;  %v1273_v8 = vadd.f32 %v1272_v58, %v6164_v15  ;;  %v1440_v16 = vmax.f32 %v1270_v38, 0.0  ;;  %v3377_v22 = vld [vmem:[%s7404_s10 + $0x88] sm:$0xff] }
 0x145   : > { %v1443_v43 = vmax.f32 %v1281_v35, 0.0  ;;  %4763 = vmatprep.subr.bf16.mxu1 %v1489_v13  ;;  %v6398_v37 = vpop.permute.xlu1 %1721  ;;  %v5260_v35 = vld [vmem:[%s7397_s3] ss:$16 sps:$4 sm:$0xff]  }
 0x146   : > { %v1441_v33 = vmax.f32 %v1273_v8, 0.0 }
 0x147   : > { %v1491_v49 = vpack.c.bf16 %v1443_v43, %v1442_v59  ;;  %4764 = vmatpush3.bf16.msra.mxu1 %v6271_v32  ;;  %v3376_v32 = vld [vmem:[%s7404_s10 + $0x80] sm:$0xff] }
 0x148   : > { %3486 = vperm.xlu0 %5218, %v3372_v28   ;;  %3491 = vperm.xlu1 %5219, %v3373_v34   ;;  %v5115_v1 = vpop.f32.mrb[32].mxu1  ;;  %v1490_v15 = vpack.c.bf16 %v1441_v33, %v1440_v16  ;;  %v5263_v34 = vld [vmem:[%s7397_s3 + $0x24] ss:$16 sps:$4 sm:$0xff]  }
 0x149   : > { %v1285_v42 = vpop.f32.mrb[33].mxu1  ;;  %v1294_v18 = vadd.f32 %v5115_v1, %v5977_v9  ;;  %v6423_v58 = vpop.permute.xlu1 %1641  ;;  %v3381_v1 = vld [vmem:[%s7404_s10 + $0xa8] sm:$0xff] }
 0x14a   : > { %v1286_v29 = vadd.f32 %v1285_v42, %v5928_v53  ;;  %v5116_v13 = vpop.f32.mrb[34].mxu1  ;;  %4765 = vmatprep.subr.bf16.mxu1 %v1490_v15 }
 0x14b   : > { %v1297_v23 = vadd.f32 %v5116_v13, %v5979_v10  ;;  %v1288_v24 = vpop.f32.mrb[35].mxu1  ;;  %4766 = vmatpush3.bf16.msra.mxu1 %v6303_v27  ;;  %v1446_v53 = vmax.f32 %v1294_v18, 0.0  ;;  %v6410_v10 = vpop.permute.xlu0 %1636  ;;  %v3379_v27 = vld [vmem:[%s7404_s10 + $0x98] sm:$0xff]  ;;  %v3382_v13 = vld [vmem:[%s7404_s10 + $0xb0] sm:$0xff] }
 0x14c   : > { %3496 = vperm.xlu0 %5218, %v3374_v63   ;;  %3501 = vperm.xlu1 %5219, %v3375_v2   ;;  %v1289_v9 = vadd.f32 %v1288_v24, %v5930_v54  ;;  %v1444_v57 = vmax.f32 %v1286_v29, 0.0  ;;  %v3378_v54 = vld [vmem:[%s7404_s10 + $0x90] sm:$0xff] }
 0x14d   : > { %v1447_v52 = vmax.f32 %v1297_v23, 0.0  ;;  %4767 = vmatprep.subr.bf16.mxu1 %v1491_v49  ;;  %v6443_v15 = vpop.permute.xlu1 %1731  ;;  %v5265_v23 = vld [vmem:[%s7397_s3 + $0x20] ss:$16 sps:$4 sm:$0xff]  }
 0x14e   : > { %v1445_v60 = vmax.f32 %v1289_v9, 0.0 }
 0x14f   : > { %v6412_v38 = vpack.c.bf16 %v1447_v52, %v1446_v53  ;;  %4768 = vmatpush3.bf16.msra.mxu1 %v6295_v41  ;;  %v3380_v41 = vld [vmem:[%s7404_s10 + $0xa0] sm:$0xff] }
 0x150   : > { %3506 = vperm.xlu0 %5218, %v3376_v32   ;;  %3511 = vperm.xlu1 %5219, %v3377_v22   ;;  %v5119_v17 = vpop.f32.mrb[36].mxu1  ;;  %v6429_v8 = vpack.c.bf16 %v1445_v60, %v1444_v57  ;;  %v5266_v22 = vld [vmem:[%s7397_s3 + $0x44] ss:$16 sps:$4 sm:$0xff]  }
 0x151   : > { %v1301_v28 = vpop.f32.mrb[37].mxu1  ;;  %v1310_v59 = vadd.f32 %v5119_v17, %v6057_v45  ;;  %v6441_v45 = vpop.permute.xlu0 %1726 }
 0x152   : > { %v1302_v43 = vadd.f32 %v1301_v28, %v6017_v25  ;;  %v5120_v16 = vpop.f32.mrb[38].mxu1  ;;  %2117 = vmatmul.mubr.bf16.vlgmr.msra.gmra.mrb[64].mxu1 %v5260_v35  ;;  %v3384_v35 = vld [vmem:[%s7404_s10 + $0xc0] sm:$0xff] }
 0x153   : > { %v1313_v33 = vadd.f32 %v5120_v16, %v6059_v46  ;;  %v1304_v49 = vpop.f32.mrb[39].mxu1  ;;  %2124 = vmatprep.mubr.bf16.mxu1 %v5263_v34  ;;  %v1450_v25 = vmax.f32 %v1310_v59, 0.0  ;;  %v3386_v16 = vld [vmem:[%s7404_s10 + $0xd0] sm:$0xff] }
 0x154   : > { %3516 = vperm.xlu0 %5218, %v3378_v54   ;;  %3521 = vperm.xlu1 %5219, %v3379_v27   ;;  %v1305_v63 = vadd.f32 %v1304_v49, %v6019_v26  ;;  %v1448_v46 = vmax.f32 %v1302_v43, 0.0  ;;  %v3383_v26 = vld [vmem:[%s7404_s10 + $0xb8] sm:$0xff]  ;;  %v3385_v54 = vld [vmem:[%s7404_s10 + $0xc8] sm:$0xff] }
 0x155   : > { %v1451_v2 = vmax.f32 %v1313_v33, 0.0  ;;  %v6463_v57 = vpop.permute.xlu0 %1646  ;;  %v3387_v33 = vld [vmem:[%s7404_s10 + $0xd8] sm:$0xff] }
 0x156   : > { %v1449_v42 = vmax.f32 %v1305_v63, 0.0 }
 0x157   : > { %v6445_v18 = vpack.c.bf16 %v1451_v2, %v1450_v25 }
 0x158   : > { %3526 = vperm.xlu0 %5218, %v3380_v41   ;;  %3531 = vperm.xlu1 %5219, %v3381_v1   ;;  %v5123_v29 = vpop.f32.mrb[40].mxu1  ;;  %v6456_v24 = vpack.c.bf16 %v1449_v42, %v1448_v46  ;;  %v5269_v1 = vld [vmem:[%s7397_s3 + $0x64] ss:$16 sps:$4 sm:$0xff]  }
 0x159   : > { %v1317_v32 = vpop.f32.mrb[41].mxu1  ;;  %v1326_v9 = vadd.f32 %v5123_v29, %v6146_v55  ;;  %v6472_v55 = vpop.permute.xlu1 %1651 }
 0x15a   : > { %v1318_v53 = vadd.f32 %v1317_v32, %v6100_v11  ;;  %v5124_v52 = vpop.f32.mrb[42].mxu1  ;;  %2125 = vmatmul.mubr.bf16.gmra.mrb[68].mxu1 %v5265_v23  ;;  %v6491_v63 = vpop.permute.xlu0 %1736  ;;  %v3389_v23 = vld [vmem:[%s7404_s10 + $0xe8] sm:$0xff] }
 0x15b   : > { %v1329_v60 = vadd.f32 %v5124_v52, %v6154_v0  ;;  %v1320_v17 = vpop.f32.mrb[43].mxu1  ;;  %2132 = vmatprep.mubr.bf16.mxu1 %v5266_v22  ;;  %v1454_v27 = vmax.f32 %v1326_v9, 0.0 }
 0x15c   : > { %3536 = vperm.xlu0 %5218, %v3382_v13   ;;  %3541 = vperm.xlu1 %5219, %v3383_v26   ;;  %v1321_v11 = vadd.f32 %v1320_v17, %v6102_v12  ;;  %v1452_v34 = vmax.f32 %v1318_v53, 0.0  ;;  %v5268_v12 = vld [vmem:[%s7397_s3 + $0x40] ss:$16 sps:$4 sm:$0xff]  }
 0x15d   : > { %v1455_v28 = vmax.f32 %v1329_v60, 0.0  ;;  %v6494_v2 = vpop.permute.xlu1 %1741  ;;  %v3388_v26 = vld [vmem:[%s7404_s10 + $0xe0] sm:$0xff]  ;;  %v3390_v60 = vld [vmem:[%s7404_s10 + $0xf0] sm:$0xff] }
 0x15e   : > { %v1453_v59 = vmax.f32 %v1321_v11, 0.0  ;;  %v5271_v17 = vld [vmem:[%s7397_s3 + $0x60] ss:$16 sps:$4 sm:$0xff]  }
 0x15f   : > { %v6475_v0 = vpack.c.bf16 %v1455_v28, %v1454_v27  ;;  %v5272_v27 = vld [vmem:[%s7397_s3 + $0x84] ss:$16 sps:$4 sm:$0xff]  }
 0x160   : > { %3546 = vperm.xlu0 %5218, %v3384_v35   ;;  %3551 = vperm.xlu1 %5219, %v3385_v54   ;;  %v5127_v43 = vpop.f32.mrb[44].mxu1  ;;  %v6486_v49 = vpack.c.bf16 %v1453_v59, %v1452_v34 }
 0x161   : > { %v1333_v41 = vpop.f32.mrb[45].mxu1  ;;  %v1342_v25 = vadd.f32 %v5127_v43, %v6269_v50  ;;  %v6518_v35 = vpop.permute.xlu1 %1661 }
 0x162   : > { %v1334_v46 = vadd.f32 %v1333_v41, %v6198_v7  ;;  %v5128_v42 = vpop.f32.mrb[46].mxu1  ;;  %2133 = vmatmul.mubr.bf16.gmra.mrb[72].mxu1 %v5268_v12  ;;  %v3393_v12 = vld [vmem:[%s7404_s10 + $0x108] sm:$0xff] }
 0x163   : > { %v1345_v29 = vadd.f32 %v5128_v42, %v6279_v61  ;;  %v1336_v13 = vpop.f32.mrb[47].mxu1  ;;  %2140 = vmatprep.mubr.bf16.mxu1 %v5269_v1  ;;  %v1458_v32 = vmax.f32 %v1342_v25, 0.0  ;;  %v6505_v61 = vpop.permute.xlu0 %1656 }
 0x164   : > { %3556 = vperm.xlu0 %5218, %v3386_v16   ;;  %3561 = vperm.xlu1 %5219, %v3387_v33   ;;  %v1337_v50 = vadd.f32 %v1336_v13, %v6206_v31  ;;  %v1456_v22 = vmax.f32 %v1334_v46, 0.0  ;;  %v3391_v31 = vld [vmem:[%s7404_s10 + $0xf8] sm:$0xff]  ;;  %v3392_v33 = vld [vmem:[%s7404_s10 + $0x100] sm:$0xff]  ;;  %v3394_v13 = vld [vmem:[%s7404_s10 + $0x110] sm:$0xff] }
 0x165   : > { %v1459_v7 = vmax.f32 %v1345_v29, 0.0  ;;  %v6537_v25 = vpop.permute.xlu1 %1751 }
 0x166   : > { %v1457_v9 = vmax.f32 %v1337_v50, 0.0 }
 0x167   : > { %v6507_v53 = vpack.c.bf16 %v1459_v7, %v1458_v32  ;;  %v5275_v32 = vld [vmem:[%s7397_s3 + $0xa4] ss:$16 sps:$4 sm:$0xff]  }
 0x168   : > { %3566 = vperm.xlu0 %5218, %v3388_v26   ;;  %3571 = vperm.xlu1 %5219, %v3389_v23   ;;  %v5131_v52 = vpop.f32.mrb[48].mxu1  ;;  %v6520_v54 = vpack.c.bf16 %v1457_v9, %v1456_v22  ;;  %v5274_v26 = vld [vmem:[%s7397_s3 + $0x80] ss:$16 sps:$4 sm:$0xff]  }
 0x169   : > { %v1349_v11 = vpop.f32.mrb[49].mxu1  ;;  %v1358_v28 = vadd.f32 %v5131_v52, %v5964_v4  ;;  %v6535_v4 = vpop.permute.xlu0 %1746 }
 0x16a   : > { %v1350_v34 = vadd.f32 %v1349_v11, %v5912_v47  ;;  %v5132_v59 = vpop.f32.mrb[50].mxu1  ;;  %2141 = vmatmul.mubr.bf16.gmra.mrb[76].mxu1 %v5271_v17  ;;  %v3396_v17 = vld [vmem:[%s7404_s10 + $0x120] sm:$0xff]  ;;  %v6562_v11 = vpop.permute.xlu1 %1671 }
 0x16b   : > { %v1361_v43 = vadd.f32 %v5132_v59, %v5966_v5  ;;  %v1352_v16 = vpop.f32.mrb[51].mxu1  ;;  %2148 = vmatprep.mubr.bf16.mxu1 %v5272_v27  ;;  %v1462_v47 = vmax.f32 %v1358_v28, 0.0 }
 0x16c   : > { %3576 = vperm.xlu0 %5218, %v3390_v60   ;;  %3581 = vperm.xlu1 %5219, %v3391_v31   ;;  %v1353_v41 = vadd.f32 %v1352_v16, %v5914_v48  ;;  %v1460_v5 = vmax.f32 %v1350_v34, 0.0  ;;  %v3395_v48 = vld [vmem:[%s7404_s10 + $0x118] sm:$0xff] }
 0x16d   : > { %v1463_v1 = vmax.f32 %v1361_v43, 0.0  ;;  %v6553_v52 = vpop.permute.xlu0 %1666 }
 0x16e   : > { %v1461_v46 = vmax.f32 %v1353_v41, 0.0 }
 0x16f   : > { %v1501_v42 = vpack.c.bf16 %v1463_v1, %v1462_v47  ;;  %v5278_v1 = vld [vmem:[%s7397_s3 + $0xc4] ss:$16 sps:$4 sm:$0xff]  }
 0x170   : > { %3586 = vperm.xlu0 %5218, %v3392_v33   ;;  %3591 = vperm.xlu1 %5219, %v3393_v12   ;;  %v5135_v29 = vpop.f32.mrb[52].mxu1  ;;  %v1500_v50 = vpack.c.bf16 %v1461_v46, %v1460_v5  ;;  %v3398_v33 = vld [vmem:[%s7404_s10 + $0x130] sm:$0xff]  ;;  %v3399_v12 = vld [vmem:[%s7404_s10 + $0x138] sm:$0xff] }
 0x171   : > { %v1365_v23 = vpop.f32.mrb[53].mxu1  ;;  %v1374_v7 = vadd.f32 %v5135_v29, %v6047_v39  ;;  %v3397_v39 = vld [vmem:[%s7404_s10 + $0x128] sm:$0xff]  ;;  %v6579_v5 = vpop.permute.xlu0 %1756  ;;  %v7420_v46 = vld [vmem:[#allocation5_spill] sm:$0xff] }
 0x172   : > { %v1366_v22 = vadd.f32 %v1365_v23, %v6007_v21  ;;  %v5136_v9 = vpop.f32.mrb[54].mxu1  ;;  %2149 = vmatmul.mubr.bf16.gmra.mrb[80].mxu1 %v5274_v26  ;;  %4865 = vmatprep.subr.bf16.mxu0 %v1500_v50  ;;  %v7419_v21 = vld [vmem:[#allocation2_spill] sm:$0xff]  ;;  %v6582_v29 = vpop.permute.xlu1 %1761 }
 0x173   : > { %v1377_v60 = vadd.f32 %v5136_v9, %v6049_v40  ;;  %v1368_v31 = vpop.f32.mrb[55].mxu1  ;;  %4866 = vmatpush3.bf16.msra.mxu0 %v6429_v8  ;;  %2156 = vmatprep.mubr.bf16.mxu1 %v5275_v32  ;;  %v1466_v28 = vmax.f32 %v1374_v7, 0.0  ;;  %v5277_v8 = vld [vmem:[%s7397_s3 + $0xa0] ss:$16 sps:$4 sm:$0xff]   ;;  %7421 = vst [vmem:[#allocation2_spill] sm:$0xff] %v6582_v29  ;;  %v3401_v7 = vld [vmem:[%s7404_s10 + $0x148] sm:$0xff] }
 0x174   : > { %3596 = vperm.xlu0 %5218, %v3394_v13   ;;  %3601 = vperm.xlu1 %5219, %v3395_v48   ;;  %v1369_v27 = vadd.f32 %v1368_v31, %v7419_v21  ;;  %v1464_v34 = vmax.f32 %v1366_v22, 0.0  ;;  %v7422_v13 = vld [vmem:[#allocation3_spill] sm:$0xff]  ;;  %v7423_v23 = vld [vmem:[#allocation6_spill] sm:$0xff]  ;;  %v7424_v22 = vld [vmem:[#allocation4_spill] sm:$0xff] }
 0x175   : > { %v1467_v40 = vmax.f32 %v1377_v60, 0.0  ;;  %4867 = vmatprep.subr.bf16.mxu0 %v1501_v42  ;;  %v3400_v32 = vld [vmem:[%s7404_s10 + $0x140] sm:$0xff]  ;;  %v6594_v21 = vpop.permute.xlu0 %1676 }
 0x176   : > { %v1465_v59 = vmax.f32 %v1369_v27, 0.0 }
 0x177   : > { %v1503_v43 = vpack.c.bf16 %v1467_v40, %v1466_v28  ;;  %4868 = vmatpush3.bf16.msra.mxu0 %v6412_v38  ;;  %v3402_v40 = vld [vmem:[%s7404_s10 + $0x150] sm:$0xff] }
 0x178   : > { %3606 = vperm.xlu0 %5218, %v3396_v17   ;;  %3611 = vperm.xlu1 %5219, %v3397_v39   ;;  %v5139_v16 = vpop.f32.mrb[56].mxu1  ;;  %v1502_v41 = vpack.c.bf16 %v1465_v59, %v1464_v34  ;;  %v5280_v34 = vld [vmem:[%s7397_s3 + $0xc0] ss:$16 sps:$4 sm:$0xff]   ;;  %v6605_v59 = vpop.permute.xlu1 %1681 }
 0x179   : > { %v1381_v47 = vpop.f32.mrb[57].mxu1  ;;  %v1390_v42 = vadd.f32 %v5139_v16, %v7420_v46 }
 0x17a   : > { %v1382_v48 = vadd.f32 %v1381_v47, %v7422_v13  ;;  %v5140_v26 = vpop.f32.mrb[58].mxu1  ;;  %2157 = vmatmul.mubr.bf16.gmra.mrb[84].mxu1 %v5277_v8  ;;  %4869 = vmatprep.subr.bf16.mxu0 %v1502_v41  ;;  %v7425_v8 = vld [vmem:[#allocation7_spill] sm:$0xff]  ;;  %v7426_v13 = vld [vmem:[#allocation8_spill] sm:$0xff] }
 0x17b   : > { %v1393_v50 = vadd.f32 %v5140_v26, %v7423_v23  ;;  %v1384_v38 = vpop.f32.mrb[59].mxu1  ;;  %4870 = vmatpush3.bf16.msra.mxu0 %v6456_v24  ;;  %2164 = vmatprep.mubr.bf16.mxu1 %v5278_v1  ;;  %v1470_v60 = vmax.f32 %v1390_v42, 0.0  ;;  %v3403_v24 = vld [vmem:[%s7404_s10 + $0x158] sm:$0xff]  ;;  %v3405_v42 = vld [vmem:[%s7404_s10 + $0x168] sm:$0xff] }
 0x17c   : > { %3616 = vperm.xlu0 %5218, %v3398_v33   ;;  %3621 = vperm.xlu1 %5219, %v3399_v12   ;;  %v1385_v9 = vadd.f32 %v1384_v38, %v7424_v22  ;;  %v1468_v17 = vmax.f32 %v1382_v48, 0.0  ;;  %v5281_v33 = vld [vmem:[%s7397_s3 + $0xe4] ss:$16 sps:$4 sm:$0xff]   ;;  %v6624_v23 = vpop.permute.xlu1 %2493  ;;  %v5283_v22 = vld [vmem:[%s7397_s3 + $0xe0] ss:$16 sps:$4 sm:$0xff]  }
 0x17d   : > { %v1471_v31 = vmax.f32 %v1393_v50, 0.0  ;;  %4871 = vmatprep.subr.bf16.mxu0 %v1503_v43  ;;  %7428 = vst [vmem:[#allocation3_spill] sm:$0xff] %v6624_v23 }
 0x17e   : > { %v1469_v39 = vmax.f32 %v1385_v9, 0.0 }
 0x17f   : > { %v1505_v27 = vpack.c.bf16 %v1471_v31, %v1470_v60  ;;  %4872 = vmatpush3.bf16.msra.mxu0 %v6445_v18  ;;  %v3404_v18 = vld [vmem:[%s7404_s10 + $0x160] sm:$0xff] }
 0x180   : > { %3626 = vperm.xlu0 %5218, %v3400_v32   ;;  %3631 = vperm.xlu1 %5219, %v3401_v7   ;;  %v5143_v28 = vpop.f32.mrb[60].mxu1  ;;  %v1504_v43 = vpack.c.bf16 %v1469_v39, %v1468_v17  ;;  %v3406_v7 = vld [vmem:[%s7404_s10 + $0x170] sm:$0xff]  ;;  %v3408_v31 = vld [vmem:[%s7404_s10 + $0x180] sm:$0xff]  ;;  %v3409_v17 = vld [vmem:[%s7404_s10 + $0x188] sm:$0xff] }
 0x181   : > { %v1397_v16 = vpop.f32.mrb[61].mxu1  ;;  %v1406_v12 = vadd.f32 %v5143_v28, %v6255_v6  ;;  %v5287_v60 = vld [vmem:[%s7397_s3 + $0x104] ss:$16 sps:$4 sm:$0xff]  }
 0x182   : > { %v1398_v41 = vadd.f32 %v1397_v16, %v7425_v8  ;;  %v5144_v47 = vpop.f32.mrb[62].mxu1  ;;  %2165 = vmatmul.mubr.bf16.gmra.mrb[88].mxu1 %v5280_v34  ;;  %4873 = vmatprep.subr.bf16.mxu0 %v1504_v43  ;;  %v3410_v28 = vld [vmem:[%s7404_s10 + $0x190] sm:$0xff]  ;;  %v5292_v34 = vld [vmem:[%s7397_s3 + $0x2c] ss:$16 sps:$4 sm:$0xff]   ;;  %v7431_v43 = vmov 0  }
 0x183   : > { %v1409_v1 = vadd.f32 %v5144_v47, %v6258_v62  ;;  %v1400_v46 = vpop.f32.mrb[63].mxu1  ;;  %4874 = vmatpush3.bf16.msra.mxu0 %v6486_v49  ;;  %2172 = vmatprep.mubr.bf16.mxu1 %v5281_v33  ;;  %v1474_v48 = vmax.f32 %v1406_v12, 0.0  ;;  %v6622_v62 = vpop.permute.xlu0 %2488  ;;  %v3407_v49 = vld [vmem:[%s7404_s10 + $0x178] sm:$0xff]  ;;  %v3413_v12 = vld [vmem:[%s7404_s10 + $0x1a8] sm:$0xff]  ;;  %v3414_v8 = vld [vmem:[%s7404_s10 + $0x1b0] sm:$0xff] }
 0x184   : > { %3636 = vperm.xlu0 %5218, %v3402_v40   ;;  %3641 = vperm.xlu1 %5219, %v3403_v24   ;;  %v1401_v6 = vadd.f32 %v1400_v46, %v7426_v13  ;;  %7427 = vst [vmem:[#allocation5_spill] sm:$0xff] %v6622_v62  ;;  %v1472_v50 = vmax.f32 %v1398_v41, 0.0  ;;  %v3411_v40 = vld [vmem:[%s7404_s10 + $0x198] sm:$0xff]  ;;  %v5290_v24 = vld [vmem:[%s7397_s3 + $0x124] ss:$16 sps:$4 sm:$0xff]  }
 0x185   : > { %v1475_v26 = vmax.f32 %v1409_v1, 0.0  ;;  %4875 = vmatprep.subr.bf16.mxu0 %v1505_v27  ;;  %v6647_v27 = vpop.permute.xlu1 %2503  ;;  %v3415_v41 = vld [vmem:[%s7404_s10 + $0x1b8] sm:$0xff]  ;;  %v5294_v47 = vld [vmem:[%s7397_s3 + $0x120] ss:$16 sps:$4 sm:$0xff]  }
 0x186   : > { %v1473_v38 = vmax.f32 %v1401_v6, 0.0  ;;  %7430 = vst [vmem:[#allocation4_spill] sm:$0xff] %v6647_v27  ;;  %v5295_v1 = vld [vmem:[%s7397_s3 + $0x28] ss:$16 sps:$4 sm:$0xff]   ;;  %v5298_v13 = vld [vmem:[%s7397_s3 + $0x4c] ss:$16 sps:$4 sm:$0xff]  }
 0x187   : > { %v1507_v32 = vpack.c.bf16 %v1475_v26, %v1474_v48  ;;  %4876 = vmatpush3.bf16.msra.mxu0 %v6475_v0  ;;  %v6645_v39 = vpop.permute.xlu0 %2498  ;;  %v5284_v0 = vld [vmem:[%s7397_s3 + $0x8] ss:$16 sps:$4 sm:$0xff]   ;;  %v3416_v6 = vld [vmem:[%s7404_s10 + $0x1c0] sm:$0xff]  ;;  %v7443_v27 = vld [vmem:[#allocation12_spill] sm:$0xff] }
 0x188   : > { %3646 = vperm.xlu0 %5218, %v3404_v18   ;;  %3651 = vperm.xlu1 %5219, %v3405_v42   ;;  %v1506_v9 = vpack.c.bf16 %v1473_v38, %v1472_v50  ;;  %7429 = vst [vmem:[#allocation6_spill] sm:$0xff] %v6645_v39  ;;  %v5296_v42 = vld [vmem:[%s7397_s3 + $0x144] ss:$16 sps:$4 sm:$0xff]   ;;  %v3417_v48 = vld [vmem:[%s7404_s10 + $0x1c8] sm:$0xff] }
 0x189   : > { %v6672_v33 = vpop.permute.xlu1 %2513  ;;  %v3418_v38 = vld [vmem:[%s7404_s10 + $0x1d0] sm:$0xff] }
 0x18a   : > { %2173 = vmatmul.mubr.bf16.gmra.mrb[92].mxu1 %v5283_v22  ;;  %4877 = vmatprep.subr.bf16.mxu0 %v1506_v9  ;;  %7433 = vst [vmem:[#allocation8_spill] sm:$0xff] %v6672_v33  ;;  %v5302_v22 = vld [vmem:[%s7397_s3 + $0x164] ss:$16 sps:$4 sm:$0xff]   ;;  %v5304_v9 = vld [vmem:[%s7397_s3 + $0x6c] ss:$16 sps:$4 sm:$0xff]  }
 0x18b   : > { %4878 = vmatpush3.bf16.msra.mxu0 %v6520_v54  ;;  %2180 = vmatprep.mubr.bf16.mxu1 %v5287_v60  ;;  %v5289_v54 = vld [vmem:[%s7397_s3 + $0x100] ss:$16 sps:$4 sm:$0xff]   ;;  %v6670_v16 = vpop.permute.xlu0 %2508 }
 0x18c   : > { %3656 = vperm.xlu0 %5218, %v3406_v7   ;;  %3661 = vperm.xlu1 %5219, %v3407_v49   ;;  %7432 = vst [vmem:[#allocation7_spill] sm:$0xff] %v6670_v16  ;;  %v5300_v7 = vld [vmem:[%s7397_s3 + $0x140] ss:$16 sps:$4 sm:$0xff]   ;;  %v5301_v49 = vld [vmem:[%s7397_s3 + $0x48] ss:$16 sps:$4 sm:$0xff]  }
 0x18d   : > { %4879 = vmatprep.subr.bf16.mxu0 %v1507_v32  ;;  %v6694_v18 = vpop.permute.xlu1 %2523  ;;  %v3419_v32 = vld [vmem:[%s7404_s10 + $0x1d8] sm:$0xff]  ;;  %v3420_v60 = vld [vmem:[%s7404_s10 + $0x1e0] sm:$0xff] }
 0x18e   : > { %7435 = vst [vmem:[#allocation14_spill] sm:$0xff] %v6694_v18  ;;  %v7442_v18 = vld [vmem:[#allocation11_spill] sm:$0xff] }
 0x18f   : > { %4880 = vmatpush3.bf16.msra.mxu0 %v6507_v53  ;;  %v3412_v53 = vld [vmem:[%s7404_s10 + $0x1a0] sm:$0xff]  ;;  %v6692_v46 = vpop.permute.xlu0 %2518 }
 0x190   : > { %3666 = vperm.xlu0 %5218, %v3408_v31   ;;  %3671 = vperm.xlu1 %5219, %v3409_v17   ;;  %7434 = vst [vmem:[#allocation13_spill] sm:$0xff] %v6692_v46  ;;  %v3421_v31 = vld [vmem:[%s7404_s10 + $0x1e8] sm:$0xff] }
 0x191   : > { %4064 = vmatprep.subr.bf16.mxu0 %v7431_v43  ;;  %v6710_v50 = vpop.permute.xlu1 %2533 }
 0x192   : > { %2181 = vmatmul.mubr.bf16.gmra.mrb[96].mxu1 %v5289_v54  ;;  %2278 = vmatmul.mubr.bf16.vlgmr.msra.gmra.mrb[0].mxu0 %v5284_v0  ;;  %7437 = vst [vmem:[#allocation16_spill] sm:$0xff] %v6710_v50  ;;  %v5306_v54 = vld [vmem:[%s7397_s3 + $0x160] ss:$16 sps:$4 sm:$0xff]  }
 0x193   : > { %2188 = vmatprep.mubr.bf16.mxu1 %v5290_v24  ;;  %2285 = vmatprep.mubr.bf16.mxu0 %v5292_v34  ;;  %v6708_v26 = vpop.permute.xlu0 %2528  ;;  %v5307_v24 = vld [vmem:[%s7397_s3 + $0x68] ss:$16 sps:$4 sm:$0xff]   ;;  %v5308_v34 = vld [vmem:[%s7397_s3 + $0x184] ss:$16 sps:$4 sm:$0xff]  }
 0x194   : > { %3676 = vperm.xlu0 %5218, %v3410_v28   ;;  %3681 = vperm.xlu1 %5219, %v3411_v40   ;;  %7436 = vst [vmem:[#allocation15_spill] sm:$0xff] %v6708_v26  ;;  %v3422_v28 = vld [vmem:[%s7404_s10 + $0x1f0] sm:$0xff]  ;;  %v3423_v40 = vld [vmem:[%s7404_s10 + $0x1f8] sm:$0xff] }
 0x195   : > { %v6738_v0 = vpop.permute.xlu1 %2543 }
 0x196   : > { %7439 = vst [vmem:[#allocation18_spill] sm:$0xff] %v6738_v0 }
 0x197   : > { %v6736_v17 = vpop.permute.xlu0 %2538 }
 0x198   : > { %3686 = vperm.xlu0 %5218, %v3412_v53   ;;  %3691 = vperm.xlu1 %5219, %v3413_v12   ;;  %7438 = vst [vmem:[#allocation17_spill] sm:$0xff] %v6736_v17  ;;  %v5310_v53 = vld [vmem:[%s7397_s3 + $0x8c] ss:$16 sps:$4 sm:$0xff]  }
 0x19a   : > { %2189 = vmatmul.mubr.bf16.gmra.mrb[100].mxu1 %v5294_v47  ;;  %2286 = vmatmul.mubr.bf16.gmra.mrb[4].mxu0 %v5295_v1  ;;  %v5313_v47 = vld [vmem:[%s7397_s3 + $0x88] ss:$16 sps:$4 sm:$0xff]   ;;  %v5314_v1 = vld [vmem:[%s7397_s3 + $0x1a4] ss:$16 sps:$4 sm:$0xff]  }
 0x19b   : > { %2196 = vmatprep.mubr.bf16.mxu1 %v5296_v42  ;;  %2293 = vmatprep.mubr.bf16.mxu0 %v5298_v13  ;;  %v6758_v12 = vpop.permute.xlu0 %2548  ;;  %v5316_v42 = vld [vmem:[%s7397_s3 + $0xac] ss:$16 sps:$4 sm:$0xff]   ;;  %v5318_v13 = vld [vmem:[%s7397_s3 + $0x1a0] ss:$16 sps:$4 sm:$0xff]  }
 0x19c   : > { %3696 = vperm.xlu0 %5218, %v3414_v8   ;;  %3701 = vperm.xlu1 %5219, %v3415_v41   ;;  %7440 = vst [vmem:[#allocation19_spill] sm:$0xff] %v6758_v12  ;;  %v6760_v8 = vpop.permute.xlu1 %2553  ;;  %v5312_v41 = vld [vmem:[%s7397_s3 + $0x180] ss:$16 sps:$4 sm:$0xff]  }
 0x19d   : > { %7441 = vst [vmem:[#allocation20_spill] sm:$0xff] %v6760_v8 }
 0x1a0   : > { %3706 = vperm.xlu0 %5218, %v3416_v6   ;;  %3711 = vperm.xlu1 %5219, %v3417_v48   ;;  %v5319_v6 = vld [vmem:[%s7397_s3 + $0xa8] ss:$16 sps:$4 sm:$0xff]   ;;  %v5320_v48 = vld [vmem:[%s7397_s3 + $0x1c4] ss:$16 sps:$4 sm:$0xff]  }
 0x1a2   : > { %2197 = vmatmul.mubr.bf16.gmra.mrb[104].mxu1 %v5300_v7  ;;  %2294 = vmatmul.mubr.bf16.gmra.mrb[8].mxu0 %v5301_v49  ;;  %v5325_v7 = vld [vmem:[%s7397_s3 + $0xc8] ss:$16 sps:$4 sm:$0xff]   ;;  %v5326_v49 = vld [vmem:[%s7397_s3 + $0x1e4] ss:$16 sps:$4 sm:$0xff]  }
 0x1a3   : > { %2204 = vmatprep.mubr.bf16.mxu1 %v5302_v22  ;;  %2301 = vmatprep.mubr.bf16.mxu0 %v5304_v9  ;;  %v5328_v22 = vld [vmem:[%s7397_s3 + $0xec] ss:$16 sps:$4 sm:$0xff]   ;;  %v5330_v9 = vld [vmem:[%s7397_s3 + $0x1e0] ss:$16 sps:$4 sm:$0xff]  }
 0x1a4   : > { %3716 = vperm.xlu0 %5218, %v3418_v38   ;;  %3721 = vperm.xlu1 %5219, %v3419_v32   ;;  %v5322_v38 = vld [vmem:[%s7397_s3 + $0xcc] ss:$16 sps:$4 sm:$0xff]   ;;  %v5324_v32 = vld [vmem:[%s7397_s3 + $0x1c0] ss:$16 sps:$4 sm:$0xff]  }
 0x1a8   : > { %3726 = vperm.xlu0 %5218, %v3420_v60   ;;  %3731 = vperm.xlu1 %5219, %v3421_v31   ;;  %v5331_v60 = vld [vmem:[%s7397_s3 + $0xe8] ss:$16 sps:$4 sm:$0xff]   ;;  %v5332_v31 = vld [vmem:[%s7397_s3 + $0x10c] ss:$16 sps:$4 sm:$0xff]  }
 0x1aa   : > { %2205 = vmatmul.mubr.bf16.gmra.mrb[108].mxu1 %v5306_v54  ;;  %2302 = vmatmul.mubr.bf16.gmra.mrb[12].mxu0 %v5307_v24  ;;  %v5337_v54 = vld [vmem:[%s7397_s3 + $0x128] ss:$16 sps:$4 sm:$0xff]   ;;  %v5338_v24 = vld [vmem:[%s7397_s3 + $0x14c] ss:$16 sps:$4 sm:$0xff]  }
 0x1ab   : > { %2212 = vmatprep.mubr.bf16.mxu1 %v5308_v34  ;;  %2309 = vmatprep.mubr.bf16.mxu0 %v5310_v53  ;;  %v5340_v34 = vld [vmem:[%s7397_s3 + $0x148] ss:$16 sps:$4 sm:$0xff]   ;;  %v5341_v53 = vld [vmem:[%s7397_s3 + $0x16c] ss:$16 sps:$4 sm:$0xff]  }
 0x1ac   : > { %3736 = vperm.xlu0 %5218, %v3422_v28   ;;  %3741 = vperm.xlu1 %5219, %v3423_v40   ;;  %v5334_v28 = vld [vmem:[%s7397_s3 + $0x108] ss:$16 sps:$4 sm:$0xff]   ;;  %v5335_v40 = vld [vmem:[%s7397_s3 + $0x12c] ss:$16 sps:$4 sm:$0xff]  }
 0x1b2   : > { %2213 = vmatmul.mubr.bf16.gmra.mrb[112].mxu1 %v5312_v41  ;;  %2310 = vmatmul.mubr.bf16.gmra.mrb[16].mxu0 %v5313_v47  ;;  %v5343_v41 = vld [vmem:[%s7397_s3 + $0x168] ss:$16 sps:$4 sm:$0xff]   ;;  %v5344_v47 = vld [vmem:[%s7397_s3 + $0x18c] ss:$16 sps:$4 sm:$0xff]  }
 0x1b3   : > { %2220 = vmatprep.mubr.bf16.mxu1 %v5314_v1  ;;  %2317 = vmatprep.mubr.bf16.mxu0 %v5316_v42  ;;  %v5346_v1 = vld [vmem:[%s7397_s3 + $0x188] ss:$16 sps:$4 sm:$0xff]   ;;  %v5347_v42 = vld [vmem:[%s7397_s3 + $0x1ac] ss:$16 sps:$4 sm:$0xff]  }
 0x1ba   : > { %2221 = vmatmul.mubr.bf16.gmra.mrb[116].mxu1 %v5318_v13  ;;  %2318 = vmatmul.mubr.bf16.gmra.mrb[20].mxu0 %v5319_v6  ;;  %v5349_v13 = vld [vmem:[%s7397_s3 + $0x1a8] ss:$16 sps:$4 sm:$0xff]   ;;  %v5350_v6 = vld [vmem:[%s7397_s3 + $0x1cc] ss:$16 sps:$4 sm:$0xff]  }
 0x1bb   : > { %2228 = vmatprep.mubr.bf16.mxu1 %v5320_v48  ;;  %2325 = vmatprep.mubr.bf16.mxu0 %v5322_v38  ;;  %v5352_v48 = vld [vmem:[%s7397_s3 + $0x1c8] ss:$16 sps:$4 sm:$0xff]   ;;  %v5353_v38 = vld [vmem:[%s7397_s3 + $0x1ec] ss:$16 sps:$4 sm:$0xff]  }
 0x1c2   : > { %2229 = vmatmul.mubr.bf16.gmra.mrb[120].mxu1 %v5324_v32  ;;  %2326 = vmatmul.mubr.bf16.gmra.mrb[24].mxu0 %v5325_v7  ;;  %v5355_v32 = vld [vmem:[%s7397_s3 + $0x1e8] ss:$16 sps:$4 sm:$0xff]  }
 0x1c3   : > { %2236 = vmatprep.mubr.bf16.mxu1 %v5326_v49  ;;  %2333 = vmatprep.mubr.bf16.mxu0 %v5328_v22 }
 0x1ca   : > { %2237 = vmatmul.mubr.bf16.gmra.mrb[124].mxu1 %v5330_v9  ;;  %2334 = vmatmul.mubr.bf16.gmra.mrb[28].mxu0 %v5331_v60 }
 0x1cb   : > { %2341 = vmatprep.mubr.bf16.mxu0 %v5332_v31 }
 0x1d2   : > { %2342 = vmatmul.mubr.bf16.gmra.mrb[32].mxu0 %v5334_v28 }
 0x1d3   : > { %2349 = vmatprep.mubr.bf16.mxu0 %v5335_v40 }
 0x1da   : > { %2350 = vmatmul.mubr.bf16.gmra.mrb[36].mxu0 %v5337_v54 }
 0x1db   : > { %2357 = vmatprep.mubr.bf16.mxu0 %v5338_v24 }
 0x1e2   : > { %2358 = vmatmul.mubr.bf16.gmra.mrb[40].mxu0 %v5340_v34 }
 0x1e3   : > { %2365 = vmatprep.mubr.bf16.mxu0 %v5341_v53 }
 0x1ea   : > { %2366 = vmatmul.mubr.bf16.gmra.mrb[44].mxu0 %v5343_v41 }
 0x1eb   : > { %2373 = vmatprep.mubr.bf16.mxu0 %v5344_v47 }
 0x1f2   : > { %2374 = vmatmul.mubr.bf16.gmra.mrb[48].mxu0 %v5346_v1 }
 0x1f3   : > { %2381 = vmatprep.mubr.bf16.mxu0 %v5347_v42 }
 0x1fa   : > { %2382 = vmatmul.mubr.bf16.gmra.mrb[52].mxu0 %v5349_v13 }
 0x1fb   : > { %2389 = vmatprep.mubr.bf16.mxu0 %v5350_v6 }
 0x202   : > { %2390 = vmatmul.mubr.bf16.gmra.mrb[56].mxu0 %v5352_v48 }
 0x203   : > { %2397 = vmatprep.mubr.bf16.mxu0 %v5353_v38 }
 0x20a   : > { %2398 = vmatmul.mubr.bf16.gmra.mrb[60].mxu0 %v5355_v32 }
 0x225   : > { %v4769_v7 = vpop.f32.mrb[64].mxu1 }
 0x226   : > { %v4770_v49 = vpop.f32.mrb[65].mxu1 }
 0x227   : > { %v4771_v22 = vadd.f32 %v4770_v49, %v4769_v7  ;;  %v4772_v9 = vpop.f32.mrb[66].mxu1 }
 0x228   : > { %v4773_v60 = vpop.f32.mrb[67].mxu1 }
 0x229   : > { %v4774_v31 = vadd.f32 %v4773_v60, %v4772_v9  ;;  %v2119_v46 = vadd.f32 %v4771_v22, %v7442_v18 }
 0x22d   : > { %v4775_v28 = vpop.f32.mrb[68].mxu1 }
 0x22e   : > { %v4776_v40 = vpop.f32.mrb[69].mxu1 }
 0x22f   : > { %v6852_v54 = vadd.f32 %v4776_v40, %v4775_v28  ;;  %v4778_v24 = vpop.f32.mrb[70].mxu1 }
 0x230   : > { %v4779_v34 = vpop.f32.mrb[71].mxu1 }
 0x231   : > { %v6854_v53 = vadd.f32 %v4779_v34, %v4778_v24  ;;  %v2127_v62 = vadd.f32 %v6852_v54, %v6340_v30 }
 0x235   : > { %v4781_v41 = vpop.f32.mrb[72].mxu1 }
 0x236   : > { %v4782_v47 = vpop.f32.mrb[73].mxu1 }
 0x237   : > { %v6856_v1 = vadd.f32 %v4782_v47, %v4781_v41  ;;  %v4784_v42 = vpop.f32.mrb[74].mxu1 }
 0x238   : > { %v4785_v13 = vpop.f32.mrb[75].mxu1 }
 0x239   : > { %v6858_v6 = vadd.f32 %v4785_v13, %v4784_v42 }
 0x23d   : > { %v4787_v48 = vpop.f32.mrb[76].mxu1 }
 0x23e   : > { %v4788_v38 = vpop.f32.mrb[77].mxu1 }
 0x23f   : > { %v6860_v32 = vadd.f32 %v4788_v38, %v4787_v48  ;;  %v4790_v7 = vpop.f32.mrb[78].mxu1 }
 0x240   : > { %v4791_v49 = vpop.f32.mrb[79].mxu1 }
 0x241   : > { %v6862_v9 = vadd.f32 %v4791_v49, %v4790_v7 }
 0x245   : > { %v4793_v60 = vpop.f32.mrb[80].mxu1 }
 0x246   : > { %v4794_v28 = vpop.f32.mrb[81].mxu1 }
 0x247   : > { %v6864_v40 = vadd.f32 %v4794_v28, %v4793_v60  ;;  %v4796_v24 = vpop.f32.mrb[82].mxu1 }
 0x248   : > { %v4797_v34 = vpop.f32.mrb[83].mxu1 }
 0x249   : > { %v6866_v41 = vadd.f32 %v4797_v34, %v4796_v24 }
 0x24d   : > { %v4799_v47 = vpop.f32.mrb[84].mxu1 }
 0x24e   : > { %v4800_v43 = vpop.f32.mrb[85].mxu1 }
 0x24f   : > { %v6868_v42 = vadd.f32 %v4800_v43, %v4799_v47  ;;  %v4802_v13 = vpop.f32.mrb[86].mxu1 }
 0x250   : > { %v4803_v8 = vpop.f32.mrb[87].mxu1 }
 0x251   : > { %v6870_v48 = vadd.f32 %v4803_v8, %v4802_v13 }
 0x255   : > { %v4805_v38 = vpop.f32.mrb[88].mxu1 }
 0x256   : > { %v4806_v12 = vpop.f32.mrb[89].mxu1 }
 0x257   : > { %v6872_v7 = vadd.f32 %v4806_v12, %v4805_v38  ;;  %v4808_v49 = vpop.f32.mrb[90].mxu1 }
 0x258   : > { %v4809_v0 = vpop.f32.mrb[91].mxu1 }
 0x259   : > { %v6874_v60 = vadd.f32 %v4809_v0, %v4808_v49 }
 0x25d   : > { %v4811_v28 = vpop.f32.mrb[92].mxu1 }
 0x25e   : > { %v4812_v17 = vpop.f32.mrb[93].mxu1 }
 0x25f   : > { %v6876_v24 = vadd.f32 %v4812_v17, %v4811_v28  ;;  %v4814_v34 = vpop.f32.mrb[94].mxu1  ;;  %v2122_v17 = vadd.f32 %v4774_v31, %v7443_v27 }
 0x260   : > { %v4815_v50 = vpop.f32.mrb[95].mxu1 }
 0x261   : > { %v6878_v43 = vadd.f32 %v4815_v50, %v4814_v34  ;;  %v5358_v34 = vld [vmem:[%s7399_s5 + $0x4] ss:$8 sps:$4 sm:$0xff]  }
 0x262   : > { %2678 = vmatprep.mubr.bf16.mxu1 %v5358_v34 }
 0x265   : > { %v4817_v47 = vpop.f32.mrb[96].mxu1  ;;  %v4881_v26 = vpop.f32.mrb[0].mxu0 }
 0x266   : > { %v4818_v8 = vpop.f32.mrb[97].mxu1  ;;  %v4882_v13 = vpop.f32.mrb[1].mxu0 }
 0x267   : > { %v6881_v12 = vadd.f32 %v4818_v8, %v4817_v47  ;;  %v4883_v38 = vadd.f32 %v4882_v13, %v4881_v26  ;;  %v4820_v33 = vpop.f32.mrb[98].mxu1  ;;  %v4884_v0 = vpop.f32.mrb[2].mxu0 }
 0x268   : > { %v4821_v49 = vpop.f32.mrb[99].mxu1  ;;  %v4885_v16 = vpop.f32.mrb[3].mxu0 }
 0x269   : > { %v2280_v28 = vadd.f32 %v4883_v38, %v2119_v46  ;;  %v6884_v39 = vadd.f32 %v4821_v49, %v4820_v33  ;;  %v4886_v50 = vadd.f32 %v4885_v16, %v4884_v0  ;;  %v2130_v49 = vadd.f32 %v6854_v53, %v6348_v56 }
 0x26b   : > { %v2283_v23 = vadd.f32 %v4886_v50, %v2122_v17  ;;  %v2406_v18 = vmax.f32 %v2280_v28, 0.0 }
 0x26d   : > { %v2407_v22 = vmax.f32 %v2283_v23, 0.0  ;;  %v4823_v47 = vpop.f32.mrb[100].mxu1  ;;  %v4887_v26 = vpop.f32.mrb[4].mxu0 }
 0x26e   : > { %v4824_v8 = vpop.f32.mrb[101].mxu1  ;;  %v4888_v13 = vpop.f32.mrb[5].mxu0 }
 0x26f   : > { %v6891_v27 = vpack.c.bf16 %v2407_v22, %v2406_v18  ;;  %v6893_v33 = vadd.f32 %v4824_v8, %v4823_v47  ;;  %v4889_v16 = vadd.f32 %v4888_v13, %v4887_v26  ;;  %v4826_v46 = vpop.f32.mrb[102].mxu1  ;;  %v4890_v31 = vpop.f32.mrb[6].mxu0  ;;  %v2135_v47 = vadd.f32 %v6856_v1, %v6375_v14 }
 0x270   : > { %v4827_v38 = vpop.f32.mrb[103].mxu1  ;;  %v4891_v0 = vpop.f32.mrb[7].mxu0 }
 0x271   : > { %v2288_v23 = vadd.f32 %v4889_v16, %v2127_v62  ;;  %v6897_v17 = vadd.f32 %v4827_v38, %v4826_v46  ;;  %v4892_v28 = vadd.f32 %v4891_v0, %v4890_v31  ;;  %v2138_v46 = vadd.f32 %v6858_v6, %v6384_v3 }
 0x273   : > { %v2291_v50 = vadd.f32 %v4892_v28, %v2130_v49  ;;  %v2408_v34 = vmax.f32 %v2288_v23, 0.0 }
 0x275   : > { %v2409_v29 = vmax.f32 %v2291_v50, 0.0  ;;  %v4829_v30 = vpop.f32.mrb[104].mxu1  ;;  %v4893_v54 = vpop.f32.mrb[8].mxu0 }
 0x276   : > { %v4830_v18 = vpop.f32.mrb[105].mxu1  ;;  %v4894_v22 = vpop.f32.mrb[9].mxu0 }
 0x277   : > { %v6901_v26 = vpack.c.bf16 %v2409_v29, %v2408_v34  ;;  %v6903_v8 = vadd.f32 %v4830_v18, %v4829_v30  ;;  %v4895_v13 = vadd.f32 %v4894_v22, %v4893_v54  ;;  %v4832_v56 = vpop.f32.mrb[106].mxu1  ;;  %v4896_v62 = vpop.f32.mrb[10].mxu0  ;;  %v2143_v34 = vadd.f32 %v6860_v32, %v6410_v10 }
 0x278   : > { %v4833_v53 = vpop.f32.mrb[107].mxu1  ;;  %v4897_v16 = vpop.f32.mrb[11].mxu0 }
 0x279   : > { %v2296_v31 = vadd.f32 %v4895_v13, %v2135_v47  ;;  %v6907_v38 = vadd.f32 %v4833_v53, %v4832_v56  ;;  %v4898_v0 = vadd.f32 %v4897_v16, %v4896_v62  ;;  %v2146_v13 = vadd.f32 %v6862_v9, %v6423_v58 }
 0x27b   : > { %v2299_v49 = vadd.f32 %v4898_v0, %v2138_v46  ;;  %v2410_v23 = vmax.f32 %v2296_v31, 0.0 }
 0x27d   : > { %v2411_v28 = vmax.f32 %v2299_v49, 0.0  ;;  %v4835_v14 = vpop.f32.mrb[108].mxu1  ;;  %v4899_v29 = vpop.f32.mrb[12].mxu0 }
 0x27e   : > { %v4836_v1 = vpop.f32.mrb[109].mxu1  ;;  %v4900_v50 = vpop.f32.mrb[13].mxu0 }
 0x27f   : > { %v6911_v30 = vpack.c.bf16 %v2411_v28, %v2410_v23  ;;  %v6913_v54 = vadd.f32 %v4836_v1, %v4835_v14  ;;  %v4901_v18 = vadd.f32 %v4900_v50, %v4899_v29  ;;  %v4838_v3 = vpop.f32.mrb[110].mxu1  ;;  %v4902_v6 = vpop.f32.mrb[14].mxu0  ;;  %v2151_v23 = vadd.f32 %v6864_v40, %v6463_v57 }
 0x280   : > { %v4839_v22 = vpop.f32.mrb[111].mxu1  ;;  %v4903_v47 = vpop.f32.mrb[15].mxu0 }
 0x281   : > { %v2304_v56 = vadd.f32 %v4901_v18, %v2143_v34  ;;  %v6917_v62 = vadd.f32 %v4839_v22, %v4838_v3  ;;  %v4904_v53 = vadd.f32 %v4903_v47, %v4902_v6  ;;  %v2154_v34 = vadd.f32 %v6866_v41, %v6472_v55 }
 0x283   : > { %v2307_v16 = vadd.f32 %v4904_v53, %v2146_v13  ;;  %v2412_v46 = vmax.f32 %v2304_v56, 0.0 }
 0x285   : > { %v2413_v31 = vmax.f32 %v2307_v16, 0.0  ;;  %v4841_v10 = vpop.f32.mrb[112].mxu1  ;;  %v4905_v32 = vpop.f32.mrb[16].mxu0  ;;  %v2159_v16 = vadd.f32 %v6868_v42, %v6505_v61 }
 0x286   : > { %v4842_v0 = vpop.f32.mrb[113].mxu1  ;;  %v4906_v49 = vpop.f32.mrb[17].mxu0 }
 0x287   : > { %v6921_v28 = vpack.c.bf16 %v2413_v31, %v2412_v46  ;;  %v6923_v14 = vadd.f32 %v4842_v0, %v4841_v10  ;;  %v4907_v29 = vadd.f32 %v4906_v49, %v4905_v32  ;;  %v4844_v58 = vpop.f32.mrb[114].mxu1  ;;  %v4908_v9 = vpop.f32.mrb[18].mxu0  ;;  %v2162_v49 = vadd.f32 %v6870_v48, %v6518_v35 }
 0x288   : > { %v4845_v1 = vpop.f32.mrb[115].mxu1  ;;  %v4909_v50 = vpop.f32.mrb[19].mxu0 }
 0x289   : > { %v2312_v18 = vadd.f32 %v4907_v29, %v2151_v23  ;;  %v6927_v3 = vadd.f32 %v4845_v1, %v4844_v58  ;;  %v4910_v6 = vadd.f32 %v4909_v50, %v4908_v9 }
 0x28b   : > { %v2315_v22 = vadd.f32 %v4910_v6, %v2154_v34  ;;  %v2414_v47 = vmax.f32 %v2312_v18, 0.0  ;;  %v2167_v6 = vadd.f32 %v6872_v7, %v6553_v52 }
 0x28d   : > { %v2415_v13 = vmax.f32 %v2315_v22, 0.0  ;;  %v4847_v57 = vpop.f32.mrb[116].mxu1  ;;  %v4911_v40 = vpop.f32.mrb[20].mxu0 }
 0x28e   : > { %v4848_v56 = vpop.f32.mrb[117].mxu1  ;;  %v4912_v53 = vpop.f32.mrb[21].mxu0 }
 0x28f   : > { %v6931_v46 = vpack.c.bf16 %v2415_v13, %v2414_v47  ;;  %v6933_v31 = vadd.f32 %v4848_v56, %v4847_v57  ;;  %v4913_v10 = vadd.f32 %v4912_v53, %v4911_v40  ;;  %v4850_v55 = vpop.f32.mrb[118].mxu1  ;;  %v4914_v41 = vpop.f32.mrb[22].mxu0  ;;  %v2170_v56 = vadd.f32 %v6874_v60, %v6562_v11 }
 0x290   : > { %v4851_v32 = vpop.f32.mrb[119].mxu1  ;;  %v4915_v0 = vpop.f32.mrb[23].mxu0 }
 0x291   : > { %v2320_v23 = vadd.f32 %v4913_v10, %v2159_v16  ;;  %v6937_v29 = vadd.f32 %v4851_v32, %v4850_v55  ;;  %v4916_v58 = vadd.f32 %v4915_v0, %v4914_v41 }
 0x293   : > { %v2323_v9 = vadd.f32 %v4916_v58, %v2162_v49  ;;  %v2416_v1 = vmax.f32 %v2320_v23, 0.0  ;;  %v2175_v23 = vadd.f32 %v6876_v24, %v6594_v21 }
 0x295   : > { %v2417_v50 = vmax.f32 %v2323_v9, 0.0  ;;  %v4853_v61 = vpop.f32.mrb[120].mxu1  ;;  %v4917_v42 = vpop.f32.mrb[24].mxu0 }
 0x296   : > { %v4854_v34 = vpop.f32.mrb[121].mxu1  ;;  %v4918_v18 = vpop.f32.mrb[25].mxu0 }
 0x297   : > { %v6941_v22 = vpack.c.bf16 %v2417_v50, %v2416_v1  ;;  %v6943_v47 = vadd.f32 %v4854_v34, %v4853_v61  ;;  %v4919_v13 = vadd.f32 %v4918_v18, %v4917_v42  ;;  %v4856_v35 = vpop.f32.mrb[122].mxu1  ;;  %v4920_v48 = vpop.f32.mrb[26].mxu0  ;;  %v2178_v42 = vadd.f32 %v6878_v43, %v6605_v59 }
 0x298   : > { %v4857_v57 = vpop.f32.mrb[123].mxu1  ;;  %v4921_v40 = vpop.f32.mrb[27].mxu0 }
 0x299   : > { %v2328_v53 = vadd.f32 %v4919_v13, %v2167_v6  ;;  %v6947_v16 = vadd.f32 %v4857_v57, %v4856_v35  ;;  %v4922_v10 = vadd.f32 %v4921_v40, %v4920_v48  ;;  %v7444_v57 = vld [vmem:[#allocation9_spill] sm:$0xff] }
 0x29a   : > { %v2183_v40 = vadd.f32 %v6881_v12, %v7444_v57 }
 0x29b   : > { %v2331_v55 = vadd.f32 %v4922_v10, %v2170_v56  ;;  %v2418_v41 = vmax.f32 %v2328_v53, 0.0 }
 0x29d   : > { %v2419_v32 = vmax.f32 %v2331_v55, 0.0  ;;  %v4859_v52 = vpop.f32.mrb[124].mxu1  ;;  %v4923_v7 = vpop.f32.mrb[28].mxu0 }
 0x29e   : > { %v4860_v0 = vpop.f32.mrb[125].mxu1  ;;  %v4924_v49 = vpop.f32.mrb[29].mxu0 }
 0x29f   : > { %v6951_v58 = vpack.c.bf16 %v2419_v32, %v2418_v41  ;;  %v6953_v9 = vadd.f32 %v4860_v0, %v4859_v52  ;;  %v4925_v1 = vadd.f32 %v4924_v49, %v4923_v7  ;;  %v4862_v11 = vpop.f32.mrb[126].mxu1  ;;  %v4926_v60 = vpop.f32.mrb[30].mxu0  ;;  %v7445_v41 = vld [vmem:[#allocation10_spill] sm:$0xff] }
 0x2a0   : > { %v4863_v50 = vpop.f32.mrb[127].mxu1  ;;  %v4927_v61 = vpop.f32.mrb[31].mxu0  ;;  %v2186_v59 = vadd.f32 %v6884_v39, %v7445_v41 }
 0x2a1   : > { %v2336_v34 = vadd.f32 %v4925_v1, %v2175_v23  ;;  %v6957_v18 = vadd.f32 %v4863_v50, %v4862_v11  ;;  %v4928_v6 = vadd.f32 %v4927_v61, %v4926_v60  ;;  %v2191_v1 = vadd.f32 %v6893_v33, %v6325_v44 }
 0x2a2   : > { %v2194_v61 = vadd.f32 %v6897_v17, %v6328_v36  ;;  %v2199_v44 = vadd.f32 %v6903_v8, %v6362_v51  ;;  %v2202_v36 = vadd.f32 %v6907_v38, %v6364_v20  ;;  %v2207_v51 = vadd.f32 %v6913_v54, %v6395_v19 }
 0x2a3   : > { %v2339_v13 = vadd.f32 %v4928_v6, %v2178_v42  ;;  %v2420_v35 = vmax.f32 %v2336_v34, 0.0  ;;  %v2210_v20 = vadd.f32 %v6917_v62, %v6398_v37  ;;  %v2215_v19 = vadd.f32 %v6923_v14, %v6441_v45 }
 0x2a4   : > { %v2218_v37 = vadd.f32 %v6927_v3, %v6443_v15  ;;  %v2223_v45 = vadd.f32 %v6933_v31, %v6491_v63  ;;  %v2226_v15 = vadd.f32 %v6937_v29, %v6494_v2  ;;  %v2231_v63 = vadd.f32 %v6943_v47, %v6535_v4 }
 0x2a5   : > { %v2421_v48 = vmax.f32 %v2339_v13, 0.0  ;;  %v4929_v21 = vpop.f32.mrb[32].mxu0  ;;  %v2234_v2 = vadd.f32 %v6947_v16, %v6537_v25  ;;  %v2239_v4 = vadd.f32 %v6953_v9, %v6579_v5  ;;  %v5356_v5 = vld [vmem:[%s7399_s5] ss:$8 sps:$4 sm:$0xff]   ;;  %v5359_v9 = vld [vmem:[%s7399_s5 + $0x14] ss:$8 sps:$4 sm:$0xff]  }
 0x2a6   : > { %v4930_v24 = vpop.f32.mrb[33].mxu0 }
 0x2a7   : > { %v6961_v56 = vpack.c.bf16 %v2421_v48, %v2420_v35  ;;  %v4931_v53 = vadd.f32 %v4930_v24, %v4929_v21  ;;  %v4932_v10 = vpop.f32.mrb[34].mxu0 }
 0x2a8   : > { %v4933_v55 = vpop.f32.mrb[35].mxu0 }
 0x2a9   : > { %v2344_v43 = vadd.f32 %v4931_v53, %v2183_v40  ;;  %v4934_v32 = vadd.f32 %v4933_v55, %v4932_v10 }
 0x2ab   : > { %v2347_v52 = vadd.f32 %v4934_v32, %v2186_v59  ;;  %v2422_v7 = vmax.f32 %v2344_v43, 0.0 }
 0x2ad   : > { %v2423_v0 = vmax.f32 %v2347_v52, 0.0  ;;  %v4935_v49 = vpop.f32.mrb[36].mxu0 }
 0x2ae   : > { %v4936_v23 = vpop.f32.mrb[37].mxu0 }
 0x2af   : > { %v4937_v11 = vadd.f32 %v4936_v23, %v4935_v49  ;;  %v4938_v12 = vpop.f32.mrb[38].mxu0  ;;  %v2446_v60 = vpack.c.bf16 %v2423_v0, %v2422_v7 }
 0x2b0   : > { %v4939_v50 = vpop.f32.mrb[39].mxu0 }
 0x2b1   : > { %v2352_v42 = vadd.f32 %v4937_v11, %v2191_v1  ;;  %v4940_v34 = vadd.f32 %v4939_v50, %v4938_v12  ;;  %4977 = vmatprep.subr.bf16.mxu1 %v2446_v60 }
 0x2b2   : > { %4978 = vmatpush3.bf16.msra.mxu1 %v6891_v27 }
 0x2b3   : > { %v2355_v39 = vadd.f32 %v4940_v34, %v2194_v61  ;;  %v2424_v6 = vmax.f32 %v2352_v42, 0.0 }
 0x2b5   : > { %v2425_v13 = vmax.f32 %v2355_v39, 0.0  ;;  %v4941_v35 = vpop.f32.mrb[40].mxu0 }
 0x2b6   : > { %v4942_v48 = vpop.f32.mrb[41].mxu0 }
 0x2b7   : > { %v4943_v33 = vadd.f32 %v4942_v48, %v4941_v35  ;;  %v4944_v21 = vpop.f32.mrb[42].mxu0  ;;  %v2447_v24 = vpack.c.bf16 %v2425_v13, %v2424_v6 }
 0x2b8   : > { %v4945_v57 = vpop.f32.mrb[43].mxu0 }
 0x2b9   : > { %v2360_v17 = vadd.f32 %v4943_v33, %v2199_v44  ;;  %v4946_v40 = vadd.f32 %v4945_v57, %v4944_v21  ;;  %4979 = vmatprep.subr.bf16.mxu1 %v2447_v24 }
 0x2ba   : > { %4980 = vmatpush3.bf16.msra.mxu1 %v6901_v26 }
 0x2bb   : > { %v2363_v27 = vadd.f32 %v4946_v40, %v2202_v36  ;;  %v2426_v53 = vmax.f32 %v2360_v17, 0.0 }
 0x2bd   : > { %v2427_v10 = vmax.f32 %v2363_v27, 0.0  ;;  %v4947_v55 = vpop.f32.mrb[44].mxu0 }
 0x2be   : > { %v4948_v41 = vpop.f32.mrb[45].mxu0 }
 0x2bf   : > { %v4949_v8 = vadd.f32 %v4948_v41, %v4947_v55  ;;  %v4950_v59 = vpop.f32.mrb[46].mxu0  ;;  %v2448_v43 = vpack.c.bf16 %v2427_v10, %v2426_v53 }
 0x2c0   : > { %v4951_v32 = vpop.f32.mrb[47].mxu0 }
 0x2c1   : > { %v2368_v38 = vadd.f32 %v4949_v8, %v2207_v51  ;;  %v4952_v52 = vadd.f32 %v4951_v32, %v4950_v59  ;;  %4981 = vmatprep.subr.bf16.mxu1 %v2448_v43  ;;  %v7446_v8 = vld [vmem:[#allocation2_spill] sm:$0xff] }
 0x2c2   : > { %4982 = vmatpush3.bf16.msra.mxu1 %v6911_v30  ;;  %v2242_v25 = vadd.f32 %v6957_v18, %v7446_v8  ;;  %v5362_v18 = vld [vmem:[%s7399_s5 + $0x24] ss:$8 sps:$4 sm:$0xff]  }
 0x2c3   : > { %v2371_v26 = vadd.f32 %v4952_v52, %v2210_v20  ;;  %v2428_v7 = vmax.f32 %v2368_v38, 0.0  ;;  %v5365_v38 = vld [vmem:[%s7399_s5 + $0x34] ss:$8 sps:$4 sm:$0xff]   ;;  %v5367_v52 = vld [vmem:[%s7399_s5 + $0x30] ss:$8 sps:$4 sm:$0xff]  }
 0x2c5   : > { %v2429_v0 = vmax.f32 %v2371_v26, 0.0  ;;  %v4953_v49 = vpop.f32.mrb[48].mxu0  ;;  %v5368_v26 = vld [vmem:[%s7399_s5 + $0x44] ss:$8 sps:$4 sm:$0xff]  }
 0x2c6   : > { %v4954_v23 = vpop.f32.mrb[49].mxu0 }
 0x2c7   : > { %v4955_v54 = vadd.f32 %v4954_v23, %v4953_v49  ;;  %v4956_v1 = vpop.f32.mrb[50].mxu0  ;;  %v2449_v11 = vpack.c.bf16 %v2429_v0, %v2428_v7  ;;  %v5370_v7 = vld [vmem:[%s7399_s5 + $0x40] ss:$8 sps:$4 sm:$0xff]   ;;  %v5371_v0 = vld [vmem:[%s7399_s5 + $0x54] ss:$8 sps:$4 sm:$0xff]  }
 0x2c8   : > { %v4957_v12 = vpop.f32.mrb[51].mxu0  ;;  %v5373_v49 = vld [vmem:[%s7399_s5 + $0x50] ss:$8 sps:$4 sm:$0xff]   ;;  %v5374_v23 = vld [vmem:[%s7399_s5 + $0x64] ss:$8 sps:$4 sm:$0xff]  }
 0x2c9   : > { %v2376_v62 = vadd.f32 %v4955_v54, %v2215_v19  ;;  %v4958_v60 = vadd.f32 %v4957_v12, %v4956_v1  ;;  %4983 = vmatprep.subr.bf16.mxu1 %v2449_v11  ;;  %v5376_v19 = vld [vmem:[%s7399_s5 + $0x60] ss:$8 sps:$4 sm:$0xff]   ;;  %v5377_v54 = vld [vmem:[%s7399_s5 + $0x74] ss:$8 sps:$4 sm:$0xff]   ;;  %v5379_v1 = vld [vmem:[%s7399_s5 + $0x70] ss:$8 sps:$4 sm:$0xff]  }
 0x2ca   : > { %4984 = vmatpush3.bf16.msra.mxu1 %v6921_v28  ;;  %v5380_v11 = vld [vmem:[%s7401_s7] sm:$0xff]  }
 0x2cb   : > { %v2379_v30 = vadd.f32 %v4958_v60, %v2218_v37  ;;  %v2430_v50 = vmax.f32 %v2376_v62, 0.0 }
 0x2cd   : > { %v2431_v61 = vmax.f32 %v2379_v30, 0.0  ;;  %v4959_v42 = vpop.f32.mrb[52].mxu0 }
 0x2ce   : > { %v4960_v34 = vpop.f32.mrb[53].mxu0 }
 0x2cf   : > { %v4961_v14 = vadd.f32 %v4960_v34, %v4959_v42  ;;  %v4962_v39 = vpop.f32.mrb[54].mxu0  ;;  %v2450_v6 = vpack.c.bf16 %v2431_v61, %v2430_v50  ;;  %v7447_v50 = vld [vmem:[#allocation5_spill] sm:$0xff]  ;;  %v7448_v34 = vld [vmem:[#allocation3_spill] sm:$0xff] }
 0x2d0   : > { %v4963_v13 = vpop.f32.mrb[55].mxu0 }
 0x2d1   : > { %v2384_v3 = vadd.f32 %v4961_v14, %v2223_v45  ;;  %v4964_v35 = vadd.f32 %v4963_v13, %v4962_v39  ;;  %4985 = vmatprep.subr.bf16.mxu1 %v2450_v6 }
 0x2d2   : > { %4986 = vmatpush3.bf16.msra.mxu1 %v6931_v46 }
 0x2d3   : > { %v2387_v28 = vadd.f32 %v4964_v35, %v2226_v15  ;;  %v2432_v48 = vmax.f32 %v2384_v3, 0.0 }
 0x2d5   : > { %v2433_v44 = vmax.f32 %v2387_v28, 0.0  ;;  %v4965_v33 = vpop.f32.mrb[56].mxu0 }
 0x2d6   : > { %v4966_v21 = vpop.f32.mrb[57].mxu0 }
 0x2d7   : > { %v4967_v31 = vadd.f32 %v4966_v21, %v4965_v33  ;;  %v4968_v24 = vpop.f32.mrb[58].mxu0  ;;  %v2451_v57 = vpack.c.bf16 %v2433_v44, %v2432_v48  ;;  %v7449_v48 = vld [vmem:[#allocation6_spill] sm:$0xff]  ;;  %v7450_v21 = vld [vmem:[#allocation4_spill] sm:$0xff] }
 0x2d8   : > { %v4969_v36 = vpop.f32.mrb[59].mxu0 }
 0x2d9   : > { %v2392_v29 = vadd.f32 %v4967_v31, %v2231_v63  ;;  %v4970_v17 = vadd.f32 %v4969_v36, %v4968_v24  ;;  %4987 = vmatprep.subr.bf16.mxu1 %v2451_v57 }
 0x2da   : > { %4988 = vmatpush3.bf16.msra.mxu1 %v6941_v22 }
 0x2db   : > { %v2395_v46 = vadd.f32 %v4970_v17, %v2234_v2  ;;  %v2434_v40 = vmax.f32 %v2392_v29, 0.0 }
 0x2dd   : > { %v2435_v27 = vmax.f32 %v2395_v46, 0.0  ;;  %v4971_v53 = vpop.f32.mrb[60].mxu0 }
 0x2de   : > { %v4972_v10 = vpop.f32.mrb[61].mxu0 }
 0x2df   : > { %v4973_v47 = vadd.f32 %v4972_v10, %v4971_v53  ;;  %v4974_v55 = vpop.f32.mrb[62].mxu0  ;;  %v2452_v41 = vpack.c.bf16 %v2435_v27, %v2434_v40  ;;  %v7451_v40 = vld [vmem:[#allocation7_spill] sm:$0xff]  ;;  %v7452_v10 = vld [vmem:[#allocation8_spill] sm:$0xff] }
 0x2e0   : > { %v4975_v51 = vpop.f32.mrb[63].mxu0 }
 0x2e1   : > { %v2400_v16 = vadd.f32 %v4973_v47, %v2239_v4  ;;  %v4976_v59 = vadd.f32 %v4975_v51, %v4974_v55  ;;  %4989 = vmatprep.subr.bf16.mxu1 %v2452_v41 }
 0x2e2   : > { %4990 = vmatpush3.bf16.msra.mxu1 %v6951_v58  ;;  %v5361_v58 = vld [vmem:[%s7399_s5 + $0x10] ss:$8 sps:$4 sm:$0xff]  }
 0x2e3   : > { %v2403_v22 = vadd.f32 %v4976_v59, %v2242_v25  ;;  %v2436_v43 = vmax.f32 %v2400_v16, 0.0 }
 0x2e5   : > { %v2437_v32 = vmax.f32 %v2403_v22, 0.0  ;;  %v7453_v22 = vld [vmem:[#allocation13_spill] sm:$0xff] }
 0x2e7   : > { %v2453_v20 = vpack.c.bf16 %v2437_v32, %v2436_v43 }
 0x2e9   : > { %4991 = vmatprep.subr.bf16.mxu1 %v2453_v20  ;;  %v7454_v20 = vld [vmem:[#allocation14_spill] sm:$0xff] }
 0x2ea   : > { %4992 = vmatpush3.bf16.msra.mxu1 %v6961_v56  ;;  %v5364_v56 = vld [vmem:[%s7399_s5 + $0x20] ss:$8 sps:$4 sm:$0xff]  }
 0x2ed   : > { %2679 = vmatmul.mubr.bf16.vlgmr.msra.gmra.mrb[128].mxu1 %v5356_v5 }
 0x2ee   : > { %2686 = vmatprep.mubr.bf16.mxu1 %v5359_v9 }
 0x2f5   : > { %2687 = vmatmul.mubr.bf16.gmra.mrb[132].mxu1 %v5361_v58 }
 0x2f6   : > { %2694 = vmatprep.mubr.bf16.mxu1 %v5362_v18 }
 0x2fd   : > { %2695 = vmatmul.mubr.bf16.gmra.mrb[136].mxu1 %v5364_v56 }
 0x2fe   : > { %2702 = vmatprep.mubr.bf16.mxu1 %v5365_v38 }
 0x305   : > { %2703 = vmatmul.mubr.bf16.gmra.mrb[140].mxu1 %v5367_v52 }
 0x306   : > { %2710 = vmatprep.mubr.bf16.mxu1 %v5368_v26 }
 0x30d   : > { %2711 = vmatmul.mubr.bf16.gmra.mrb[144].mxu1 %v5370_v7 }
 0x30e   : > { %2718 = vmatprep.mubr.bf16.mxu1 %v5371_v0  ;;  %v7455_v0 = vld [vmem:[#allocation15_spill] sm:$0xff] }
 0x315   : > { %2719 = vmatmul.mubr.bf16.gmra.mrb[148].mxu1 %v5373_v49 }
 0x316   : > { %2726 = vmatprep.mubr.bf16.mxu1 %v5374_v23 }
 0x31d   : > { %2727 = vmatmul.mubr.bf16.gmra.mrb[152].mxu1 %v5376_v19  ;;  %v7456_v19 = vld [vmem:[#allocation16_spill] sm:$0xff] }
 0x31e   : > { %2734 = vmatprep.mubr.bf16.mxu1 %v5377_v54 }
 0x325   : > { %2735 = vmatmul.mubr.bf16.gmra.mrb[156].mxu1 %v5379_v1 }
 0x326   : > { %5161 = vmatprep.mubr.bf16.mxu1 %v5380_v11 }
 0x3c0   : > { %v4993_v12 = vpop.f32.mrb[128].mxu1 }
 0x3c1   : > { %v4994_v37 = vpop.f32.mrb[129].mxu1 }
 0x3c2   : > { %v4995_v62 = vadd.f32 %v4994_v37, %v4993_v12  ;;  %v4996_v60 = vpop.f32.mrb[130].mxu1 }
 0x3c3   : > { %v4997_v30 = vpop.f32.mrb[131].mxu1 }
 0x3c4   : > { %v2681_v61 = vadd.f32 %v4995_v62, %v7447_v50  ;;  %v4998_v42 = vadd.f32 %v4997_v30, %v4996_v60 }
 0x3c6   : > { %v2684_v45 = vadd.f32 %v4998_v42, %v7448_v34  ;;  %v2743_v14 = vmax.f32 %v2681_v61, 0.0  ;;  %v7457_v61 = vld [vmem:[#allocation17_spill] sm:$0xff] }
 0x3c8   : > { %v2744_v39 = vmax.f32 %v2684_v45, 0.0  ;;  %v4999_v6 = vpop.f32.mrb[132].mxu1  ;;  %v7458_v45 = vld [vmem:[#allocation18_spill] sm:$0xff] }
 0x3c9   : > { %v5000_v13 = vpop.f32.mrb[133].mxu1 }
 0x3ca   : > { %v5001_v15 = vadd.f32 %v5000_v13, %v4999_v6  ;;  %v5002_v3 = vpop.f32.mrb[134].mxu1  ;;  %v2759_v35 = vpack.c.bf16 %v2744_v39, %v2743_v14 }
 0x3cb   : > { %v5003_v28 = vpop.f32.mrb[135].mxu1 }
 0x3cc   : > { %v2689_v44 = vadd.f32 %v5001_v15, %v7449_v48  ;;  %v5004_v33 = vadd.f32 %v5003_v28, %v5002_v3  ;;  %5145 = vmatprep.subr.bf16.mxu1 %v2759_v35 }
 0x3cd   : > { %5146 = vmatpush3.bf16.msra.mxu1 %v2759_v35 }
 0x3ce   : > { %v2692_v63 = vadd.f32 %v5004_v33, %v7450_v21  ;;  %v2745_v31 = vmax.f32 %v2689_v44, 0.0  ;;  %v7459_v44 = vld [vmem:[#allocation19_spill] sm:$0xff] }
 0x3d0   : > { %v2746_v24 = vmax.f32 %v2692_v63, 0.0  ;;  %v5005_v57 = vpop.f32.mrb[136].mxu1  ;;  %v7460_v63 = vld [vmem:[#allocation20_spill] sm:$0xff] }
 0x3d1   : > { %v5006_v36 = vpop.f32.mrb[137].mxu1 }
 0x3d2   : > { %v5007_v2 = vadd.f32 %v5006_v36, %v5005_v57  ;;  %v5008_v29 = vpop.f32.mrb[138].mxu1  ;;  %v2760_v17 = vpack.c.bf16 %v2746_v24, %v2745_v31 }
 0x3d3   : > { %v5009_v46 = vpop.f32.mrb[139].mxu1 }
 0x3d4   : > { %v2697_v27 = vadd.f32 %v5007_v2, %v7451_v40  ;;  %v5010_v53 = vadd.f32 %v5009_v46, %v5008_v29  ;;  %5147 = vmatprep.subr.bf16.mxu1 %v2760_v17  ;;  %v2559_v40 = vpop.permute.xlu0 %2558 }
 0x3d5   : > { %5148 = vmatpush3.bf16.msra.mxu1 %v2760_v17 }
 0x3d6   : > { %v2700_v4 = vadd.f32 %v5010_v53, %v7452_v10  ;;  %v2747_v47 = vmax.f32 %v2697_v27, 0.0 }
 0x3d8   : > { %v2748_v55 = vmax.f32 %v2700_v4, 0.0  ;;  %v5011_v41 = vpop.f32.mrb[140].mxu1  ;;  %v2564_v4 = vpop.permute.xlu1 %2563 }
 0x3d9   : > { %v5012_v51 = vpop.f32.mrb[141].mxu1 }
 0x3da   : > { %v5013_v8 = vadd.f32 %v5012_v51, %v5011_v41  ;;  %v5014_v25 = vpop.f32.mrb[142].mxu1  ;;  %v2761_v16 = vpack.c.bf16 %v2748_v55, %v2747_v47 }
 0x3db   : > { %v5015_v59 = vpop.f32.mrb[143].mxu1 }
 0x3dc   : > { %v2705_v43 = vadd.f32 %v5013_v8, %v7453_v22  ;;  %v5016_v32 = vadd.f32 %v5015_v59, %v5014_v25  ;;  %5149 = vmatprep.subr.bf16.mxu1 %v2761_v16  ;;  %v5381_v8 = vld [vmem:[%s7401_s7 + $0x8] sm:$0xff]   ;;  %v5382_v25 = vld [vmem:[%s7401_s7 + $0x10] sm:$0xff]   ;;  %v5384_v59 = vld [vmem:[%s7401_s7 + $0x20] sm:$0xff]  }
 0x3dd   : > { %5150 = vmatpush3.bf16.msra.mxu1 %v2761_v16  ;;  %v5383_v16 = vld [vmem:[%s7401_s7 + $0x18] sm:$0xff]   ;;  %v5385_v22 = vld [vmem:[%s7401_s7 + $0x28] sm:$0xff]  }
 0x3de   : > { %v2708_v5 = vadd.f32 %v5016_v32, %v7454_v20  ;;  %v2749_v9 = vmax.f32 %v2705_v43, 0.0  ;;  %v5386_v43 = vld [vmem:[%s7401_s7 + $0x30] sm:$0xff]   ;;  %v5387_v32 = vld [vmem:[%s7401_s7 + $0x38] sm:$0xff]   ;;  %v5388_v20 = vld [vmem:[%s7401_s7 + $0x40] sm:$0xff]  }
 0x3e0   : > { %v2750_v58 = vmax.f32 %v2708_v5, 0.0  ;;  %v5017_v18 = vpop.f32.mrb[144].mxu1  ;;  %v5389_v5 = vld [vmem:[%s7401_s7 + $0x48] sm:$0xff]  }
 0x3e1   : > { %v5018_v56 = vpop.f32.mrb[145].mxu1 }
 0x3e2   : > { %v5019_v38 = vadd.f32 %v5018_v56, %v5017_v18  ;;  %v5020_v52 = vpop.f32.mrb[146].mxu1  ;;  %v2762_v26 = vpack.c.bf16 %v2750_v58, %v2749_v9  ;;  %v5390_v9 = vld [vmem:[%s7401_s7 + $0x50] sm:$0xff]   ;;  %v5391_v58 = vld [vmem:[%s7401_s7 + $0x58] sm:$0xff]   ;;  %v5392_v18 = vld [vmem:[%s7401_s7 + $0x60] sm:$0xff]  }
 0x3e3   : > { %v5021_v7 = vpop.f32.mrb[147].mxu1  ;;  %v5393_v56 = vld [vmem:[%s7401_s7 + $0x68] sm:$0xff]  }
 0x3e4   : > { %v2713_v49 = vadd.f32 %v5019_v38, %v7455_v0  ;;  %v5022_v23 = vadd.f32 %v5021_v7, %v5020_v52  ;;  %5151 = vmatprep.subr.bf16.mxu1 %v2762_v26  ;;  %v5394_v38 = vld [vmem:[%s7401_s7 + $0x70] sm:$0xff]   ;;  %v5395_v52 = vld [vmem:[%s7401_s7 + $0x78] sm:$0xff]   ;;  %v2834_v7 = vpop.permute.xlu0 %2833  ;;  %v2839_v0 = vpop.permute.xlu1 %2838 }
 0x3e5   : > { %5152 = vmatpush3.bf16.msra.mxu1 %v2762_v26  ;;  %v5398_v26 = vld [vmem:[%s7403_s9 + $0x4] ss:$8 sps:$4 sm:$0xff]  }
 0x3e6   : > { %v2716_v54 = vadd.f32 %v5022_v23, %v7456_v19  ;;  %v2751_v1 = vmax.f32 %v2713_v49, 0.0  ;;  %4096 = vmatprep.mubr.bf16.mxu0 %v5398_v26 }
 0x3e8   : > { %v2752_v11 = vmax.f32 %v2716_v54, 0.0  ;;  %v5023_v12 = vpop.f32.mrb[148].mxu1  ;;  %v2844_v49 = vpop.permute.xlu0 %2843 }
 0x3e9   : > { %v5024_v37 = vpop.f32.mrb[149].mxu1  ;;  %v2849_v23 = vpop.permute.xlu1 %2848 }
 0x3ea   : > { %v5025_v62 = vadd.f32 %v5024_v37, %v5023_v12  ;;  %v5026_v60 = vpop.f32.mrb[150].mxu1  ;;  %v2763_v30 = vpack.c.bf16 %v2752_v11, %v2751_v1 }
 0x3eb   : > { %v5027_v50 = vpop.f32.mrb[151].mxu1 }
 0x3ec   : > { %v2721_v42 = vadd.f32 %v5025_v62, %v7457_v61  ;;  %v5028_v34 = vadd.f32 %v5027_v50, %v5026_v60  ;;  %5153 = vmatprep.subr.bf16.mxu1 %v2763_v30  ;;  %v2854_v19 = vpop.permute.xlu0 %2853 }
 0x3ed   : > { %5154 = vmatpush3.bf16.msra.mxu1 %v2763_v30  ;;  %v2859_v54 = vpop.permute.xlu1 %2858 }
 0x3ee   : > { %v2724_v14 = vadd.f32 %v5028_v34, %v7458_v45  ;;  %v2753_v39 = vmax.f32 %v2721_v42, 0.0 }
 0x3f0   : > { %v2754_v6 = vmax.f32 %v2724_v14, 0.0  ;;  %v5029_v13 = vpop.f32.mrb[152].mxu1  ;;  %v2864_v1 = vpop.permute.xlu0 %2863 }
 0x3f1   : > { %v5030_v15 = vpop.f32.mrb[153].mxu1  ;;  %v2869_v11 = vpop.permute.xlu1 %2868 }
 0x3f2   : > { %v5031_v3 = vadd.f32 %v5030_v15, %v5029_v13  ;;  %v5032_v35 = vpop.f32.mrb[154].mxu1  ;;  %v2764_v28 = vpack.c.bf16 %v2754_v6, %v2753_v39 }
 0x3f3   : > { %v5033_v48 = vpop.f32.mrb[155].mxu1 }
 0x3f4   : > { %v2729_v33 = vadd.f32 %v5031_v3, %v7459_v44  ;;  %v5034_v21 = vadd.f32 %v5033_v48, %v5032_v35  ;;  %5155 = vmatprep.subr.bf16.mxu1 %v2764_v28  ;;  %v2874_v12 = vpop.permute.xlu0 %2873 }
 0x3f5   : > { %5156 = vmatpush3.bf16.msra.mxu1 %v2764_v28  ;;  %v2879_v37 = vpop.permute.xlu1 %2878 }
 0x3f6   : > { %v2732_v31 = vadd.f32 %v5034_v21, %v7460_v63  ;;  %v2755_v24 = vmax.f32 %v2729_v33, 0.0 }
 0x3f8   : > { %v2756_v57 = vmax.f32 %v2732_v31, 0.0  ;;  %v5035_v36 = vpop.f32.mrb[156].mxu1  ;;  %v2884_v62 = vpop.permute.xlu0 %2883 }
 0x3f9   : > { %v5036_v2 = vpop.f32.mrb[157].mxu1  ;;  %v2889_v60 = vpop.permute.xlu1 %2888 }
 0x3fa   : > { %v5037_v29 = vadd.f32 %v5036_v2, %v5035_v36  ;;  %v5038_v17 = vpop.f32.mrb[158].mxu1  ;;  %v2765_v46 = vpack.c.bf16 %v2756_v57, %v2755_v24 }
 0x3fb   : > { %v5039_v27 = vpop.f32.mrb[159].mxu1 }
 0x3fc   : > { %v2737_v53 = vadd.f32 %v5037_v29, %v2559_v40  ;;  %v5040_v10 = vadd.f32 %v5039_v27, %v5038_v17  ;;  %5157 = vmatprep.subr.bf16.mxu1 %v2765_v46  ;;  %v2894_v42 = vpop.permute.xlu0 %2893  ;;  %v7461_v17 = vmov 0  }
 0x3fd   : > { %5158 = vmatpush3.bf16.msra.mxu1 %v2765_v46  ;;  %v2899_v6 = vpop.permute.xlu1 %2898 }
 0x3fe   : > { %v2740_v47 = vadd.f32 %v5040_v10, %v2564_v4  ;;  %v2757_v55 = vmax.f32 %v2737_v53, 0.0 }
 0x400   : > { %v2758_v41 = vmax.f32 %v2740_v47, 0.0  ;;  %v2904_v44 = vpop.permute.xlu0 %2903 }
 0x401   : > { %v2909_v24 = vpop.permute.xlu1 %2908 }
 0x402   : > { %v2766_v51 = vpack.c.bf16 %v2758_v41, %v2757_v55 }
 0x404   : > { %5159 = vmatprep.subr.bf16.mxu1 %v2766_v51  ;;  %v2914_v53 = vpop.permute.xlu0 %2913 }
 0x405   : > { %5160 = vmatpush3.bf16.msra.mxu1 %v2766_v51  ;;  %v2919_v55 = vpop.permute.xlu1 %2918 }
 0x408   : > { %5162 = vmatmul.mubr.bf16.vlgmr.msra.gmra.mrb[160].mxu1 %v5381_v8 }
 0x409   : > { %5165 = vmatprep.mubr.bf16.mxu1 %v5382_v25 }
 0x410   : > { %5166 = vmatmul.mubr.bf16.gmra.mrb[164].mxu1 %v5383_v16 }
 0x411   : > { %5169 = vmatprep.mubr.bf16.mxu1 %v5384_v59 }
 0x418   : > { %5170 = vmatmul.mubr.bf16.gmra.mrb[168].mxu1 %v5385_v22 }
 0x419   : > { %5173 = vmatprep.mubr.bf16.mxu1 %v5386_v43 }
 0x420   : > { %5174 = vmatmul.mubr.bf16.gmra.mrb[172].mxu1 %v5387_v32  ;;  %v2924_v32 = vpop.permute.xlu0 %2923 }
 0x421   : > { %5177 = vmatprep.mubr.bf16.mxu1 %v5388_v20 }
 0x428   : > { %5178 = vmatmul.mubr.bf16.gmra.mrb[176].mxu1 %v5389_v5 }
 0x429   : > { %5181 = vmatprep.mubr.bf16.mxu1 %v5390_v9 }
 0x430   : > { %5182 = vmatmul.mubr.bf16.gmra.mrb[180].mxu1 %v5391_v58  ;;  %v2929_v58 = vpop.permute.xlu1 %2928 }
 0x431   : > { %5185 = vmatprep.mubr.bf16.mxu1 %v5392_v18 }
 0x438   : > { %5186 = vmatmul.mubr.bf16.gmra.mrb[184].mxu1 %v5393_v56 }
 0x439   : > { %5189 = vmatprep.mubr.bf16.mxu1 %v5394_v38 }
 0x440   : > { %5190 = vmatmul.mubr.bf16.gmra.mrb[188].mxu1 %v5395_v52 }
 0x4db   : > { %v5163_v30 = vpop.f32.mrb[160].mxu1 }
 0x4dc   : > { %v3130_v50 = vadd.f32 %v5163_v30, %v2844_v49  ;;  %v3121_v61 = vpop.f32.mrb[161].mxu1  ;;  %v2934_v49 = vpop.permute.xlu0 %2933 }
 0x4dd   : > { %v3122_v34 = vadd.f32 %v3121_v61, %v2834_v7  ;;  %v5164_v45 = vpop.f32.mrb[162].mxu1 }
 0x4de   : > { %v3133_v14 = vadd.f32 %v5164_v45, %v2849_v23  ;;  %v3124_v39 = vpop.f32.mrb[163].mxu1  ;;  %v3250_v15 = vmax.f32 %v3130_v50, 0.0 }
 0x4df   : > { %v3125_v13 = vadd.f32 %v3124_v39, %v2839_v0  ;;  %v3248_v35 = vmax.f32 %v3122_v34, 0.0 }
 0x4e0   : > { %v3251_v3 = vmax.f32 %v3133_v14, 0.0  ;;  %v2944_v61 = vpop.permute.xlu0 %2943 }
 0x4e1   : > { %v3249_v28 = vmax.f32 %v3125_v13, 0.0 }
 0x4e2   : > { %v3281_v48 = vpack.c.bf16 %v3251_v3, %v3250_v15 }
 0x4e3   : > { %v3280_v33 = vpack.c.bf16 %v3249_v28, %v3248_v35  ;;  %v5167_v21 = vpop.f32.mrb[164].mxu1 }
 0x4e4   : > { %v3146_v63 = vadd.f32 %v5167_v21, %v2864_v1  ;;  %v3137_v31 = vpop.f32.mrb[165].mxu1 }
 0x4e5   : > { %v3138_v57 = vadd.f32 %v3137_v31, %v2854_v19  ;;  %v5168_v36 = vpop.f32.mrb[166].mxu1  ;;  %4065 = vmatpush1.bf16.msra.mxu0 %v3280_v33 }
 0x4e6   : > { %v3149_v2 = vadd.f32 %v5168_v36, %v2869_v11  ;;  %v3140_v29 = vpop.f32.mrb[167].mxu1  ;;  %4066 = vmatprep.subr.bf16.mxu0 %v7461_v17  ;;  %v3254_v40 = vmax.f32 %v3146_v63, 0.0  ;;  %v2939_v11 = vpop.permute.xlu1 %2938 }
 0x4e7   : > { %v3141_v46 = vadd.f32 %v3140_v29, %v2859_v54  ;;  %v3252_v10 = vmax.f32 %v3138_v57, 0.0 }
 0x4e8   : > { %v3255_v27 = vmax.f32 %v3149_v2, 0.0 }
 0x4e9   : > { %v3253_v4 = vmax.f32 %v3141_v46, 0.0  ;;  %4067 = vmatpush1.bf16.msra.mxu0 %v3281_v48 }
 0x4ea   : > { %v3283_v47 = vpack.c.bf16 %v3255_v27, %v3254_v40  ;;  %4068 = vmatprep.subr.bf16.mxu0 %v7461_v17  ;;  %v2949_v39 = vpop.permute.xlu1 %2948 }
 0x4eb   : > { %v3282_v41 = vpack.c.bf16 %v3253_v4, %v3252_v10  ;;  %v5171_v51 = vpop.f32.mrb[168].mxu1 }
 0x4ec   : > { %v3162_v8 = vadd.f32 %v5171_v51, %v2884_v62  ;;  %v3153_v25 = vpop.f32.mrb[169].mxu1 }
 0x4ed   : > { %v3154_v16 = vadd.f32 %v3153_v25, %v2874_v12  ;;  %v5172_v59 = vpop.f32.mrb[170].mxu1  ;;  %4069 = vmatpush1.bf16.msra.mxu0 %v3282_v41 }
 0x4ee   : > { %v3165_v22 = vadd.f32 %v5172_v59, %v2889_v60  ;;  %v3156_v43 = vpop.f32.mrb[171].mxu1  ;;  %4070 = vmatprep.subr.bf16.mxu0 %v7461_v17  ;;  %v3258_v5 = vmax.f32 %v3162_v8, 0.0  ;;  %v2959_v31 = vpop.permute.xlu1 %2958 }
 0x4ef   : > { %v3157_v20 = vadd.f32 %v3156_v43, %v2879_v37  ;;  %v3256_v18 = vmax.f32 %v3154_v16, 0.0 }
 0x4f0   : > { %v3259_v9 = vmax.f32 %v3165_v22, 0.0 }
 0x4f1   : > { %v3257_v56 = vmax.f32 %v3157_v20, 0.0  ;;  %4071 = vmatpush1.bf16.msra.mxu0 %v3283_v47 }
 0x4f2   : > { %v3285_v38 = vpack.c.bf16 %v3259_v9, %v3258_v5  ;;  %4072 = vmatprep.subr.bf16.mxu0 %v7461_v17 }
 0x4f3   : > { %v3284_v52 = vpack.c.bf16 %v3257_v56, %v3256_v18  ;;  %v5175_v26 = vpop.f32.mrb[172].mxu1 }
 0x4f4   : > { %v3178_v7 = vadd.f32 %v5175_v26, %v2904_v44  ;;  %v3169_v0 = vpop.f32.mrb[173].mxu1  ;;  %v2954_v44 = vpop.permute.xlu0 %2953 }
 0x4f5   : > { %v3170_v23 = vadd.f32 %v3169_v0, %v2894_v42  ;;  %v5176_v19 = vpop.f32.mrb[174].mxu1  ;;  %4073 = vmatpush1.bf16.msra.mxu0 %v3284_v52 }
 0x4f6   : > { %v3181_v54 = vadd.f32 %v5176_v19, %v2909_v24  ;;  %v3172_v1 = vpop.f32.mrb[175].mxu1  ;;  %4074 = vmatprep.subr.bf16.mxu0 %v7461_v17  ;;  %v3262_v37 = vmax.f32 %v3178_v7, 0.0 }
 0x4f7   : > { %v3173_v12 = vadd.f32 %v3172_v1, %v2899_v6  ;;  %v3260_v60 = vmax.f32 %v3170_v23, 0.0 }
 0x4f8   : > { %v3263_v62 = vmax.f32 %v3181_v54, 0.0 }
 0x4f9   : > { %v3261_v30 = vmax.f32 %v3173_v12, 0.0  ;;  %4075 = vmatpush1.bf16.msra.mxu0 %v3285_v38 }
 0x4fa   : > { %v3287_v50 = vpack.c.bf16 %v3263_v62, %v3262_v37  ;;  %4076 = vmatprep.subr.bf16.mxu0 %v7461_v17 }
 0x4fb   : > { %v3286_v34 = vpack.c.bf16 %v3261_v30, %v3260_v60  ;;  %v5179_v45 = vpop.f32.mrb[176].mxu1 }
 0x4fc   : > { %v3194_v42 = vadd.f32 %v5179_v45, %v2924_v32  ;;  %v3185_v14 = vpop.f32.mrb[177].mxu1 }
 0x4fd   : > { %v3186_v13 = vadd.f32 %v3185_v14, %v2914_v53  ;;  %v5180_v15 = vpop.f32.mrb[178].mxu1  ;;  %4077 = vmatpush1.bf16.msra.mxu0 %v3286_v34  ;;  %v2964_v53 = vpop.permute.xlu0 %2963  ;;  %v5396_v14 = vld [vmem:[%s7403_s9] ss:$8 sps:$4 sm:$0xff]  }
 0x4fe   : > { %v3197_v3 = vadd.f32 %v5180_v15, %v2929_v58  ;;  %v3188_v35 = vpop.f32.mrb[179].mxu1  ;;  %4078 = vmatprep.subr.bf16.mxu0 %v7461_v17  ;;  %v3266_v28 = vmax.f32 %v3194_v42, 0.0  ;;  %v5402_v15 = vld [vmem:[%s7403_s9 + $0x24] ss:$8 sps:$4 sm:$0xff]  }
 0x4ff   : > { %v3189_v6 = vadd.f32 %v3188_v35, %v2919_v55  ;;  %v3264_v33 = vmax.f32 %v3186_v13, 0.0  ;;  %v2969_v55 = vpop.permute.xlu1 %2968  ;;  %v5401_v13 = vld [vmem:[%s7403_s9 + $0x10] ss:$8 sps:$4 sm:$0xff]  }
 0x500   : > { %v3267_v48 = vmax.f32 %v3197_v3, 0.0  ;;  %v5405_v3 = vld [vmem:[%s7403_s9 + $0x34] ss:$8 sps:$4 sm:$0xff]   ;;  %v5407_v35 = vld [vmem:[%s7403_s9 + $0x30] ss:$8 sps:$4 sm:$0xff]  }
 0x501   : > { %v3265_v21 = vmax.f32 %v3189_v6, 0.0  ;;  %4079 = vmatpush1.bf16.msra.mxu0 %v3287_v50  ;;  %v2974_v43 = vpop.permute.xlu0 %2973  ;;  %v5408_v6 = vld [vmem:[%s7403_s9 + $0x44] ss:$8 sps:$4 sm:$0xff]  }
 0x502   : > { %v3289_v63 = vpack.c.bf16 %v3267_v48, %v3266_v28  ;;  %4080 = vmatprep.subr.bf16.mxu0 %v7461_v17  ;;  %v5410_v28 = vld [vmem:[%s7403_s9 + $0x40] ss:$8 sps:$4 sm:$0xff]   ;;  %v5411_v48 = vld [vmem:[%s7403_s9 + $0x54] ss:$8 sps:$4 sm:$0xff]  }
 0x503   : > { %v3288_v24 = vpack.c.bf16 %v3265_v21, %v3264_v33  ;;  %v5183_v57 = vpop.f32.mrb[180].mxu1  ;;  %v2979_v58 = vpop.permute.xlu1 %2978  ;;  %v5414_v33 = vld [vmem:[%s7403_s9 + $0x64] ss:$8 sps:$4 sm:$0xff]   ;;  %v5416_v21 = vld [vmem:[%s7403_s9 + $0x60] ss:$8 sps:$4 sm:$0xff]  }
 0x504   : > { %v3210_v36 = vadd.f32 %v5183_v57, %v2944_v61  ;;  %v3201_v2 = vpop.f32.mrb[181].mxu1  ;;  %v5422_v57 = vld [vmem:[%s7403_s9 + $0x80] ss:$8 sps:$4 sm:$0xff]  }
 0x505   : > { %v3202_v29 = vadd.f32 %v3201_v2, %v2934_v49  ;;  %v5184_v46 = vpop.f32.mrb[182].mxu1  ;;  %4081 = vmatpush1.bf16.msra.mxu0 %v3288_v24  ;;  %v2984_v0 = vpop.permute.xlu0 %2983  ;;  %v5420_v24 = vld [vmem:[%s7403_s9 + $0x84] ss:$8 sps:$4 sm:$0xff]   ;;  %v5425_v2 = vld [vmem:[%s7403_s9 + $0x90] ss:$8 sps:$4 sm:$0xff]  }
 0x506   : > { %v3213_v40 = vadd.f32 %v5184_v46, %v2949_v39  ;;  %v3204_v27 = vpop.f32.mrb[183].mxu1  ;;  %4082 = vmatprep.subr.bf16.mxu0 %v7461_v17  ;;  %v3270_v4 = vmax.f32 %v3210_v36, 0.0  ;;  %v5399_v39 = vld [vmem:[%s7403_s9 + $0x14] ss:$8 sps:$4 sm:$0xff]   ;;  %v5428_v46 = vld [vmem:[%s7403_s9 + $0xa0] ss:$8 sps:$4 sm:$0xff]  }
 0x507   : > { %v3205_v10 = vadd.f32 %v3204_v27, %v2939_v11  ;;  %v3268_v41 = vmax.f32 %v3202_v29, 0.0  ;;  %v2989_v1 = vpop.permute.xlu1 %2988  ;;  %v5423_v36 = vld [vmem:[%s7403_s9 + $0x94] ss:$8 sps:$4 sm:$0xff]   ;;  %v5426_v29 = vld [vmem:[%s7403_s9 + $0xa4] ss:$8 sps:$4 sm:$0xff]  }
 0x508   : > { %v3271_v47 = vmax.f32 %v3213_v40, 0.0  ;;  %v5429_v40 = vld [vmem:[%s7403_s9 + $0xb4] ss:$8 sps:$4 sm:$0xff]   ;;  %v5431_v27 = vld [vmem:[%s7403_s9 + $0xb0] ss:$8 sps:$4 sm:$0xff]  }
 0x509   : > { %v3269_v51 = vmax.f32 %v3205_v10, 0.0  ;;  %4083 = vmatpush1.bf16.msra.mxu0 %v3289_v63  ;;  %v5417_v63 = vld [vmem:[%s7403_s9 + $0x74] ss:$8 sps:$4 sm:$0xff]   ;;  %v5434_v10 = vld [vmem:[%s7403_s9 + $0xc0] ss:$8 sps:$4 sm:$0xff]  }
 0x50a   : > { %v3291_v8 = vpack.c.bf16 %v3271_v47, %v3270_v4  ;;  %4084 = vmatprep.subr.bf16.mxu0 %v7461_v17  ;;  %v5435_v4 = vld [vmem:[%s7403_s9 + $0xd4] ss:$8 sps:$4 sm:$0xff]   ;;  %v5437_v47 = vld [vmem:[%s7403_s9 + $0xd0] ss:$8 sps:$4 sm:$0xff]  }
 0x50b   : > { %v3290_v25 = vpack.c.bf16 %v3269_v51, %v3268_v41  ;;  %v5187_v16 = vpop.f32.mrb[184].mxu1  ;;  %v5440_v41 = vld [vmem:[%s7403_s9 + $0xe0] ss:$8 sps:$4 sm:$0xff]   ;;  %v5441_v51 = vld [vmem:[%s7403_s9 + $0xf4] ss:$8 sps:$4 sm:$0xff]  }
 0x50c   : > { %v3226_v59 = vadd.f32 %v5187_v16, %v2964_v53  ;;  %v3217_v22 = vpop.f32.mrb[185].mxu1  ;;  %v5432_v53 = vld [vmem:[%s7403_s9 + $0xc4] ss:$8 sps:$4 sm:$0xff]   ;;  %v5446_v16 = vld [vmem:[%s7403_s9 + $0x100] ss:$8 sps:$4 sm:$0xff]  }
 0x50d   : > { %v3218_v32 = vadd.f32 %v3217_v22, %v2954_v44  ;;  %v5188_v20 = vpop.f32.mrb[186].mxu1  ;;  %4085 = vmatpush1.bf16.msra.mxu0 %v3290_v25  ;;  %v5413_v44 = vld [vmem:[%s7403_s9 + $0x50] ss:$8 sps:$4 sm:$0xff]   ;;  %v5444_v25 = vld [vmem:[%s7403_s9 + $0x104] ss:$8 sps:$4 sm:$0xff]  }
 0x50e   : > { %v3229_v5 = vadd.f32 %v5188_v20, %v2969_v55  ;;  %v3220_v9 = vpop.f32.mrb[187].mxu1  ;;  %4086 = vmatprep.subr.bf16.mxu0 %v7461_v17  ;;  %v3274_v56 = vmax.f32 %v3226_v59, 0.0  ;;  %v5438_v55 = vld [vmem:[%s7403_s9 + $0xe4] ss:$8 sps:$4 sm:$0xff]   ;;  %v5447_v59 = vld [vmem:[%s7403_s9 + $0x114] ss:$8 sps:$4 sm:$0xff]  }
 0x50f   : > { %v3221_v18 = vadd.f32 %v3220_v9, %v2959_v31  ;;  %v3272_v52 = vmax.f32 %v3218_v32, 0.0  ;;  %v5419_v31 = vld [vmem:[%s7403_s9 + $0x70] ss:$8 sps:$4 sm:$0xff]   ;;  %v5452_v32 = vld [vmem:[%s7403_s9 + $0x120] ss:$8 sps:$4 sm:$0xff]  }
 0x510   : > { %v3275_v38 = vmax.f32 %v3229_v5, 0.0  ;;  %v5449_v22 = vld [vmem:[%s7403_s9 + $0x110] ss:$8 sps:$4 sm:$0xff]   ;;  %v5453_v20 = vld [vmem:[%s7403_s9 + $0x134] ss:$8 sps:$4 sm:$0xff]  }
 0x511   : > { %v3273_v26 = vmax.f32 %v3221_v18, 0.0  ;;  %4087 = vmatpush1.bf16.msra.mxu0 %v3291_v8  ;;  %v5443_v8 = vld [vmem:[%s7403_s9 + $0xf0] ss:$8 sps:$4 sm:$0xff]   ;;  %v5456_v9 = vld [vmem:[%s7403_s9 + $0x144] ss:$8 sps:$4 sm:$0xff]  }
 0x512   : > { %v3293_v7 = vpack.c.bf16 %v3275_v38, %v3274_v56  ;;  %4088 = vmatprep.subr.bf16.mxu0 %v7461_v17  ;;  %v5455_v5 = vld [vmem:[%s7403_s9 + $0x130] ss:$8 sps:$4 sm:$0xff]   ;;  %v5459_v18 = vld [vmem:[%s7403_s9 + $0x154] ss:$8 sps:$4 sm:$0xff]   ;;  %v5462_v38 = vld [vmem:[%s7403_s9 + $0x164] ss:$8 sps:$4 sm:$0xff]  }
 0x513   : > { %v3292_v49 = vpack.c.bf16 %v3273_v26, %v3272_v52  ;;  %v5191_v23 = vpop.f32.mrb[188].mxu1  ;;  %v5461_v56 = vld [vmem:[%s7403_s9 + $0x150] ss:$8 sps:$4 sm:$0xff]   ;;  %v5464_v52 = vld [vmem:[%s7403_s9 + $0x160] ss:$8 sps:$4 sm:$0xff]  }
 0x514   : > { %v3242_v19 = vadd.f32 %v5191_v23, %v2984_v0  ;;  %v3233_v54 = vpop.f32.mrb[189].mxu1  ;;  %v5465_v26 = vld [vmem:[%s7403_s9 + $0x174] ss:$8 sps:$4 sm:$0xff]   ;;  %v5468_v0 = vld [vmem:[%s7403_s9 + $0x184] ss:$8 sps:$4 sm:$0xff]  }
 0x515   : > { %v3234_v11 = vadd.f32 %v3233_v54, %v2974_v43  ;;  %v5192_v12 = vpop.f32.mrb[190].mxu1  ;;  %4089 = vmatpush1.bf16.msra.mxu0 %v3292_v49  ;;  %v5450_v43 = vld [vmem:[%s7403_s9 + $0x124] ss:$8 sps:$4 sm:$0xff]   ;;  %v5470_v49 = vld [vmem:[%s7403_s9 + $0x180] ss:$8 sps:$4 sm:$0xff]  }
 0x516   : > { %v3245_v37 = vadd.f32 %v5192_v12, %v2989_v1  ;;  %v3236_v62 = vpop.f32.mrb[191].mxu1  ;;  %4090 = vmatprep.subr.bf16.mxu0 %v7461_v17  ;;  %v3278_v30 = vmax.f32 %v3242_v19, 0.0  ;;  %v5471_v23 = vld [vmem:[%s7403_s9 + $0x194] ss:$8 sps:$4 sm:$0xff]   ;;  %v5473_v19 = vld [vmem:[%s7403_s9 + $0x190] ss:$8 sps:$4 sm:$0xff]   ;;  %v3427_v12 = vpop.permute.xlu0 %3426 }
 0x517   : > { %v3237_v60 = vadd.f32 %v3236_v62, %v2979_v58  ;;  %v3276_v61 = vmax.f32 %v3234_v11, 0.0  ;;  %v5458_v58 = vld [vmem:[%s7403_s9 + $0x140] ss:$8 sps:$4 sm:$0xff]   ;;  %v5474_v54 = vld [vmem:[%s7403_s9 + $0x1a4] ss:$8 sps:$4 sm:$0xff]  }
 0x518   : > { %v3279_v50 = vmax.f32 %v3245_v37, 0.0  ;;  %v5476_v1 = vld [vmem:[%s7403_s9 + $0x1a0] ss:$8 sps:$4 sm:$0xff]   ;;  %v5477_v11 = vld [vmem:[%s7403_s9 + $0x1b4] ss:$8 sps:$4 sm:$0xff]  }
 0x519   : > { %v3277_v34 = vmax.f32 %v3237_v60, 0.0  ;;  %4091 = vmatpush1.bf16.msra.mxu0 %v3293_v7  ;;  %v5467_v7 = vld [vmem:[%s7403_s9 + $0x170] ss:$8 sps:$4 sm:$0xff]  }
 0x51a   : > { %v3295_v45 = vpack.c.bf16 %v3279_v50, %v3278_v30  ;;  %4092 = vmatprep.subr.bf16.mxu0 %v7461_v17  ;;  %v5479_v30 = vld [vmem:[%s7403_s9 + $0x1b0] ss:$8 sps:$4 sm:$0xff]   ;;  %v3432_v50 = vpop.permute.xlu1 %3431 }
 0x51b   : > { %v3294_v42 = vpack.c.bf16 %v3277_v34, %v3276_v61  ;;  %v5480_v34 = vld [vmem:[%s7403_s9 + $0x1c4] ss:$8 sps:$4 sm:$0xff]  }
 0x51d   : > { %4093 = vmatpush1.bf16.msra.mxu0 %v3294_v42 }
 0x51e   : > { %4094 = vmatprep.subr.bf16.mxu0 %v7461_v17  ;;  %v5404_v17 = vld [vmem:[%s7403_s9 + $0x20] ss:$8 sps:$4 sm:$0xff]  }
 0x521   : > { %4095 = vmatpush1.bf16.msra.mxu0 %v3295_v45 }
 0x524   : > { %4097 = vmatmul.mubr.bf16.vlgmr.msra.gmra.mrb[64].mxu0 %v5396_v14  ;;  %v3437_v14 = vpop.permute.xlu0 %3436 }
 0x525   : > { %4104 = vmatprep.mubr.bf16.mxu0 %v5399_v39 }
 0x52c   : > { %4105 = vmatmul.mubr.bf16.gmra.mrb[68].mxu0 %v5401_v13 }
 0x52d   : > { %4112 = vmatprep.mubr.bf16.mxu0 %v5402_v15 }
 0x534   : > { %4113 = vmatmul.mubr.bf16.gmra.mrb[72].mxu0 %v5404_v17  ;;  %v5482_v17 = vld [vmem:[%s7403_s9 + $0x1c0] ss:$8 sps:$4 sm:$0xff]  }
 0x535   : > { %4120 = vmatprep.mubr.bf16.mxu0 %v5405_v3  ;;  %v3442_v3 = vpop.permute.xlu1 %3441 }
 0x53c   : > { %4121 = vmatmul.mubr.bf16.gmra.mrb[76].mxu0 %v5407_v35 }
 0x53d   : > { %4128 = vmatprep.mubr.bf16.mxu0 %v5408_v6  ;;  %v5483_v6 = vld [vmem:[%s7403_s9 + $0x1d4] ss:$8 sps:$4 sm:$0xff]  }
 0x544   : > { %4129 = vmatmul.mubr.bf16.gmra.mrb[80].mxu0 %v5410_v28 }
 0x545   : > { %4136 = vmatprep.mubr.bf16.mxu0 %v5411_v48 }
 0x54c   : > { %4137 = vmatmul.mubr.bf16.gmra.mrb[84].mxu0 %v5413_v44  ;;  %v3447_v44 = vpop.permute.xlu0 %3446 }
 0x54d   : > { %4144 = vmatprep.mubr.bf16.mxu0 %v5414_v33 }
 0x554   : > { %4145 = vmatmul.mubr.bf16.gmra.mrb[88].mxu0 %v5416_v21 }
 0x555   : > { %4152 = vmatprep.mubr.bf16.mxu0 %v5417_v63 }
 0x55c   : > { %4153 = vmatmul.mubr.bf16.gmra.mrb[92].mxu0 %v5419_v31  ;;  %v5485_v31 = vld [vmem:[%s7403_s9 + $0x1d0] ss:$8 sps:$4 sm:$0xff]  }
 0x55d   : > { %4160 = vmatprep.mubr.bf16.mxu0 %v5420_v24  ;;  %v3452_v24 = vpop.permute.xlu1 %3451 }
 0x564   : > { %4161 = vmatmul.mubr.bf16.gmra.mrb[96].mxu0 %v5422_v57 }
 0x565   : > { %4168 = vmatprep.mubr.bf16.mxu0 %v5423_v36  ;;  %v5486_v36 = vld [vmem:[%s7403_s9 + $0x1e4] ss:$8 sps:$4 sm:$0xff]  }
 0x56c   : > { %4169 = vmatmul.mubr.bf16.gmra.mrb[100].mxu0 %v5425_v2 }
 0x56d   : > { %4176 = vmatprep.mubr.bf16.mxu0 %v5426_v29 }
 0x574   : > { %4177 = vmatmul.mubr.bf16.gmra.mrb[104].mxu0 %v5428_v46  ;;  %v3457_v46 = vpop.permute.xlu0 %3456 }
 0x575   : > { %4184 = vmatprep.mubr.bf16.mxu0 %v5429_v40 }
 0x57c   : > { %4185 = vmatmul.mubr.bf16.gmra.mrb[108].mxu0 %v5431_v27 }
 0x57d   : > { %4192 = vmatprep.mubr.bf16.mxu0 %v5432_v53 }
 0x584   : > { %4193 = vmatmul.mubr.bf16.gmra.mrb[112].mxu0 %v5434_v10  ;;  %v5488_v10 = vld [vmem:[%s7403_s9 + $0x1e0] ss:$8 sps:$4 sm:$0xff]  }
 0x585   : > { %4200 = vmatprep.mubr.bf16.mxu0 %v5435_v4  ;;  %v3462_v4 = vpop.permute.xlu1 %3461 }
 0x58c   : > { %4201 = vmatmul.mubr.bf16.gmra.mrb[116].mxu0 %v5437_v47 }
 0x58d   : > { %4208 = vmatprep.mubr.bf16.mxu0 %v5438_v55  ;;  %v5489_v55 = vld [vmem:[%s7403_s9 + $0x1f4] ss:$8 sps:$4 sm:$0xff]  }
 0x594   : > { %4209 = vmatmul.mubr.bf16.gmra.mrb[120].mxu0 %v5440_v41 }
 0x595   : > { %4216 = vmatprep.mubr.bf16.mxu0 %v5441_v51 }
 0x59c   : > { %4217 = vmatmul.mubr.bf16.gmra.mrb[124].mxu0 %v5443_v8  ;;  %v3467_v8 = vpop.permute.xlu0 %3466 }
 0x59d   : > { %4224 = vmatprep.mubr.bf16.mxu0 %v5444_v25 }
 0x5a4   : > { %4225 = vmatmul.mubr.bf16.gmra.mrb[128].mxu0 %v5446_v16 }
 0x5a5   : > { %4232 = vmatprep.mubr.bf16.mxu0 %v5447_v59 }
 0x5ac   : > { %4233 = vmatmul.mubr.bf16.gmra.mrb[132].mxu0 %v5449_v22  ;;  %v5491_v22 = vld [vmem:[%s7403_s9 + $0x1f0] ss:$8 sps:$4 sm:$0xff]  }
 0x5ad   : > { %4240 = vmatprep.mubr.bf16.mxu0 %v5450_v43  ;;  %v3472_v43 = vpop.permute.xlu1 %3471 }
 0x5b4   : > { %4241 = vmatmul.mubr.bf16.gmra.mrb[136].mxu0 %v5452_v32 }
 0x5b5   : > { %4248 = vmatprep.mubr.bf16.mxu0 %v5453_v20 }
 0x5bc   : > { %4249 = vmatmul.mubr.bf16.gmra.mrb[140].mxu0 %v5455_v5 }
 0x5bd   : > { %4256 = vmatprep.mubr.bf16.mxu0 %v5456_v9  ;;  %v3477_v9 = vpop.permute.xlu0 %3476 }
 0x5c4   : > { %4257 = vmatmul.mubr.bf16.gmra.mrb[144].mxu0 %v5458_v58 }
 0x5c5   : > { %4264 = vmatprep.mubr.bf16.mxu0 %v5459_v18 }
 0x5cc   : > { %4265 = vmatmul.mubr.bf16.gmra.mrb[148].mxu0 %v5461_v56 }
 0x5cd   : > { %4272 = vmatprep.mubr.bf16.mxu0 %v5462_v38  ;;  %v3482_v38 = vpop.permute.xlu1 %3481 }
 0x5d4   : > { %4273 = vmatmul.mubr.bf16.gmra.mrb[152].mxu0 %v5464_v52 }
 0x5d5   : > { %4280 = vmatprep.mubr.bf16.mxu0 %v5465_v26 }
 0x5dc   : > { %4281 = vmatmul.mubr.bf16.gmra.mrb[156].mxu0 %v5467_v7 }
 0x5dd   : > { %4288 = vmatprep.mubr.bf16.mxu0 %v5468_v0  ;;  %v3487_v0 = vpop.permute.xlu0 %3486 }
 0x5e4   : > { %4289 = vmatmul.mubr.bf16.gmra.mrb[160].mxu0 %v5470_v49 }
 0x5e5   : > { %4296 = vmatprep.mubr.bf16.mxu0 %v5471_v23 }
 0x5ec   : > { %4297 = vmatmul.mubr.bf16.gmra.mrb[164].mxu0 %v5473_v19 }
 0x5ed   : > { %4304 = vmatprep.mubr.bf16.mxu0 %v5474_v54  ;;  %v3492_v54 = vpop.permute.xlu1 %3491 }
 0x5f4   : > { %4305 = vmatmul.mubr.bf16.gmra.mrb[168].mxu0 %v5476_v1 }
 0x5f5   : > { %4312 = vmatprep.mubr.bf16.mxu0 %v5477_v11 }
 0x5f7   : > { %v4098_v37 = vpop.f32.mrb[64].mxu0 }
 0x5f8   : > { %v4099_v62 = vadd.f32 %v4098_v37, %v3427_v12  ;;  %v4100_v60 = vpop.f32.mrb[65].mxu0  ;;  %v3497_v37 = vpop.permute.xlu0 %3496 }
 0x5f9   : > { %v4101_v61 = vpop.f32.mrb[66].mxu0 }
 0x5fa   : > { %4353 = vst [vmem:[%s7292_s12] sm:$0xff] %v4099_v62  ;;  %v4102_v45 = vadd.f32 %v4101_v61, %v3432_v50  ;;  %v4103_v42 = vpop.f32.mrb[67].mxu0  ;;  %v3502_v50 = vpop.permute.xlu1 %3501 }
 0x5fc   : > { %4354 = vst [vmem:[%s7292_s12 + $0x8] sm:$0xff] %v4102_v45  ;;  %4313 = vmatmul.mubr.bf16.gmra.mrb[172].mxu0 %v5479_v30  ;;  %v3507_v42 = vpop.permute.xlu0 %3506 }
 0x5fd   : > { %4320 = vmatprep.mubr.bf16.mxu0 %v5480_v34 }
 0x5ff   : > { %v4106_v39 = vpop.f32.mrb[68].mxu0 }
 0x600   : > { %v4107_v13 = vadd.f32 %v4106_v39, %v3437_v14  ;;  %v4108_v15 = vpop.f32.mrb[69].mxu0 }
 0x601   : > { %v4109_v35 = vpop.f32.mrb[70].mxu0  ;;  %v3512_v15 = vpop.permute.xlu1 %3511 }
 0x602   : > { %4355 = vst [vmem:[%s7292_s12 + $0x10] sm:$0xff] %v4107_v13  ;;  %v4110_v28 = vadd.f32 %v4109_v35, %v3442_v3  ;;  %v4111_v48 = vpop.f32.mrb[71].mxu0 }
 0x604   : > { %4356 = vst [vmem:[%s7292_s12 + $0x18] sm:$0xff] %v4110_v28  ;;  %4321 = vmatmul.mubr.bf16.gmra.mrb[176].mxu0 %v5482_v17 }
 0x605   : > { %4328 = vmatprep.mubr.bf16.mxu0 %v5483_v6  ;;  %v3517_v6 = vpop.permute.xlu0 %3516 }
 0x607   : > { %v4114_v33 = vpop.f32.mrb[72].mxu0 }
 0x608   : > { %v4115_v21 = vadd.f32 %v4114_v33, %v3447_v44  ;;  %v4116_v63 = vpop.f32.mrb[73].mxu0  ;;  %v3522_v33 = vpop.permute.xlu1 %3521 }
 0x609   : > { %v4117_v57 = vpop.f32.mrb[74].mxu0 }
 0x60a   : > { %4357 = vst [vmem:[%s7292_s12 + $0x20] sm:$0xff] %v4115_v21  ;;  %v4118_v2 = vadd.f32 %v4117_v57, %v3452_v24  ;;  %v4119_v29 = vpop.f32.mrb[75].mxu0  ;;  %v3527_v24 = vpop.permute.xlu0 %3526 }
 0x60c   : > { %4358 = vst [vmem:[%s7292_s12 + $0x28] sm:$0xff] %v4118_v2  ;;  %4329 = vmatmul.mubr.bf16.gmra.mrb[180].mxu0 %v5485_v31  ;;  %v3532_v29 = vpop.permute.xlu1 %3531 }
 0x60d   : > { %4336 = vmatprep.mubr.bf16.mxu0 %v5486_v36 }
 0x60f   : > { %v4122_v40 = vpop.f32.mrb[76].mxu0 }
 0x610   : > { %v4123_v27 = vadd.f32 %v4122_v40, %v3457_v46  ;;  %v4124_v53 = vpop.f32.mrb[77].mxu0 }
 0x611   : > { %v4125_v47 = vpop.f32.mrb[78].mxu0  ;;  %v3537_v53 = vpop.permute.xlu0 %3536 }
 0x612   : > { %4359 = vst [vmem:[%s7292_s12 + $0x30] sm:$0xff] %v4123_v27  ;;  %v4126_v41 = vadd.f32 %v4125_v47, %v3462_v4  ;;  %v4127_v51 = vpop.f32.mrb[79].mxu0 }
 0x614   : > { %4360 = vst [vmem:[%s7292_s12 + $0x38] sm:$0xff] %v4126_v41  ;;  %4337 = vmatmul.mubr.bf16.gmra.mrb[184].mxu0 %v5488_v10 }
 0x615   : > { %4344 = vmatprep.mubr.bf16.mxu0 %v5489_v55  ;;  %v3542_v55 = vpop.permute.xlu1 %3541 }
 0x617   : > { %v4130_v25 = vpop.f32.mrb[80].mxu0 }
 0x618   : > { %v4131_v16 = vadd.f32 %v4130_v25, %v3467_v8  ;;  %v4132_v59 = vpop.f32.mrb[81].mxu0  ;;  %v3547_v25 = vpop.permute.xlu0 %3546 }
 0x619   : > { %v4133_v32 = vpop.f32.mrb[82].mxu0 }
 0x61a   : > { %4361 = vst [vmem:[%s7292_s12 + $0x40] sm:$0xff] %v4131_v16  ;;  %v4134_v20 = vadd.f32 %v4133_v32, %v3472_v43  ;;  %v4135_v5 = vpop.f32.mrb[83].mxu0  ;;  %v3552_v43 = vpop.permute.xlu1 %3551 }
 0x61c   : > { %4362 = vst [vmem:[%s7292_s12 + $0x48] sm:$0xff] %v4134_v20  ;;  %4345 = vmatmul.mubr.bf16.gmra.mrb[188].mxu0 %v5491_v22 }
 0x61f   : > { %v4138_v58 = vpop.f32.mrb[84].mxu0 }
 0x620   : > { %v4139_v18 = vadd.f32 %v4138_v58, %v3477_v9  ;;  %v4140_v56 = vpop.f32.mrb[85].mxu0  ;;  %v3557_v9 = vpop.permute.xlu0 %3556 }
 0x621   : > { %v4141_v52 = vpop.f32.mrb[86].mxu0 }
 0x622   : > { %4363 = vst [vmem:[%s7292_s12 + $0x50] sm:$0xff] %v4139_v18  ;;  %v4142_v26 = vadd.f32 %v4141_v52, %v3482_v38  ;;  %v4143_v7 = vpop.f32.mrb[87].mxu0  ;;  %v3562_v38 = vpop.permute.xlu1 %3561 }
 0x624   : > { %4364 = vst [vmem:[%s7292_s12 + $0x58] sm:$0xff] %v4142_v26 }
 0x627   : > { %v4146_v49 = vpop.f32.mrb[88].mxu0 }
 0x628   : > { %v4147_v23 = vadd.f32 %v4146_v49, %v3487_v0  ;;  %v4148_v19 = vpop.f32.mrb[89].mxu0  ;;  %v3567_v0 = vpop.permute.xlu0 %3566 }
 0x629   : > { %v4149_v1 = vpop.f32.mrb[90].mxu0 }
 0x62a   : > { %4365 = vst [vmem:[%s7292_s12 + $0x60] sm:$0xff] %v4147_v23  ;;  %v4150_v11 = vadd.f32 %v4149_v1, %v3492_v54  ;;  %v4151_v12 = vpop.f32.mrb[91].mxu0  ;;  %v3572_v54 = vpop.permute.xlu1 %3571 }
 0x62c   : > { %4366 = vst [vmem:[%s7292_s12 + $0x68] sm:$0xff] %v4150_v11 }
 0x62f   : > { %v4154_v62 = vpop.f32.mrb[92].mxu0 }
 0x630   : > { %v4155_v60 = vadd.f32 %v4154_v62, %v3497_v37  ;;  %v4156_v30 = vpop.f32.mrb[93].mxu0  ;;  %v3577_v37 = vpop.permute.xlu0 %3576 }
 0x631   : > { %v4157_v61 = vpop.f32.mrb[94].mxu0 }
 0x632   : > { %4367 = vst [vmem:[%s7292_s12 + $0x70] sm:$0xff] %v4155_v60  ;;  %v4158_v34 = vadd.f32 %v4157_v61, %v3502_v50  ;;  %v4159_v45 = vpop.f32.mrb[95].mxu0  ;;  %v3582_v50 = vpop.permute.xlu1 %3581 }
 0x634   : > { %4368 = vst [vmem:[%s7292_s12 + $0x78] sm:$0xff] %v4158_v34 }
 0x637   : > { %v4162_v14 = vpop.f32.mrb[96].mxu0 }
 0x638   : > { %v4163_v39 = vadd.f32 %v4162_v14, %v3507_v42  ;;  %v4164_v13 = vpop.f32.mrb[97].mxu0  ;;  %v3587_v42 = vpop.permute.xlu0 %3586 }
 0x639   : > { %v4165_v17 = vpop.f32.mrb[98].mxu0 }
 0x63a   : > { %4369 = vst [vmem:[%s7292_s12 + $0x80] sm:$0xff] %v4163_v39  ;;  %v4166_v3 = vadd.f32 %v4165_v17, %v3512_v15  ;;  %v4167_v35 = vpop.f32.mrb[99].mxu0  ;;  %v3592_v15 = vpop.permute.xlu1 %3591 }
 0x63c   : > { %4370 = vst [vmem:[%s7292_s12 + $0x88] sm:$0xff] %v4166_v3 }
 0x63f   : > { %v4170_v28 = vpop.f32.mrb[100].mxu0 }
 0x640   : > { %v4171_v48 = vadd.f32 %v4170_v28, %v3517_v6  ;;  %v4172_v44 = vpop.f32.mrb[101].mxu0  ;;  %v3597_v6 = vpop.permute.xlu0 %3596 }
 0x641   : > { %v4173_v21 = vpop.f32.mrb[102].mxu0 }
 0x642   : > { %4371 = vst [vmem:[%s7292_s12 + $0x90] sm:$0xff] %v4171_v48  ;;  %v4174_v63 = vadd.f32 %v4173_v21, %v3522_v33  ;;  %v4175_v31 = vpop.f32.mrb[103].mxu0  ;;  %v3602_v33 = vpop.permute.xlu1 %3601 }
 0x644   : > { %4372 = vst [vmem:[%s7292_s12 + $0x98] sm:$0xff] %v4174_v63 }
 0x647   : > { %v4178_v57 = vpop.f32.mrb[104].mxu0 }
 0x648   : > { %v4179_v36 = vadd.f32 %v4178_v57, %v3527_v24  ;;  %v4180_v2 = vpop.f32.mrb[105].mxu0  ;;  %v3607_v24 = vpop.permute.xlu0 %3606 }
 0x649   : > { %v4181_v46 = vpop.f32.mrb[106].mxu0 }
 0x64a   : > { %4373 = vst [vmem:[%s7292_s12 + $0xa0] sm:$0xff] %v4179_v36  ;;  %v4182_v40 = vadd.f32 %v4181_v46, %v3532_v29  ;;  %v4183_v27 = vpop.f32.mrb[107].mxu0  ;;  %v3612_v29 = vpop.permute.xlu1 %3611 }
 0x64c   : > { %4374 = vst [vmem:[%s7292_s12 + $0xa8] sm:$0xff] %v4182_v40 }
 0x64f   : > { %v4186_v10 = vpop.f32.mrb[108].mxu0 }
 0x650   : > { %v4187_v4 = vadd.f32 %v4186_v10, %v3537_v53  ;;  %v4188_v47 = vpop.f32.mrb[109].mxu0  ;;  %v3617_v53 = vpop.permute.xlu0 %3616 }
 0x651   : > { %v4189_v41 = vpop.f32.mrb[110].mxu0 }
 0x652   : > { %4375 = vst [vmem:[%s7292_s12 + $0xb0] sm:$0xff] %v4187_v4  ;;  %v4190_v51 = vadd.f32 %v4189_v41, %v3542_v55  ;;  %v4191_v8 = vpop.f32.mrb[111].mxu0  ;;  %v3622_v55 = vpop.permute.xlu1 %3621 }
 0x654   : > { %4376 = vst [vmem:[%s7292_s12 + $0xb8] sm:$0xff] %v4190_v51 }
 0x657   : > { %v4194_v16 = vpop.f32.mrb[112].mxu0 }
 0x658   : > { %v4195_v59 = vadd.f32 %v4194_v16, %v3547_v25  ;;  %v4196_v22 = vpop.f32.mrb[113].mxu0  ;;  %v3627_v25 = vpop.permute.xlu0 %3626 }
 0x659   : > { %v4197_v32 = vpop.f32.mrb[114].mxu0 }
 0x65a   : > { %4377 = vst [vmem:[%s7292_s12 + $0xc0] sm:$0xff] %v4195_v59  ;;  %v4198_v20 = vadd.f32 %v4197_v32, %v3552_v43  ;;  %v4199_v5 = vpop.f32.mrb[115].mxu0  ;;  %v3632_v43 = vpop.permute.xlu1 %3631 }
 0x65c   : > { %4378 = vst [vmem:[%s7292_s12 + $0xc8] sm:$0xff] %v4198_v20 }
 0x65f   : > { %v4202_v58 = vpop.f32.mrb[116].mxu0 }
 0x660   : > { %v4203_v18 = vadd.f32 %v4202_v58, %v3557_v9  ;;  %v4204_v56 = vpop.f32.mrb[117].mxu0  ;;  %v3637_v9 = vpop.permute.xlu0 %3636 }
 0x661   : > { %v4205_v52 = vpop.f32.mrb[118].mxu0 }
 0x662   : > { %4379 = vst [vmem:[%s7292_s12 + $0xd0] sm:$0xff] %v4203_v18  ;;  %v4206_v26 = vadd.f32 %v4205_v52, %v3562_v38  ;;  %v4207_v7 = vpop.f32.mrb[119].mxu0  ;;  %v3642_v38 = vpop.permute.xlu1 %3641 }
 0x664   : > { %4380 = vst [vmem:[%s7292_s12 + $0xd8] sm:$0xff] %v4206_v26 }
 0x667   : > { %v4210_v49 = vpop.f32.mrb[120].mxu0 }
 0x668   : > { %v4211_v23 = vadd.f32 %v4210_v49, %v3567_v0  ;;  %v4212_v19 = vpop.f32.mrb[121].mxu0  ;;  %v3647_v0 = vpop.permute.xlu0 %3646 }
 0x669   : > { %v4213_v1 = vpop.f32.mrb[122].mxu0 }
 0x66a   : > { %4381 = vst [vmem:[%s7292_s12 + $0xe0] sm:$0xff] %v4211_v23  ;;  %v4214_v11 = vadd.f32 %v4213_v1, %v3572_v54  ;;  %v4215_v12 = vpop.f32.mrb[123].mxu0  ;;  %v3652_v54 = vpop.permute.xlu1 %3651 }
 0x66c   : > { %4382 = vst [vmem:[%s7292_s12 + $0xe8] sm:$0xff] %v4214_v11 }
 0x66f   : > { %v4218_v62 = vpop.f32.mrb[124].mxu0 }
 0x670   : > { %v4219_v60 = vadd.f32 %v4218_v62, %v3577_v37  ;;  %v4220_v30 = vpop.f32.mrb[125].mxu0  ;;  %v3657_v37 = vpop.permute.xlu0 %3656 }
 0x671   : > { %v4221_v61 = vpop.f32.mrb[126].mxu0 }
 0x672   : > { %4383 = vst [vmem:[%s7292_s12 + $0xf0] sm:$0xff] %v4219_v60  ;;  %v4222_v34 = vadd.f32 %v4221_v61, %v3582_v50  ;;  %v4223_v45 = vpop.f32.mrb[127].mxu0  ;;  %v3662_v50 = vpop.permute.xlu1 %3661 }
 0x674   : > { %4384 = vst [vmem:[%s7292_s12 + $0xf8] sm:$0xff] %v4222_v34 }
 0x677   : > { %v4226_v14 = vpop.f32.mrb[128].mxu0 }
 0x678   : > { %v4227_v39 = vadd.f32 %v4226_v14, %v3587_v42  ;;  %v4228_v13 = vpop.f32.mrb[129].mxu0  ;;  %v3667_v42 = vpop.permute.xlu0 %3666 }
 0x679   : > { %v4229_v17 = vpop.f32.mrb[130].mxu0 }
 0x67a   : > { %4385 = vst [vmem:[%s7292_s12 + $0x100] sm:$0xff] %v4227_v39  ;;  %v4230_v3 = vadd.f32 %v4229_v17, %v3592_v15  ;;  %v4231_v35 = vpop.f32.mrb[131].mxu0  ;;  %v3672_v15 = vpop.permute.xlu1 %3671 }
 0x67c   : > { %4386 = vst [vmem:[%s7292_s12 + $0x108] sm:$0xff] %v4230_v3 }
 0x67f   : > { %v4234_v28 = vpop.f32.mrb[132].mxu0 }
 0x680   : > { %v4235_v48 = vadd.f32 %v4234_v28, %v3597_v6  ;;  %v4236_v44 = vpop.f32.mrb[133].mxu0  ;;  %v3677_v6 = vpop.permute.xlu0 %3676 }
 0x681   : > { %v4237_v21 = vpop.f32.mrb[134].mxu0 }
 0x682   : > { %4387 = vst [vmem:[%s7292_s12 + $0x110] sm:$0xff] %v4235_v48  ;;  %v4238_v63 = vadd.f32 %v4237_v21, %v3602_v33  ;;  %v4239_v31 = vpop.f32.mrb[135].mxu0  ;;  %v3682_v33 = vpop.permute.xlu1 %3681 }
 0x684   : > { %4388 = vst [vmem:[%s7292_s12 + $0x118] sm:$0xff] %v4238_v63 }
 0x687   : > { %v4242_v57 = vpop.f32.mrb[136].mxu0 }
 0x688   : > { %v4243_v36 = vadd.f32 %v4242_v57, %v3607_v24  ;;  %v4244_v2 = vpop.f32.mrb[137].mxu0  ;;  %v3687_v24 = vpop.permute.xlu0 %3686 }
 0x689   : > { %v4245_v46 = vpop.f32.mrb[138].mxu0 }
 0x68a   : > { %4389 = vst [vmem:[%s7292_s12 + $0x120] sm:$0xff] %v4243_v36  ;;  %v4246_v40 = vadd.f32 %v4245_v46, %v3612_v29  ;;  %v4247_v27 = vpop.f32.mrb[139].mxu0  ;;  %v3692_v29 = vpop.permute.xlu1 %3691 }
 0x68c   : > { %4390 = vst [vmem:[%s7292_s12 + $0x128] sm:$0xff] %v4246_v40 }
 0x68f   : > { %v4250_v10 = vpop.f32.mrb[140].mxu0 }
 0x690   : > { %v4251_v4 = vadd.f32 %v4250_v10, %v3617_v53  ;;  %v4252_v47 = vpop.f32.mrb[141].mxu0  ;;  %v3697_v53 = vpop.permute.xlu0 %3696 }
 0x691   : > { %v4253_v41 = vpop.f32.mrb[142].mxu0 }
 0x692   : > { %4391 = vst [vmem:[%s7292_s12 + $0x130] sm:$0xff] %v4251_v4  ;;  %v4254_v51 = vadd.f32 %v4253_v41, %v3622_v55  ;;  %v4255_v8 = vpop.f32.mrb[143].mxu0  ;;  %v3702_v55 = vpop.permute.xlu1 %3701 }
 0x694   : > { %4392 = vst [vmem:[%s7292_s12 + $0x138] sm:$0xff] %v4254_v51 }
 0x697   : > { %v4258_v16 = vpop.f32.mrb[144].mxu0 }
 0x698   : > { %v4259_v59 = vadd.f32 %v4258_v16, %v3627_v25  ;;  %v4260_v22 = vpop.f32.mrb[145].mxu0  ;;  %v3707_v25 = vpop.permute.xlu0 %3706 }
 0x699   : > { %v4261_v32 = vpop.f32.mrb[146].mxu0 }
 0x69a   : > { %4393 = vst [vmem:[%s7292_s12 + $0x140] sm:$0xff] %v4259_v59  ;;  %v4262_v20 = vadd.f32 %v4261_v32, %v3632_v43  ;;  %v4263_v5 = vpop.f32.mrb[147].mxu0  ;;  %v3712_v43 = vpop.permute.xlu1 %3711 }
 0x69c   : > { %4394 = vst [vmem:[%s7292_s12 + $0x148] sm:$0xff] %v4262_v20 }
 0x69f   : > { %v4266_v58 = vpop.f32.mrb[148].mxu0 }
 0x6a0   : > { %v4267_v18 = vadd.f32 %v4266_v58, %v3637_v9  ;;  %v4268_v56 = vpop.f32.mrb[149].mxu0  ;;  %v3717_v9 = vpop.permute.xlu0 %3716 }
 0x6a1   : > { %v4269_v52 = vpop.f32.mrb[150].mxu0 }
 0x6a2   : > { %4395 = vst [vmem:[%s7292_s12 + $0x150] sm:$0xff] %v4267_v18  ;;  %v4270_v26 = vadd.f32 %v4269_v52, %v3642_v38  ;;  %v4271_v7 = vpop.f32.mrb[151].mxu0  ;;  %v3722_v38 = vpop.permute.xlu1 %3721 }
 0x6a4   : > { %4396 = vst [vmem:[%s7292_s12 + $0x158] sm:$0xff] %v4270_v26 }
 0x6a7   : > { %v4274_v49 = vpop.f32.mrb[152].mxu0 }
 0x6a8   : > { %v4275_v23 = vadd.f32 %v4274_v49, %v3647_v0  ;;  %v4276_v19 = vpop.f32.mrb[153].mxu0  ;;  %v3727_v0 = vpop.permute.xlu0 %3726 }
 0x6a9   : > { %v4277_v1 = vpop.f32.mrb[154].mxu0 }
 0x6aa   : > { %4397 = vst [vmem:[%s7292_s12 + $0x160] sm:$0xff] %v4275_v23  ;;  %v4278_v11 = vadd.f32 %v4277_v1, %v3652_v54  ;;  %v4279_v12 = vpop.f32.mrb[155].mxu0  ;;  %v3732_v54 = vpop.permute.xlu1 %3731 }
 0x6ac   : > { %4398 = vst [vmem:[%s7292_s12 + $0x168] sm:$0xff] %v4278_v11 }
 0x6af   : > { %v4282_v62 = vpop.f32.mrb[156].mxu0 }
 0x6b0   : > { %v4283_v60 = vadd.f32 %v4282_v62, %v3657_v37  ;;  %v4284_v30 = vpop.f32.mrb[157].mxu0  ;;  %v3737_v37 = vpop.permute.xlu0 %3736 }
 0x6b1   : > { %v4285_v61 = vpop.f32.mrb[158].mxu0 }
 0x6b2   : > { %4399 = vst [vmem:[%s7292_s12 + $0x170] sm:$0xff] %v4283_v60  ;;  %v4286_v34 = vadd.f32 %v4285_v61, %v3662_v50  ;;  %v4287_v45 = vpop.f32.mrb[159].mxu0  ;;  %v3742_v50 = vpop.permute.xlu1 %3741 }
 0x6b4   : > { %4400 = vst [vmem:[%s7292_s12 + $0x178] sm:$0xff] %v4286_v34 }
 0x6b7   : > { %v4290_v14 = vpop.f32.mrb[160].mxu0 }
 0x6b8   : > { %v4291_v39 = vadd.f32 %v4290_v14, %v3667_v42  ;;  %v4292_v13 = vpop.f32.mrb[161].mxu0 }
 0x6b9   : > { %v4293_v17 = vpop.f32.mrb[162].mxu0 }
 0x6ba   : > { %4401 = vst [vmem:[%s7292_s12 + $0x180] sm:$0xff] %v4291_v39  ;;  %v4294_v3 = vadd.f32 %v4293_v17, %v3672_v15  ;;  %v4295_v35 = vpop.f32.mrb[163].mxu0 }
 0x6bc   : > { %4402 = vst [vmem:[%s7292_s12 + $0x188] sm:$0xff] %v4294_v3 }
 0x6bf   : > { %v4298_v28 = vpop.f32.mrb[164].mxu0 }
 0x6c0   : > { %v4299_v48 = vadd.f32 %v4298_v28, %v3677_v6  ;;  %v4300_v44 = vpop.f32.mrb[165].mxu0 }
 0x6c1   : > { %v4301_v21 = vpop.f32.mrb[166].mxu0 }
 0x6c2   : > { %4403 = vst [vmem:[%s7292_s12 + $0x190] sm:$0xff] %v4299_v48  ;;  %v4302_v63 = vadd.f32 %v4301_v21, %v3682_v33  ;;  %v4303_v31 = vpop.f32.mrb[167].mxu0 }
 0x6c4   : > { %4404 = vst [vmem:[%s7292_s12 + $0x198] sm:$0xff] %v4302_v63 }
 0x6c7   : > { %v4306_v57 = vpop.f32.mrb[168].mxu0 }
 0x6c8   : > { %v4307_v36 = vadd.f32 %v4306_v57, %v3687_v24  ;;  %v4308_v2 = vpop.f32.mrb[169].mxu0 }
 0x6c9   : > { %v4309_v46 = vpop.f32.mrb[170].mxu0 }
 0x6ca   : > { %4405 = vst [vmem:[%s7292_s12 + $0x1a0] sm:$0xff] %v4307_v36  ;;  %v4310_v40 = vadd.f32 %v4309_v46, %v3692_v29  ;;  %v4311_v27 = vpop.f32.mrb[171].mxu0 }
 0x6cc   : > { %4406 = vst [vmem:[%s7292_s12 + $0x1a8] sm:$0xff] %v4310_v40 }
 0x6cf   : > { %v4314_v10 = vpop.f32.mrb[172].mxu0 }
 0x6d0   : > { %v4315_v4 = vadd.f32 %v4314_v10, %v3697_v53  ;;  %v4316_v47 = vpop.f32.mrb[173].mxu0 }
 0x6d1   : > { %v4317_v41 = vpop.f32.mrb[174].mxu0 }
 0x6d2   : > { %4407 = vst [vmem:[%s7292_s12 + $0x1b0] sm:$0xff] %v4315_v4  ;;  %v4318_v51 = vadd.f32 %v4317_v41, %v3702_v55  ;;  %v4319_v8 = vpop.f32.mrb[175].mxu0 }
 0x6d4   : > { %4408 = vst [vmem:[%s7292_s12 + $0x1b8] sm:$0xff] %v4318_v51 }
 0x6d7   : > { %v4322_v16 = vpop.f32.mrb[176].mxu0 }
 0x6d8   : > { %v4323_v59 = vadd.f32 %v4322_v16, %v3707_v25  ;;  %v4324_v22 = vpop.f32.mrb[177].mxu0 }
 0x6d9   : > { %v4325_v32 = vpop.f32.mrb[178].mxu0 }
 0x6da   : > { %4409 = vst [vmem:[%s7292_s12 + $0x1c0] sm:$0xff] %v4323_v59  ;;  %v4326_v20 = vadd.f32 %v4325_v32, %v3712_v43  ;;  %v4327_v5 = vpop.f32.mrb[179].mxu0 }
 0x6dc   : > { %4410 = vst [vmem:[%s7292_s12 + $0x1c8] sm:$0xff] %v4326_v20 }
 0x6df   : > { %v4330_v58 = vpop.f32.mrb[180].mxu0 }
 0x6e0   : > { %v4331_v18 = vadd.f32 %v4330_v58, %v3717_v9  ;;  %v4332_v56 = vpop.f32.mrb[181].mxu0 }
 0x6e1   : > { %v4333_v52 = vpop.f32.mrb[182].mxu0 }
 0x6e2   : > { %4411 = vst [vmem:[%s7292_s12 + $0x1d0] sm:$0xff] %v4331_v18  ;;  %v4334_v26 = vadd.f32 %v4333_v52, %v3722_v38  ;;  %v4335_v7 = vpop.f32.mrb[183].mxu0 }
 0x6e4   : > { %4412 = vst [vmem:[%s7292_s12 + $0x1d8] sm:$0xff] %v4334_v26 }
 0x6e7   : > { %v4338_v49 = vpop.f32.mrb[184].mxu0 }
 0x6e8   : > { %v4339_v23 = vadd.f32 %v4338_v49, %v3727_v0  ;;  %v4340_v19 = vpop.f32.mrb[185].mxu0 }
 0x6e9   : > { %v4341_v1 = vpop.f32.mrb[186].mxu0 }
 0x6ea   : > { %4413 = vst [vmem:[%s7292_s12 + $0x1e0] sm:$0xff] %v4339_v23  ;;  %v4342_v11 = vadd.f32 %v4341_v1, %v3732_v54  ;;  %v4343_v12 = vpop.f32.mrb[187].mxu0 }
 0x6ec   : > { %4414 = vst [vmem:[%s7292_s12 + $0x1e8] sm:$0xff] %v4342_v11 }
 0x6ef   : > { %v4346_v62 = vpop.f32.mrb[188].mxu0 }
 0x6f0   : > { %v4347_v60 = vadd.f32 %v4346_v62, %v3737_v37  ;;  %v4348_v30 = vpop.f32.mrb[189].mxu0 }
 0x6f1   : > { %v4349_v61 = vpop.f32.mrb[190].mxu0 }
 0x6f2   : > { %4415 = vst [vmem:[%s7292_s12 + $0x1f0] sm:$0xff] %v4347_v60  ;;  %v4350_v34 = vadd.f32 %v4349_v61, %v3742_v50  ;;  %v4351_v45 = vpop.f32.mrb[191].mxu0 }
 0x6f4   : > { %4416 = vst [vmem:[%s7292_s12 + $0x1f8] sm:$0xff] %v4350_v34 }
 0x6f5 PF: > { %s21_s19 = sadd.s32 1, %s5514_s19   ;;  %s7462_s17 = smov %s5510_s18 }
 0x6f6   : > { %p18_p5 = scmp.ge.s32.totalorder %s21_s19, 4   ;;  %s7463_s18 = smov %s7465_s20 }
 0x6f8   :  { %20 = sbr.rel (!%p18_p5) target bundleno = 2 (0x2), region = 94 }

</bundles_post_ra>
